<compile_context>
chip_gen: v6e
topology: v6e:2x2x1
jax: 0.10.0
libtpu: 0.0.40
codegen_flags: <defaults>
</compile_context>

<pallas_src>
import functools

import jax
import jax.numpy as jnp
from jax.experimental import pallas as pl
from jax.experimental.pallas import tpu as pltpu


# ----------------------------------------------------------------------------
# Fused kernel: Conv3x3(+bias,+ReLU) -> global avg pool -> Linear  (one image)
# ----------------------------------------------------------------------------
def _fused_densenet_kernel(xp_ref, wk_ref, bc_ref, wl_ref, bl_ref, out_ref,
                           acc_ref, *, H, W):
    # xp_ref : (1, H+2, W+2, Cin) f32   padded input for this grid step (image)
    # wk_ref : (9, Cin, Cout)     bf16  conv weights, tap k = dy*3 + dx
    # bc_ref : (1, Cout)          f32   conv bias
    # wl_ref : (Cout, NP)         bf16  linear weight, classes padded to NP=128
    # bl_ref : (1, NP)            f32   linear bias (zero in padded columns)
    # out_ref: (1, 1, NP)         f32   padded logits for this image
    # acc_ref: (H*W, Cout)        f32   VMEM scratch accumulator
    Cin = xp_ref.shape[-1]
    Cout = wk_ref.shape[-1]
    NP = wl_ref.shape[-1]
    HW = H * W

    # 3x3 "same" conv as 9 statically-unrolled shifted matmuls on the MXU.
    # bf16 operands, f32 accumulation in the VMEM scratch (keeps the (HW, Cout)
    # accumulator out of the vreg file, per review).
    for k in range(9):
        dy, dx = divmod(k, 3)
        patch = xp_ref[0, dy:dy + H, dx:dx + W, :].reshape(HW, Cin)
        contrib = jnp.dot(patch.astype(jnp.bfloat16), wk_ref[k],
                          preferred_element_type=jnp.float32)
        if k == 0:
            acc_ref[...] = contrib            # first tap: plain store (no zero-init)
        else:
            acc_ref[...] += contrib

    # bias + ReLU + adaptive_avg_pool2d((1,1)) fused epilogue (all f32).
    act = jnp.maximum(acc_ref[...] + bc_ref[0, :], 0.0)            # (HW, Cout)
    pooled = jnp.sum(act, axis=0, keepdims=True) * (1.0 / HW)       # (1, Cout)

    # Dropout is eval-mode identity.
    # TODO(synk): training-mode dropout would use pltpu.prng_seed/prng_random_bits.
    logits = jnp.dot(pooled.astype(jnp.bfloat16), wl_ref[...],
                     preferred_element_type=jnp.float32) + bl_ref[0, :]  # (1, NP)
    out_ref[...] = logits.reshape(1, 1, NP)


# ----------------------------------------------------------------------------
# Wrapper (accepts PyTorch NCHW layout)
# ----------------------------------------------------------------------------
def densenet_custom_forward(x_nchw, params):
    x_nhwc = jnp.transpose(x_nchw, (0, 2, 3, 1)).astype(jnp.float32)
    B, H, W, Cin = x_nhwc.shape
    Cout = params["conv_w_k"].shape[-1]
    NP = params["lin_w_t_pad"].shape[-1]
    n_class = params["n_class"]
    Hp, Wp = H + 2, W + 2

    x_pad = jnp.pad(x_nhwc, ((0, 0), (1, 1), (1, 1), (0, 0)))  # SAME halo

    kernel = functools.partial(_fused_densenet_kernel, H=H, W=W)
    out_padded = pl.pallas_call(
        kernel,
        out_shape=jax.ShapeDtypeStruct((B, 1, NP), jnp.float32),
        grid_spec=pltpu.PrefetchScalarGridSpec(
            num_scalar_prefetch=0,
            grid=(B,),
            in_specs=[
                pl.BlockSpec((1, Hp, Wp, Cin), lambda b: (b, 0, 0, 0)),
                pl.BlockSpec((9, Cin, Cout), lambda b: (0, 0, 0)),
                pl.BlockSpec((1, Cout), lambda b: (0, 0)),
                pl.BlockSpec((Cout, NP), lambda b: (0, 0)),
                pl.BlockSpec((1, NP), lambda b: (0, 0)),
            ],
            out_specs=pl.BlockSpec((1, 1, NP), lambda b: (b, 0, 0)),
            scratch_shapes=[pltpu.VMEM((H * W, Cout), jnp.float32)],
        ),
        compiler_params=pltpu.CompilerParams(
            dimension_semantics=("parallel",),      # v7x: one image per TensorCore
            vmem_limit_bytes=32 * 1024 * 1024,      # explicit (v7x has 64 MiB VMEM)
        ),
    )(x_pad, params["conv_w_k"], params["conv_b"],
      params["lin_w_t_pad"], params["lin_b_pad"])

    # drop the padded (zero-weight) classes -> (B, n_class)
    return out_padded.reshape(B, NP)[:, :n_class]


# ----------------------------------------------------------------------------
# Parameter construction (deterministic, torch layouts kept as f32 masters)
# ----------------------------------------------------------------------------
def init_params(key, cin, feat_size, n_class):
    k1, k2, k3, k4 = jax.random.split(key, 4)
    conv_w = jax.random.normal(k1, (feat_size, cin, 3, 3), jnp.float32) * 0.1  # OIHW
    conv_b = jax.random.normal(k2, (feat_size,), jnp.float32) * 0.1
    lin_w = jax.random.normal(k3, (n_class, feat_size), jnp.float32) * 0.1     # (out,in)
    lin_b = jax.random.normal(k4, (n_class,), jnp.float32) * 0.1

    # conv weights repacked for the kernel: (9, Cin, Cout), tap k = dy*3 + dx
    conv_w_k = jnp.transpose(conv_w, (2, 3, 1, 0)).reshape(9, cin, feat_size)

    # linear weight/bias padded to a lane-dense 128-class slab (extra cols = 0)
    n_pad = ((n_class + 127) // 128) * 128
    lin_w_t_pad = jnp.zeros((feat_size, n_pad), jnp.float32)
    lin_w_t_pad = lin_w_t_pad.at[:, :n_class].set(lin_w.T)
    lin_b_pad = jnp.zeros((1, n_pad), jnp.float32).at[0, :n_class].set(lin_b)

    return {
        "conv_w_k": conv_w_k.astype(jnp.bfloat16),
        "conv_b": conv_b.reshape(1, feat_size),
        "lin_w_t_pad": lin_w_t_pad.astype(jnp.bfloat16),
        "lin_b_pad": lin_b_pad,
        "n_class": n_class,
        # f32 masters for the reference
        "_conv_w_oihw": conv_w, "_conv_b": conv_b,
        "_lin_w": lin_w, "_lin_b": lin_b,
    }


# ----------------------------------------------------------------------------
# Pure-JAX reference (mirrors the kernel's bf16 quantization points, f32 math)
# ----------------------------------------------------------------------------
def reference_forward(x_nchw, params):
    f32 = jnp.float32
    xq = x_nchw.astype(jnp.bfloat16).astype(f32)
    wq = params["_conv_w_oihw"].astype(jnp.bfloat16).astype(f32)
    y = jax.lax.conv_general_dilated(
        xq, wq, window_strides=(1, 1), padding="SAME",
        dimension_numbers=("NCHW", "OIHW", "NCHW"),
        precision=jax.lax.Precision.HIGHEST)
    y = y + params["_conv_b"][None, :, None, None]
    y = jnp.maximum(y, 0.0)
    pooled = jnp.mean(y, axis=(2, 3))                                # (B, feat)
    pooledq = pooled.astype(jnp.bfloat16).astype(f32)
    wlq = params["_lin_w"].astype(jnp.bfloat16).astype(f32)
    return jnp.dot(pooledq, wlq.T,
                   precision=jax.lax.Precision.HIGHEST) + params["_lin_b"]


if __name__ == "__main__":
    B, Cin, H, W = 2, 4, 16, 16
    feat_size, n_class = 32, 10

    key = jax.random.PRNGKey(0)
    kx, kp = jax.random.split(key)
    x = jax.random.normal(kx, (B, Cin, H, W), jnp.float32)
    params = init_params(kp, Cin, feat_size, n_class)

    out = jax.block_until_ready(densenet_custom_forward(x, params))
    ref = jax.block_until_ready(reference_forward(x, params))

    assert out.shape == (B, n_class), out.shape
    assert jnp.allclose(out, ref, atol=2e-3, rtol=2e-3), (out, ref)

    print("KERNEL_OK")
</pallas_src>

<mosaic_0001>
module attributes {stable_mosaic.version = 11 : i64} {
  func.func @_fused_densenet_kernel(%arg0: i32, %arg1: memref<1x18x18x4xf32, #tpu.memory_space<vmem>>, %arg2: memref<9x4x32xbf16, #tpu.memory_space<vmem>>, %arg3: memref<1x32xf32, #tpu.memory_space<vmem>>, %arg4: memref<32x128xbf16, #tpu.memory_space<vmem>>, %arg5: memref<1x128xf32, #tpu.memory_space<vmem>>, %arg6: memref<1x1x128xf32, #tpu.memory_space<vmem>>, %arg7: memref<256x32xf32, #tpu.memory_space<vmem>>) attributes {dimension_semantics = [#tpu.dimension_semantics<parallel>], iteration_bounds = array<i64: 2>, scalar_prefetch = 0 : i64, scratch_operands = 1 : i64, tpu.core_type = #tpu.core_type<tc>, window_params = [{transform_indices = @transform_0, window_bounds = array<i64: 1, 18, 18, 4>}, {pipeline_mode = #tpu.pipeline_mode<synchronous>, transform_indices = @transform_1, window_bounds = array<i64: 9, 4, 32>}, {pipeline_mode = #tpu.pipeline_mode<synchronous>, transform_indices = @transform_2, window_bounds = array<i64: 1, 32>}, {pipeline_mode = #tpu.pipeline_mode<synchronous>, transform_indices = @transform_3, window_bounds = array<i64: 32, 128>}, {pipeline_mode = #tpu.pipeline_mode<synchronous>, transform_indices = @transform_4, window_bounds = array<i64: 1, 128>}, {transform_indices = @transform_5, window_bounds = array<i64: 1, 1, 128>}]} {
    %c0 = arith.constant 0 : index
    %c0_0 = arith.constant 0 : index
    %c0_1 = arith.constant 0 : index
    %c0_2 = arith.constant 0 : index
    %0 = vector.load %arg1[%c0, %c0_0, %c0_1, %c0_2] : memref<1x18x18x4xf32, #tpu.memory_space<vmem>>, vector<1x16x16x4xf32>
    %1 = vector.shape_cast %0 : vector<1x16x16x4xf32> to vector<16x16x4xf32>
    %2 = vector.shape_cast %1 : vector<16x16x4xf32> to vector<256x4xf32>
    %3 = arith.truncf %2 : vector<256x4xf32> to vector<256x4xbf16>
    %c0_3 = arith.constant 0 : index
    %c0_4 = arith.constant 0 : index
    %c0_5 = arith.constant 0 : index
    %4 = vector.load %arg2[%c0_3, %c0_4, %c0_5] : memref<9x4x32xbf16, #tpu.memory_space<vmem>>, vector<1x4x32xbf16>
    %5 = vector.shape_cast %4 : vector<1x4x32xbf16> to vector<4x32xbf16>
    %cst = arith.constant dense<0.000000e+00> : vector<256x32xf32>
    %6 = tpu.matmul %3, %5, %cst {dimension_numbers = #tpu.dot_dimension_numbers<[1], [0], [0], [1], [0, 0, 1, 1], [], []>} : vector<256x4xbf16>, vector<4x32xbf16>, vector<256x32xf32> -> vector<256x32xf32>
    %c0_6 = arith.constant 0 : index
    %c0_7 = arith.constant 0 : index
    %7 = vector.load %arg7[%c0_6, %c0_7] : memref<256x32xf32, #tpu.memory_space<vmem>>, vector<256x32xf32>
    tpu.vector_store %arg7[%c0_6, %c0_7], %6 {strides = array<i32>} : memref<256x32xf32, #tpu.memory_space<vmem>>, vector<256x32xf32>,
    %c0_8 = arith.constant 0 : index
    %c0_9 = arith.constant 0 : index
    %c1 = arith.constant 1 : index
    %c0_10 = arith.constant 0 : index
    %8 = vector.load %arg1[%c0_8, %c0_9, %c1, %c0_10] : memref<1x18x18x4xf32, #tpu.memory_space<vmem>>, vector<1x16x16x4xf32>
    %9 = vector.shape_cast %8 : vector<1x16x16x4xf32> to vector<16x16x4xf32>
    %10 = vector.shape_cast %9 : vector<16x16x4xf32> to vector<256x4xf32>
    %11 = arith.truncf %10 : vector<256x4xf32> to vector<256x4xbf16>
    %c1_11 = arith.constant 1 : index
    %c0_12 = arith.constant 0 : index
    %c0_13 = arith.constant 0 : index
    %12 = vector.load %arg2[%c1_11, %c0_12, %c0_13] : memref<9x4x32xbf16, #tpu.memory_space<vmem>>, vector<1x4x32xbf16>
    %13 = vector.shape_cast %12 : vector<1x4x32xbf16> to vector<4x32xbf16>
    %cst_14 = arith.constant dense<0.000000e+00> : vector<256x32xf32>
    %14 = tpu.matmul %11, %13, %cst_14 {dimension_numbers = #tpu.dot_dimension_numbers<[1], [0], [0], [1], [0, 0, 1, 1], [], []>} : vector<256x4xbf16>, vector<4x32xbf16>, vector<256x32xf32> -> vector<256x32xf32>
    %c0_15 = arith.constant 0 : index
    %c0_16 = arith.constant 0 : index
    %15 = vector.load %arg7[%c0_15, %c0_16] : memref<256x32xf32, #tpu.memory_space<vmem>>, vector<256x32xf32>
    %16 = arith.addf %15, %14 : vector<256x32xf32>
    %c0_17 = arith.constant 0 : index
    %c0_18 = arith.constant 0 : index
    %17 = vector.load %arg7[%c0_17, %c0_18] : memref<256x32xf32, #tpu.memory_space<vmem>>, vector<256x32xf32>
    tpu.vector_store %arg7[%c0_17, %c0_18], %16 {strides = array<i32>} : memref<256x32xf32, #tpu.memory_space<vmem>>, vector<256x32xf32>,
    %c0_19 = arith.constant 0 : index
    %c0_20 = arith.constant 0 : index
    %c2 = arith.constant 2 : index
    %c0_21 = arith.constant 0 : index
    %18 = vector.load %arg1[%c0_19, %c0_20, %c2, %c0_21] : memref<1x18x18x4xf32, #tpu.memory_space<vmem>>, vector<1x16x16x4xf32>
    %19 = vector.shape_cast %18 : vector<1x16x16x4xf32> to vector<16x16x4xf32>
    %20 = vector.shape_cast %19 : vector<16x16x4xf32> to vector<256x4xf32>
    %21 = arith.truncf %20 : vector<256x4xf32> to vector<256x4xbf16>
    %c2_22 = arith.constant 2 : index
    %c0_23 = arith.constant 0 : index
    %c0_24 = arith.constant 0 : index
    %22 = vector.load %arg2[%c2_22, %c0_23, %c0_24] : memref<9x4x32xbf16, #tpu.memory_space<vmem>>, vector<1x4x32xbf16>
    %23 = vector.shape_cast %22 : vector<1x4x32xbf16> to vector<4x32xbf16>
    %cst_25 = arith.constant dense<0.000000e+00> : vector<256x32xf32>
    %24 = tpu.matmul %21, %23, %cst_25 {dimension_numbers = #tpu.dot_dimension_numbers<[1], [0], [0], [1], [0, 0, 1, 1], [], []>} : vector<256x4xbf16>, vector<4x32xbf16>, vector<256x32xf32> -> vector<256x32xf32>
    %c0_26 = arith.constant 0 : index
    %c0_27 = arith.constant 0 : index
    %25 = vector.load %arg7[%c0_26, %c0_27] : memref<256x32xf32, #tpu.memory_space<vmem>>, vector<256x32xf32>
    %26 = arith.addf %25, %24 : vector<256x32xf32>
    %c0_28 = arith.constant 0 : index
    %c0_29 = arith.constant 0 : index
    %27 = vector.load %arg7[%c0_28, %c0_29] : memref<256x32xf32, #tpu.memory_space<vmem>>, vector<256x32xf32>
    tpu.vector_store %arg7[%c0_28, %c0_29], %26 {strides = array<i32>} : memref<256x32xf32, #tpu.memory_space<vmem>>, vector<256x32xf32>,
    %c0_30 = arith.constant 0 : index
    %c1_31 = arith.constant 1 : index
    %c0_32 = arith.constant 0 : index
    %c0_33 = arith.constant 0 : index
    %28 = vector.load %arg1[%c0_30, %c1_31, %c0_32, %c0_33] : memref<1x18x18x4xf32, #tpu.memory_space<vmem>>, vector<1x16x16x4xf32>
    %29 = vector.shape_cast %28 : vector<1x16x16x4xf32> to vector<16x16x4xf32>
    %30 = vector.shape_cast %29 : vector<16x16x4xf32> to vector<256x4xf32>
    %31 = arith.truncf %30 : vector<256x4xf32> to vector<256x4xbf16>
    %c3 = arith.constant 3 : index
    %c0_34 = arith.constant 0 : index
    %c0_35 = arith.constant 0 : index
    %32 = vector.load %arg2[%c3, %c0_34, %c0_35] : memref<9x4x32xbf16, #tpu.memory_space<vmem>>, vector<1x4x32xbf16>
    %33 = vector.shape_cast %32 : vector<1x4x32xbf16> to vector<4x32xbf16>
    %cst_36 = arith.constant dense<0.000000e+00> : vector<256x32xf32>
    %34 = tpu.matmul %31, %33, %cst_36 {dimension_numbers = #tpu.dot_dimension_numbers<[1], [0], [0], [1], [0, 0, 1, 1], [], []>} : vector<256x4xbf16>, vector<4x32xbf16>, vector<256x32xf32> -> vector<256x32xf32>
    %c0_37 = arith.constant 0 : index
    %c0_38 = arith.constant 0 : index
    %35 = vector.load %arg7[%c0_37, %c0_38] : memref<256x32xf32, #tpu.memory_space<vmem>>, vector<256x32xf32>
    %36 = arith.addf %35, %34 : vector<256x32xf32>
    %c0_39 = arith.constant 0 : index
    %c0_40 = arith.constant 0 : index
    %37 = vector.load %arg7[%c0_39, %c0_40] : memref<256x32xf32, #tpu.memory_space<vmem>>, vector<256x32xf32>
    tpu.vector_store %arg7[%c0_39, %c0_40], %36 {strides = array<i32>} : memref<256x32xf32, #tpu.memory_space<vmem>>, vector<256x32xf32>,
    %c0_41 = arith.constant 0 : index
    %c1_42 = arith.constant 1 : index
    %c1_43 = arith.constant 1 : index
    %c0_44 = arith.constant 0 : index
    %38 = vector.load %arg1[%c0_41, %c1_42, %c1_43, %c0_44] : memref<1x18x18x4xf32, #tpu.memory_space<vmem>>, vector<1x16x16x4xf32>
    %39 = vector.shape_cast %38 : vector<1x16x16x4xf32> to vector<16x16x4xf32>
    %40 = vector.shape_cast %39 : vector<16x16x4xf32> to vector<256x4xf32>
    %41 = arith.truncf %40 : vector<256x4xf32> to vector<256x4xbf16>
    %c4 = arith.constant 4 : index
    %c0_45 = arith.constant 0 : index
    %c0_46 = arith.constant 0 : index
    %42 = vector.load %arg2[%c4, %c0_45, %c0_46] : memref<9x4x32xbf16, #tpu.memory_space<vmem>>, vector<1x4x32xbf16>
    %43 = vector.shape_cast %42 : vector<1x4x32xbf16> to vector<4x32xbf16>
    %cst_47 = arith.constant dense<0.000000e+00> : vector<256x32xf32>
    %44 = tpu.matmul %41, %43, %cst_47 {dimension_numbers = #tpu.dot_dimension_numbers<[1], [0], [0], [1], [0, 0, 1, 1], [], []>} : vector<256x4xbf16>, vector<4x32xbf16>, vector<256x32xf32> -> vector<256x32xf32>
    %c0_48 = arith.constant 0 : index
    %c0_49 = arith.constant 0 : index
    %45 = vector.load %arg7[%c0_48, %c0_49] : memref<256x32xf32, #tpu.memory_space<vmem>>, vector<256x32xf32>
    %46 = arith.addf %45, %44 : vector<256x32xf32>
    %c0_50 = arith.constant 0 : index
    %c0_51 = arith.constant 0 : index
    %47 = vector.load %arg7[%c0_50, %c0_51] : memref<256x32xf32, #tpu.memory_space<vmem>>, vector<256x32xf32>
    tpu.vector_store %arg7[%c0_50, %c0_51], %46 {strides = array<i32>} : memref<256x32xf32, #tpu.memory_space<vmem>>, vector<256x32xf32>,
    %c0_52 = arith.constant 0 : index
    %c1_53 = arith.constant 1 : index
    %c2_54 = arith.constant 2 : index
    %c0_55 = arith.constant 0 : index
    %48 = vector.load %arg1[%c0_52, %c1_53, %c2_54, %c0_55] : memref<1x18x18x4xf32, #tpu.memory_space<vmem>>, vector<1x16x16x4xf32>
    %49 = vector.shape_cast %48 : vector<1x16x16x4xf32> to vector<16x16x4xf32>
    %50 = vector.shape_cast %49 : vector<16x16x4xf32> to vector<256x4xf32>
    %51 = arith.truncf %50 : vector<256x4xf32> to vector<256x4xbf16>
    %c5 = arith.constant 5 : index
    %c0_56 = arith.constant 0 : index
    %c0_57 = arith.constant 0 : index
    %52 = vector.load %arg2[%c5, %c0_56, %c0_57] : memref<9x4x32xbf16, #tpu.memory_space<vmem>>, vector<1x4x32xbf16>
    %53 = vector.shape_cast %52 : vector<1x4x32xbf16> to vector<4x32xbf16>
    %cst_58 = arith.constant dense<0.000000e+00> : vector<256x32xf32>
    %54 = tpu.matmul %51, %53, %cst_58 {dimension_numbers = #tpu.dot_dimension_numbers<[1], [0], [0], [1], [0, 0, 1, 1], [], []>} : vector<256x4xbf16>, vector<4x32xbf16>, vector<256x32xf32> -> vector<256x32xf32>
    %c0_59 = arith.constant 0 : index
    %c0_60 = arith.constant 0 : index
    %55 = vector.load %arg7[%c0_59, %c0_60] : memref<256x32xf32, #tpu.memory_space<vmem>>, vector<256x32xf32>
    %56 = arith.addf %55, %54 : vector<256x32xf32>
    %c0_61 = arith.constant 0 : index
    %c0_62 = arith.constant 0 : index
    %57 = vector.load %arg7[%c0_61, %c0_62] : memref<256x32xf32, #tpu.memory_space<vmem>>, vector<256x32xf32>
    tpu.vector_store %arg7[%c0_61, %c0_62], %56 {strides = array<i32>} : memref<256x32xf32, #tpu.memory_space<vmem>>, vector<256x32xf32>,
    %c0_63 = arith.constant 0 : index
    %c2_64 = arith.constant 2 : index
    %c0_65 = arith.constant 0 : index
    %c0_66 = arith.constant 0 : index
    %58 = vector.load %arg1[%c0_63, %c2_64, %c0_65, %c0_66] : memref<1x18x18x4xf32, #tpu.memory_space<vmem>>, vector<1x16x16x4xf32>
    %59 = vector.shape_cast %58 : vector<1x16x16x4xf32> to vector<16x16x4xf32>
    %60 = vector.shape_cast %59 : vector<16x16x4xf32> to vector<256x4xf32>
    %61 = arith.truncf %60 : vector<256x4xf32> to vector<256x4xbf16>
    %c6 = arith.constant 6 : index
    %c0_67 = arith.constant 0 : index
    %c0_68 = arith.constant 0 : index
    %62 = vector.load %arg2[%c6, %c0_67, %c0_68] : memref<9x4x32xbf16, #tpu.memory_space<vmem>>, vector<1x4x32xbf16>
    %63 = vector.shape_cast %62 : vector<1x4x32xbf16> to vector<4x32xbf16>
    %cst_69 = arith.constant dense<0.000000e+00> : vector<256x32xf32>
    %64 = tpu.matmul %61, %63, %cst_69 {dimension_numbers = #tpu.dot_dimension_numbers<[1], [0], [0], [1], [0, 0, 1, 1], [], []>} : vector<256x4xbf16>, vector<4x32xbf16>, vector<256x32xf32> -> vector<256x32xf32>
    %c0_70 = arith.constant 0 : index
    %c0_71 = arith.constant 0 : index
    %65 = vector.load %arg7[%c0_70, %c0_71] : memref<256x32xf32, #tpu.memory_space<vmem>>, vector<256x32xf32>
    %66 = arith.addf %65, %64 : vector<256x32xf32>
    %c0_72 = arith.constant 0 : index
    %c0_73 = arith.constant 0 : index
    %67 = vector.load %arg7[%c0_72, %c0_73] : memref<256x32xf32, #tpu.memory_space<vmem>>, vector<256x32xf32>
    tpu.vector_store %arg7[%c0_72, %c0_73], %66 {strides = array<i32>} : memref<256x32xf32, #tpu.memory_space<vmem>>, vector<256x32xf32>,
    %c0_74 = arith.constant 0 : index
    %c2_75 = arith.constant 2 : index
    %c1_76 = arith.constant 1 : index
    %c0_77 = arith.constant 0 : index
    %68 = vector.load %arg1[%c0_74, %c2_75, %c1_76, %c0_77] : memref<1x18x18x4xf32, #tpu.memory_space<vmem>>, vector<1x16x16x4xf32>
    %69 = vector.shape_cast %68 : vector<1x16x16x4xf32> to vector<16x16x4xf32>
    %70 = vector.shape_cast %69 : vector<16x16x4xf32> to vector<256x4xf32>
    %71 = arith.truncf %70 : vector<256x4xf32> to vector<256x4xbf16>
    %c7 = arith.constant 7 : index
    %c0_78 = arith.constant 0 : index
    %c0_79 = arith.constant 0 : index
    %72 = vector.load %arg2[%c7, %c0_78, %c0_79] : memref<9x4x32xbf16, #tpu.memory_space<vmem>>, vector<1x4x32xbf16>
    %73 = vector.shape_cast %72 : vector<1x4x32xbf16> to vector<4x32xbf16>
    %cst_80 = arith.constant dense<0.000000e+00> : vector<256x32xf32>
    %74 = tpu.matmul %71, %73, %cst_80 {dimension_numbers = #tpu.dot_dimension_numbers<[1], [0], [0], [1], [0, 0, 1, 1], [], []>} : vector<256x4xbf16>, vector<4x32xbf16>, vector<256x32xf32> -> vector<256x32xf32>
    %c0_81 = arith.constant 0 : index
    %c0_82 = arith.constant 0 : index
    %75 = vector.load %arg7[%c0_81, %c0_82] : memref<256x32xf32, #tpu.memory_space<vmem>>, vector<256x32xf32>
    %76 = arith.addf %75, %74 : vector<256x32xf32>
    %c0_83 = arith.constant 0 : index
    %c0_84 = arith.constant 0 : index
    %77 = vector.load %arg7[%c0_83, %c0_84] : memref<256x32xf32, #tpu.memory_space<vmem>>, vector<256x32xf32>
    tpu.vector_store %arg7[%c0_83, %c0_84], %76 {strides = array<i32>} : memref<256x32xf32, #tpu.memory_space<vmem>>, vector<256x32xf32>,
    %c0_85 = arith.constant 0 : index
    %c2_86 = arith.constant 2 : index
    %c2_87 = arith.constant 2 : index
    %c0_88 = arith.constant 0 : index
    %78 = vector.load %arg1[%c0_85, %c2_86, %c2_87, %c0_88] : memref<1x18x18x4xf32, #tpu.memory_space<vmem>>, vector<1x16x16x4xf32>
    %79 = vector.shape_cast %78 : vector<1x16x16x4xf32> to vector<16x16x4xf32>
    %80 = vector.shape_cast %79 : vector<16x16x4xf32> to vector<256x4xf32>
    %81 = arith.truncf %80 : vector<256x4xf32> to vector<256x4xbf16>
    %c8 = arith.constant 8 : index
    %c0_89 = arith.constant 0 : index
    %c0_90 = arith.constant 0 : index
    %82 = vector.load %arg2[%c8, %c0_89, %c0_90] : memref<9x4x32xbf16, #tpu.memory_space<vmem>>, vector<1x4x32xbf16>
    %83 = vector.shape_cast %82 : vector<1x4x32xbf16> to vector<4x32xbf16>
    %cst_91 = arith.constant dense<0.000000e+00> : vector<256x32xf32>
    %84 = tpu.matmul %81, %83, %cst_91 {dimension_numbers = #tpu.dot_dimension_numbers<[1], [0], [0], [1], [0, 0, 1, 1], [], []>} : vector<256x4xbf16>, vector<4x32xbf16>, vector<256x32xf32> -> vector<256x32xf32>
    %c0_92 = arith.constant 0 : index
    %c0_93 = arith.constant 0 : index
    %85 = vector.load %arg7[%c0_92, %c0_93] : memref<256x32xf32, #tpu.memory_space<vmem>>, vector<256x32xf32>
    %86 = arith.addf %85, %84 : vector<256x32xf32>
    %c0_94 = arith.constant 0 : index
    %c0_95 = arith.constant 0 : index
    %87 = vector.load %arg7[%c0_94, %c0_95] : memref<256x32xf32, #tpu.memory_space<vmem>>, vector<256x32xf32>
    tpu.vector_store %arg7[%c0_94, %c0_95], %86 {strides = array<i32>} : memref<256x32xf32, #tpu.memory_space<vmem>>, vector<256x32xf32>,
    %c0_96 = arith.constant 0 : index
    %c0_97 = arith.constant 0 : index
    %88 = vector.load %arg7[%c0_96, %c0_97] : memref<256x32xf32, #tpu.memory_space<vmem>>, vector<256x32xf32>
    %c0_98 = arith.constant 0 : index
    %c0_99 = arith.constant 0 : index
    %89 = vector.load %arg3[%c0_98, %c0_99] : memref<1x32xf32, #tpu.memory_space<vmem>>, vector<1x32xf32>
    %90 = vector.shape_cast %89 : vector<1x32xf32> to vector<32xf32>
    %91 = vector.shape_cast %90 : vector<32xf32> to vector<1x32xf32>
    %92 = vector.broadcast %91 : vector<1x32xf32> to vector<256x32xf32>
    %93 = arith.addf %88, %92 : vector<256x32xf32>
    %cst_100 = arith.constant 0.000000e+00 : f32
    %94 = vector.broadcast %cst_100 : f32 to vector<256x32xf32>
    %95 = arith.maximumf %93, %94 : vector<256x32xf32>
    %cst_101 = arith.constant dense<0.000000e+00> : vector<32xf32>
    %96 = vector.multi_reduction <add>, %95, %cst_101 [0] : vector<256x32xf32> to vector<32xf32>
    %97 = vector.shape_cast %96 : vector<32xf32> to vector<1x32xf32>
    %cst_102 = arith.constant 3.906250e-03 : f32
    %98 = vector.broadcast %cst_102 : f32 to vector<1x32xf32>
    %99 = arith.mulf %97, %98 : vector<1x32xf32>
    %100 = arith.truncf %99 : vector<1x32xf32> to vector<1x32xbf16>
    %c0_103 = arith.constant 0 : index
    %c0_104 = arith.constant 0 : index
    %101 = vector.load %arg4[%c0_103, %c0_104] : memref<32x128xbf16, #tpu.memory_space<vmem>>, vector<32x128xbf16>
    %cst_105 = arith.constant dense<0.000000e+00> : vector<1x128xf32>
    %102 = tpu.matmul %100, %101, %cst_105 {dimension_numbers = #tpu.dot_dimension_numbers<[1], [0], [0], [1], [0, 0, 1, 1], [], []>} : vector<1x32xbf16>, vector<32x128xbf16>, vector<1x128xf32> -> vector<1x128xf32>
    %c0_106 = arith.constant 0 : index
    %c0_107 = arith.constant 0 : index
    %103 = vector.load %arg5[%c0_106, %c0_107] : memref<1x128xf32, #tpu.memory_space<vmem>>, vector<1x128xf32>
    %104 = vector.shape_cast %103 : vector<1x128xf32> to vector<128xf32>
    %105 = vector.shape_cast %104 : vector<128xf32> to vector<1x128xf32>
    %106 = arith.addf %102, %105 : vector<1x128xf32>
    %107 = vector.shape_cast %106 : vector<1x128xf32> to vector<1x1x128xf32>
    %c0_108 = arith.constant 0 : index
    %c0_109 = arith.constant 0 : index
    %c0_110 = arith.constant 0 : index
    %108 = vector.load %arg6[%c0_108, %c0_109, %c0_110] : memref<1x1x128xf32, #tpu.memory_space<vmem>>, vector<1x1x128xf32>
    tpu.vector_store %arg6[%c0_108, %c0_109, %c0_110], %107 {strides = array<i32>} : memref<1x1x128xf32, #tpu.memory_space<vmem>>, vector<1x1x128xf32>,
    return
  }
  func.func @transform_0(%arg0: i32) -> (i32, i32, i32, i32) {
    %c0_i32 = arith.constant 0 : i32
    %c0_i32_0 = arith.constant 0 : i32
    %c0_i32_1 = arith.constant 0 : i32
    %c0_i32_2 = arith.constant 0 : i32
    return %arg0, %c0_i32, %c0_i32_0, %c0_i32_1 : i32, i32, i32, i32
  }
  func.func @transform_1(%arg0: i32) -> (i32, i32, i32) {
    %c0_i32 = arith.constant 0 : i32
    %c0_i32_0 = arith.constant 0 : i32
    %c0_i32_1 = arith.constant 0 : i32
    %c0_i32_2 = arith.constant 0 : i32
    return %c0_i32, %c0_i32_0, %c0_i32_1 : i32, i32, i32
  }
  func.func @transform_2(%arg0: i32) -> (i32, i32) {
    %c0_i32 = arith.constant 0 : i32
    %c0_i32_0 = arith.constant 0 : i32
    %c0_i32_1 = arith.constant 0 : i32
    return %c0_i32, %c0_i32_0 : i32, i32
  }
  func.func @transform_3(%arg0: i32) -> (i32, i32) {
    %c0_i32 = arith.constant 0 : i32
    %c0_i32_0 = arith.constant 0 : i32
    %c0_i32_1 = arith.constant 0 : i32
    return %c0_i32, %c0_i32_0 : i32, i32
  }
  func.func @transform_4(%arg0: i32) -> (i32, i32) {
    %c0_i32 = arith.constant 0 : i32
    %c0_i32_0 = arith.constant 0 : i32
    %c0_i32_1 = arith.constant 0 : i32
    return %c0_i32, %c0_i32_0 : i32, i32
  }
  func.func @transform_5(%arg0: i32) -> (i32, i32, i32) {
    %c0_i32 = arith.constant 0 : i32
    %c0_i32_0 = arith.constant 0 : i32
    %c0_i32_1 = arith.constant 0 : i32
    return %arg0, %c0_i32, %c0_i32_0 : i32, i32, i32
  }
}

</mosaic_0001>

<bundles_post_ra>
// kernel: tpu_custom_call.1
= control target key start
LH: loop header
LB: loop body
LE: loop exit
PB: predicated region body
PF: predicated region fallthrough
CT: control target
= control target key end

     0   :  { %10 = vsyncpa [#allocation4], 0  ;;  %s5696_s0 = inlined_call_operand.vmem [shape: f32[2,18,18,4], index: 0, kind: input, shape index: {}]   ;;  %s5697_s1 = inlined_call_operand.vmem [shape: bf16[9,4,32], index: 1, kind: input, shape index: {}]   ;;  %s5698_s2 = inlined_call_operand.vmem [shape: f32[1,32], index: 2, kind: input, shape index: {}]   ;;  %s5699_s3 = inlined_call_operand.vmem [shape: bf16[32,128], index: 3, kind: input, shape index: {}]   ;;  %s5700_s4 = inlined_call_operand.vmem [shape: f32[1,128], index: 4, kind: input, shape index: {}]   ;;  %s5701_s5 = inlined_call_operand.hbm [shape: f32[2,1,128], index: 5, kind: output, shape index: {}]  }
   0x1   :  { %12 = vsyncpa [#allocation4 + $0x1], 0  ;;  %s4665_s18 = smov 0   ;;  %s4667_s19 = smov 0  }
   0x2   :  { %s4669_s20 = smov 0   ;;  %s4671_s21 = smov 0  }
   0x3 LB: > { %s4686_s22 = sadd.s32 4294967295, %s4630_s21   ;;  %s3688_s23 = sadd.s32 4294967294, %s4630_s21   ;;  %s4630_s21 = sphi %s4671_s21, %s5707_s21   ;;  %s4626_s20 = sphi %s4669_s20, %s5706_s20   ;;  %s4622_s19 = sphi %s4667_s19, %s5705_s19   ;;  %s4618_s18 = sphi %s4665_s18, %s5704_s18  }
   0x4   : > { %s4690_s24 = sadd.s32 1, %s4630_s21   ;;  %s135_s25 = sadd.s32 1, %s4626_s20 }
   0x5   : > { %s132_s26 = ssub.s32 %s4630_s21, %s4690_s24  ;;  %p145_p0 = scmp.ne.s32.totalorder %s4626_s20, %s4622_s19 }
   0x6   : > { %p133_p1 = scmp.eq.s32.totalorder %s132_s26, 0  ;;  %p146_p2 = scmp.eq.s32.totalorder %s4686_s22, 1 }
   0x7   : > { %p151_p3 = scmp.ne.s32.totalorder %s4622_s19, %s4618_s18  ;;  %p152_p4 = scmp.eq.s32.totalorder %s3688_s23, 1 }
   0x8   : > { %s4701_s27 = scalar_select %p133_p1, %s4626_s20, %s135_s25  }
   0x9   : > { %p4703_p5 = por %p146_p2, %p145_p0  ;;  %p4707_p6 = por %p152_p4, %p151_p3 }
   0xa   : > { %p3691_p7 = scmp.ge.s32.totalorder %s4630_s21, 1  ;;  %p190_p8 = scmp.lt.s32.totalorder %s4630_s21, 3 }
   0xc   : > { %p191_p9 = pnand %p3691_p7, %p190_p8 }
   0xd   : > { %p217_p10 = scmp.lt.s32.totalorder (!%p191_p9), %s4686_s22, 1  ;;  %s215_s23 = sand.u32 (!%p191_p9), 1, %s4622_s19  }
   0xe   : > { %194 = sbr.rel (%p191_p9) target bundleno = 762 (0x2fa), region = 40  ;;  %s4041_s30 = sshll.u32 (!%p191_p9), %s4686_s22, 4 }
   0xf   : > { %s216_s6 = scalar_lea.vmem (!%p191_p9), [#allocation3], %s215_s23  ;;  %s5655_s10 = scalar_lea.hbm (!%p191_p9), %s5701_s5, %s4041_s30 }
  0x10   : > { %s3633_s7 = sshll.u32 (!%p191_p9), %s216_s6, 4  ;;  %s5657_s7 = int_to_ptr.vmem [resolvable:$true] %s3633_s7 }
  0x13   : > { %v271_v0 = vld [vmem:[%s5697_s1] sm:$0x3]  ;;  %vm321_vm0 = vcmask 1041408   ;;  %v3726_v2 = vld [vmem:[%s5697_s1 + $0x4] sm:$0x3]  ;;  %s218_s11 = scalar_select %p217_p10, %s4686_s22, 1 }
  0x14   : > { %4516 = vmatprep.subr.msk.bf16.mxu0 %vm321_vm0, %v271_v0  ;;  %4517 = vmatprep.subr.msk.bf16.mxu1 %vm321_vm0, %v271_v0  ;;  %v323_v1 = vsel %vm321_vm0, %v271_v0, 0  ;;  %v3709_v3 = vld [vmem:[%s5697_s1 + $0x2] sm:$0x3]  ;;  %vm272_vm1 = vcmask 31744   ;;  %v976_v15 = vsel %vm321_vm0, %v3726_v2, 0  ;;  %vm486_vm2 = vcmask 261120  }
  0x15   : > { %4201 = vmatpush3.bf16.msra.mxu0 %v323_v1  ;;  %4515 = vmatpush3.bf16.msra.mxu1 %v323_v1  ;;  %s4526_s12 = smul.u32 432, %s218_s11  ;;  %v618_v18 = vsel %vm321_vm0, %v3709_v3, 0  ;;  %v3775_v24 = vld [vmem:[%s5697_s1 + $0x6] sm:$0x3]  ;;  %v4769_v25 = vld [vmem:[%s5697_s1 + $0x8] sm:$0x3] }
  0x16   : > { %4519 = vmatprep.subr.msk.bf16.mxu0 %vm321_vm0, %v3726_v2  ;;  %4518 = vmatprep.subr.msk.bf16.mxu1 %vm321_vm0, %v3709_v3  ;;  %v1335_v62 = vsel %vm321_vm0, %v3775_v24, 0  ;;  %v4847_v63 = vld [vmem:[%s5697_s1 + $0xa] sm:$0x3]  ;;  %vm4633_vm3 = vmmov 0   ;;  %s3621_s11 = scalar_lea.sflag [#allocation4], %s215_s23  ;;  %s4634_s22 = smov [#allocation3]  }
  0x17   : > { %s4732_s15 = scalar_lea.vmem %s5696_s0, %s4526_s12  ;;  %s4570_s12 = scalar_lea.vmem %s5657_s7, 16 }
  0x18   : > { %v223_v4 = vld [vmem:[%s4732_s15] sm:$0xff]  ;;  %v224_v5 = vld [vmem:[%s4732_s15 + $0x8] sm:$0xff]  ;;  %v243_v6 = vld [vmem:[%s4732_s15 + $0xf0] sm:$0xff]  ;;  %p4571_p11 = scmp.ne.s32.totalorder %s5657_s7, %s4570_s12  ;;  %s4574_s13 = sshll.u32 %s4634_s22, 4  ;;  %s4575_s13 = int_to_ptr.vmem [resolvable:$false] %s4574_s13 }
  0x19   : > { %v255_v7 = vpack.c.bf16 %v224_v5, %v223_v4  ;;  %v244_v8 = vld [vmem:[%s4732_s15 + $0xf8] sm:$0xff]  ;;  %v226_v10 = vld [vmem:[%s4732_s15 + $0x20] sm:$0xff]  ;;  %v245_v13 = vld [vmem:[%s4732_s15 + $0x108] sm:$0xff]  ;;  %s4576_s14 = scalar_lea.vmem %s4575_s13, 32  ;;  %p4577_p0 = scmp.lt.s32.totalorder %s5657_s7, %s4575_s13 }
  0x1a   : > { %v225_v9 = vld [vmem:[%s4732_s15 + $0x18] sm:$0xff]  ;;  %v4740_v11 = vpack.c.bf16 %v244_v8, %v243_v6  ;;  %v246_v14 = vld [vmem:[%s4732_s15 + $0x110] sm:$0xff]  ;;  %v247_v20 = vld [vmem:[%s4732_s15 + $0x120] sm:$0xff]  ;;  %p4572_p12 = pnand %p4571_p11, %p4703_p5  ;;  %p4578_p1 = scmp.lt.s32.totalorder %s4576_s14, %s4570_s12 }
  0x1b   : > { %v4742_v12 = vpack.c.bf16 %v226_v10, %v225_v9  ;;  %v227_v16 = vld [vmem:[%s4732_s15 + $0x30] sm:$0xff]  ;;  %4202 = vmatprep.mubr.msk.bf16.mxu0 %vm272_vm1, %v255_v7  ;;  %v4749_v17 = vpack.c.bf16 %v246_v14, %v245_v13  ;;  %v228_v19 = vld [vmem:[%s4732_s15 + $0x38] sm:$0xff]  ;;  %v248_v21 = vld [vmem:[%s4732_s15 + $0x128] sm:$0xff] }
  0x1c   : > { %4222 = vmatprep.mubr.msk.bf16.mxu1 %vm272_vm1, %v4740_v11  ;;  %v4759_v22 = vpack.c.bf16 %v228_v19, %v227_v16  ;;  %v4761_v23 = vpack.c.bf16 %v248_v21, %v247_v20  ;;  %v229_v26 = vld [vmem:[%s4732_s15 + $0x48] sm:$0xff]  ;;  %v230_v27 = vld [vmem:[%s4732_s15 + $0x50] sm:$0xff]  ;;  %v249_v28 = vld [vmem:[%s4732_s15 + $0x138] sm:$0xff]  ;;  %p4573_p13 = pneg %p4572_p12  ;;  %p4579_p2 = por %p4578_p1, %p4577_p0 }
  0x1d   : > { %4203 = vmatmul.mubr.msk.bf16.vlgmr.msra.gmra.mxu0 %vm272_vm1, %v4742_v12  ;;  %4223 = vmatmul.mubr.msk.bf16.vlgmr.msra.gmra.mxu1 %vm272_vm1, %v4749_v17  ;;  %v250_v29 = vld [vmem:[%s4732_s15 + $0x140] sm:$0xff]  ;;  %v232_v31 = vld [vmem:[%s4732_s15 + $0x68] sm:$0xff]  ;;  %v251_v32 = vld [vmem:[%s4732_s15 + $0x150] sm:$0xff]  ;;  %v4786_v34 = vpack.c.bf16 %v230_v27, %v229_v26 }
  0x1e   : > { %4269 = vmatpush3.bf16.msra.mxu0 %v976_v15  ;;  %4235 = vmatpush3.bf16.msra.mxu1 %v618_v18  ;;  %v231_v30 = vld [vmem:[%s4732_s15 + $0x60] sm:$0xff]  ;;  %v252_v33 = vld [vmem:[%s4732_s15 + $0x158] sm:$0xff]  ;;  %v4790_v35 = vpack.c.bf16 %v250_v29, %v249_v28  ;;  %v253_v40 = vld [vmem:[%s4732_s15 + $0x168] sm:$0xff]  ;;  %v1693_v28 = vsel %vm321_vm0, %v4769_v25, 0  ;;  %p4580_p3 = pnand %p4579_p2, %p4573_p13 }
  0x1f   : > { %4206 = vmatprep.mubr.msk.bf16.mxu0 %vm272_vm1, %v4759_v22  ;;  %4226 = vmatprep.mubr.msk.bf16.mxu1 %vm272_vm1, %v4761_v23  ;;  %v4792_v36 = vpack.c.bf16 %v232_v31, %v231_v30  ;;  %v4794_v37 = vpack.c.bf16 %v252_v33, %v251_v32  ;;  %v233_v38 = vld [vmem:[%s4732_s15 + $0x78] sm:$0xff]  ;;  %v234_v39 = vld [vmem:[%s4732_s15 + $0x80] sm:$0xff]  ;;  %v254_v41 = vld [vmem:[%s4732_s15 + $0x170] sm:$0xff] }
  0x20   : > { %4520 = vmatprep.subr.msk.bf16.mxu1 %vm321_vm0, %v3775_v24  ;;  %4521 = vmatprep.subr.msk.bf16.mxu0 %vm321_vm0, %v4769_v25  ;;  %v235_v42 = vld [vmem:[%s4732_s15 + $0x90] sm:$0xff]  ;;  %v236_v43 = vld [vmem:[%s4732_s15 + $0x98] sm:$0xff]  ;;  %v519_v44 = vld [vmem:[%s4732_s15 + $0x1] sm:$0xff]  ;;  %v4812_v46 = vpack.c.bf16 %v234_v39, %v233_v38  ;;  %v4814_v47 = vpack.c.bf16 %v254_v41, %v253_v40 }
  0x21   : > { %v520_v45 = vld [vmem:[%s4732_s15 + $0x9] sm:$0xff]  ;;  %v4816_v48 = vpack.c.bf16 %v236_v43, %v235_v42  ;;  %v521_v52 = vld [vmem:[%s4732_s15 + $0x19] sm:$0xff]  ;;  %v522_v53 = vld [vmem:[%s4732_s15 + $0x21] sm:$0xff] }
  0x22   : > { %v551_v49 = vpack.c.bf16 %v520_v45, %v519_v44  ;;  %v237_v50 = vld [vmem:[%s4732_s15 + $0xa8] sm:$0xff]  ;;  %v238_v51 = vld [vmem:[%s4732_s15 + $0xb0] sm:$0xff]  ;;  %v239_v54 = vld [vmem:[%s4732_s15 + $0xc0] sm:$0xff]  ;;  %v4835_v59 = vpack.c.bf16 %v522_v53, %v521_v52 }
  0x23   : > { %v240_v55 = vld [vmem:[%s4732_s15 + $0xc8] sm:$0xff]  ;;  %v523_v56 = vld [vmem:[%s4732_s15 + $0x31] sm:$0xff]  ;;  %v524_v57 = vld [vmem:[%s4732_s15 + $0x39] sm:$0xff]  ;;  %v4833_v58 = vpack.c.bf16 %v238_v51, %v237_v50 }
  0x24   : > { %v4837_v60 = vpack.c.bf16 %v240_v55, %v239_v54  ;;  %v4839_v61 = vpack.c.bf16 %v524_v57, %v523_v56  ;;  %v241_v0 = vld [vmem:[%s4732_s15 + $0xd8] sm:$0xff]  ;;  %v242_v1 = vld [vmem:[%s4732_s15 + $0xe0] sm:$0xff]  ;;  %v525_v2 = vld [vmem:[%s4732_s15 + $0x49] sm:$0xff] }
  0x25   : > { %4207 = vmatmul.mubr.msk.bf16.gmra.mxu0 %vm272_vm1, %v4786_v34  ;;  %4227 = vmatmul.mubr.msk.bf16.gmra.mxu1 %vm272_vm1, %v4790_v35  ;;  %v526_v3 = vld [vmem:[%s4732_s15 + $0x51] sm:$0xff]  ;;  %v877_v4 = vld [vmem:[%s4732_s15 + $0x2] sm:$0xff]  ;;  %v4865_v8 = vpack.c.bf16 %v242_v1, %v241_v0  ;;  %v879_v14 = vld [vmem:[%s4732_s15 + $0x1a] sm:$0xff] }
  0x26   : > { %4210 = vmatprep.mubr.msk.bf16.mxu0 %vm272_vm1, %v4792_v36  ;;  %4230 = vmatprep.mubr.msk.bf16.mxu1 %vm272_vm1, %v4794_v37  ;;  %v878_v5 = vld [vmem:[%s4732_s15 + $0xa] sm:$0xff]  ;;  %v527_v6 = vld [vmem:[%s4732_s15 + $0x61] sm:$0xff]  ;;  %v4867_v9 = vpack.c.bf16 %v526_v3, %v525_v2  ;;  %v529_v16 = vld [vmem:[%s4732_s15 + $0x79] sm:$0xff] }
  0x27   : > { %v528_v7 = vld [vmem:[%s4732_s15 + $0x69] sm:$0xff]  ;;  %v909_v10 = vpack.c.bf16 %v878_v5, %v877_v4  ;;  %v530_v18 = vld [vmem:[%s4732_s15 + $0x81] sm:$0xff]  ;;  %v531_v19 = vld [vmem:[%s4732_s15 + $0x91] sm:$0xff] }
  0x28   : > { %v4869_v13 = vpack.c.bf16 %v528_v7, %v527_v6  ;;  %v880_v15 = vld [vmem:[%s4732_s15 + $0x22] sm:$0xff]  ;;  %v532_v20 = vld [vmem:[%s4732_s15 + $0x99] sm:$0xff]  ;;  %v4888_v27 = vpack.c.bf16 %v530_v18, %v529_v16  ;;  %v4901_v31 = vld [vmem:[%s5697_s1 + $0xc] sm:$0x3] }
  0x29   : > { %v881_v21 = vld [vmem:[%s4732_s15 + $0x32] sm:$0xff]  ;;  %v882_v24 = vld [vmem:[%s4732_s15 + $0x3a] sm:$0xff]  ;;  %v4886_v26 = vpack.c.bf16 %v880_v15, %v879_v14  ;;  %v4892_v29 = vpack.c.bf16 %v532_v20, %v531_v19  ;;  %v533_v32 = vld [vmem:[%s4732_s15 + $0xa9] sm:$0xff] }
  0x2a   : > { %v4894_v30 = vpack.c.bf16 %v882_v24, %v881_v21  ;;  %v883_v33 = vld [vmem:[%s4732_s15 + $0x4a] sm:$0xff]  ;;  %v884_v25 = vld [vmem:[%s4732_s15 + $0x52] sm:$0xff]  ;;  %v885_v39 = vld [vmem:[%s4732_s15 + $0x62] sm:$0xff] }
  0x2b   : > { %v534_v38 = vld [vmem:[%s4732_s15 + $0xb1] sm:$0xff]  ;;  %v535_v41 = vld [vmem:[%s4732_s15 + $0xc1] sm:$0xff]  ;;  %v536_v42 = vld [vmem:[%s4732_s15 + $0xc9] sm:$0xff]  ;;  %v4919_v43 = vpack.c.bf16 %v884_v25, %v883_v33 }
  0x2c   : > { %v886_v40 = vld [vmem:[%s4732_s15 + $0x6a] sm:$0xff]  ;;  %v4921_v44 = vpack.c.bf16 %v534_v38, %v533_v32  ;;  %v537_v50 = vld [vmem:[%s4732_s15 + $0xd9] sm:$0xff]  ;;  %v888_v52 = vld [vmem:[%s4732_s15 + $0x82] sm:$0xff] }
  0x2d   : > { %4211 = vmatmul.mubr.msk.bf16.gmra.mxu0 %vm272_vm1, %v4812_v46  ;;  %4231 = vmatmul.mubr.msk.bf16.gmra.mxu1 %vm272_vm1, %v4814_v47  ;;  %v4923_v45 = vpack.c.bf16 %v886_v40, %v885_v39  ;;  %v887_v51 = vld [vmem:[%s4732_s15 + $0x7a] sm:$0xff]  ;;  %v889_v54 = vld [vmem:[%s4732_s15 + $0x92] sm:$0xff]  ;;  %v541_v3 = vld [vmem:[%s4732_s15 + $0x109] sm:$0xff] }
  0x2e   : > { %4214 = vmatprep.mubr.msk.bf16.mxu0 %vm272_vm1, %v4816_v48  ;;  %4236 = vmatprep.mubr.msk.bf16.mxu1 %vm272_vm1, %v551_v49  ;;  %v4925_v49 = vpack.c.bf16 %v536_v42, %v535_v41  ;;  %v538_v53 = vld [vmem:[%s4732_s15 + $0xe1] sm:$0xff]  ;;  %v539_v56 = vld [vmem:[%s4732_s15 + $0xf1] sm:$0xff]  ;;  %v540_v57 = vld [vmem:[%s4732_s15 + $0xf9] sm:$0xff] }
  0x2f   : > { %v890_v55 = vld [vmem:[%s4732_s15 + $0x9a] sm:$0xff]  ;;  %v4945_v0 = vpack.c.bf16 %v538_v53, %v537_v50  ;;  %v4949_v2 = vpack.c.bf16 %v540_v57, %v539_v56  ;;  %v891_v4 = vld [vmem:[%s4732_s15 + $0xaa] sm:$0xff]  ;;  %v892_v5 = vld [vmem:[%s4732_s15 + $0xb2] sm:$0xff] }
  0x30   : > { %v4947_v1 = vpack.c.bf16 %v890_v55, %v889_v54  ;;  %v542_v6 = vld [vmem:[%s4732_s15 + $0x111] sm:$0xff]  ;;  %v893_v7 = vld [vmem:[%s4732_s15 + $0xc2] sm:$0xff]  ;;  %v4967_v16 = vpack.c.bf16 %v892_v5, %v891_v4  ;;  %v545_v21 = vld [vmem:[%s4732_s15 + $0x139] sm:$0xff] }
  0x31   : > { %v543_v14 = vld [vmem:[%s4732_s15 + $0x121] sm:$0xff]  ;;  %v544_v15 = vld [vmem:[%s4732_s15 + $0x129] sm:$0xff]  ;;  %v4969_v18 = vpack.c.bf16 %v542_v6, %v541_v3  ;;  %v897_v33 = vld [vmem:[%s4732_s15 + $0xf2] sm:$0xff] }
  0x32   : > { %v4973_v20 = vpack.c.bf16 %v544_v15, %v543_v14  ;;  %v895_v24 = vld [vmem:[%s4732_s15 + $0xda] sm:$0xff]  ;;  %v547_v38 = vld [vmem:[%s4732_s15 + $0x151] sm:$0xff]  ;;  %v901_v55 = vld [vmem:[%s4732_s15 + $0x122] sm:$0xff] }
  0x33   : > { %v546_v32 = vld [vmem:[%s4732_s15 + $0x141] sm:$0xff]  ;;  %v548_v39 = vld [vmem:[%s4732_s15 + $0x159] sm:$0xff]  ;;  %v550_v54 = vld [vmem:[%s4732_s15 + $0x171] sm:$0xff] }
  0x34   : > { %v898_v25 = vld [vmem:[%s4732_s15 + $0xfa] sm:$0xff]  ;;  %v4993_v41 = vpack.c.bf16 %v546_v32, %v545_v21  ;;  %v4997_v50 = vpack.c.bf16 %v548_v39, %v547_v38  ;;  %v900_v53 = vld [vmem:[%s4732_s15 + $0x112] sm:$0xff]  ;;  %v902_v56 = vld [vmem:[%s4732_s15 + $0x12a] sm:$0xff]  ;;  %v2051_v21 = vsel %vm321_vm0, %v4847_v63, 0  ;;  %v2410_v32 = vsel %vm321_vm0, %v4901_v31, 0 }
  0x35   : > { %4215 = vmatmul.mubr.msk.bf16.gmra.mxu0 %vm272_vm1, %v4833_v58  ;;  %4237 = vmatmul.mubr.msk.bf16.vlgmr.msra.gmra.mxu1 %vm272_vm1, %v4835_v59  ;;  %v4995_v42 = vpack.c.bf16 %v898_v25, %v897_v33  ;;  %v5015_v4 = vpack.c.bf16 %v902_v56, %v901_v55  ;;  %v903_v5 = vld [vmem:[%s4732_s15 + $0x13a] sm:$0xff]  ;;  %v904_v6 = vld [vmem:[%s4732_s15 + $0x142] sm:$0xff]  ;;  %v4020_v33 = vld [vmem:[%s5697_s1 + $0x10] sm:$0x3] }
  0x36   : > { %4218 = vmatprep.mubr.msk.bf16.mxu0 %vm272_vm1, %v4837_v60  ;;  %4303 = vmatpush3.bf16.msra.mxu1 %v1335_v62  ;;  %v4943_v62 = vpack.c.bf16 %v888_v52, %v887_v51  ;;  %v549_v51 = vld [vmem:[%s4732_s15 + $0x169] sm:$0xff]  ;;  %v5028_v14 = vpack.c.bf16 %v904_v6, %v903_v5  ;;  %v3920_v55 = vld [vmem:[%s4732_s15 + $0x198] sm:$0xff]  ;;  %v3921_v56 = vld [vmem:[%s4732_s15 + $0x1a0] sm:$0xff] }
  0x37   : > { %4240 = vmatprep.mubr.msk.bf16.mxu1 %vm272_vm1, %v4839_v61  ;;  %4522 = vmatprep.subr.msk.bf16.mxu1 %vm321_vm0, %v4847_v63  ;;  %v899_v52 = vld [vmem:[%s4732_s15 + $0x10a] sm:$0xff]  ;;  %v566_v3 = vpack.c.bf16 %v550_v54, %v549_v51 }
  0x38   : > { %v5013_v57 = vpack.c.bf16 %v900_v53, %v899_v52 }
  0x3d   : > { %4219 = vmatmul.mubr.msk.bf16.gmra.mxu0 %vm272_vm1, %v4865_v8  ;;  %4241 = vmatmul.mubr.msk.bf16.gmra.mxu1 %vm272_vm1, %v4867_v9 }
  0x3e   : > { %4270 = vmatprep.mubr.msk.bf16.mxu0 %vm272_vm1, %v909_v10  ;;  %4244 = vmatprep.mubr.msk.bf16.mxu1 %vm272_vm1, %v4869_v13  ;;  %v894_v10 = vld [vmem:[%s4732_s15 + $0xca] sm:$0xff] }
  0x3f   : > { %v4971_v19 = vpack.c.bf16 %v894_v10, %v893_v7  ;;  %v905_v7 = vld [vmem:[%s4732_s15 + $0x152] sm:$0xff]  ;;  %v906_v10 = vld [vmem:[%s4732_s15 + $0x15a] sm:$0xff] }
  0x40   : > { %v5030_v15 = vpack.c.bf16 %v906_v10, %v905_v7  ;;  %v2358_v7 = vpack.c.bf16 %v3921_v56, %v3920_v55 }
  0x45   : > { %4271 = vmatmul.mubr.msk.bf16.vlgmr.msra.gmra.mxu0 %vm272_vm1, %v4886_v26  ;;  %4245 = vmatmul.mubr.msk.bf16.gmra.mxu1 %vm272_vm1, %v4888_v27 }
  0x46   : > { %4337 = vmatpush3.bf16.msra.mxu0 %v1693_v28  ;;  %4248 = vmatprep.mubr.msk.bf16.mxu1 %vm272_vm1, %v4892_v29  ;;  %v896_v28 = vld [vmem:[%s4732_s15 + $0xe2] sm:$0xff] }
  0x47   : > { %4274 = vmatprep.mubr.msk.bf16.mxu0 %vm272_vm1, %v4894_v30  ;;  %4523 = vmatprep.subr.msk.bf16.mxu0 %vm321_vm0, %v4901_v31  ;;  %v4991_v40 = vpack.c.bf16 %v896_v28, %v895_v24  ;;  %v3971_v24 = vld [vmem:[%s5697_s1 + $0xe] sm:$0x3]  ;;  %v908_v28 = vld [vmem:[%s4732_s15 + $0x172] sm:$0xff] }
  0x48   : > { %v3774_v31 = vld [vmem:[%s4732_s15 + $0x188] sm:$0xff] }
  0x4d   : > { %4275 = vmatmul.mubr.msk.bf16.gmra.mxu0 %vm272_vm1, %v4919_v43  ;;  %4249 = vmatmul.mubr.msk.bf16.gmra.mxu1 %vm272_vm1, %v4921_v44 }
  0x4e   : > { %4278 = vmatprep.mubr.msk.bf16.mxu0 %vm272_vm1, %v4923_v45  ;;  %4252 = vmatprep.mubr.msk.bf16.mxu1 %vm272_vm1, %v4925_v49 }
  0x55   : > { %4279 = vmatmul.mubr.msk.bf16.gmra.mxu0 %vm272_vm1, %v4943_v62  ;;  %4253 = vmatmul.mubr.msk.bf16.gmra.mxu1 %vm272_vm1, %v4945_v0 }
  0x56   : > { %4282 = vmatprep.mubr.msk.bf16.mxu0 %vm272_vm1, %v4947_v1  ;;  %4256 = vmatprep.mubr.msk.bf16.mxu1 %vm272_vm1, %v4949_v2 }
  0x5d   : > { %4283 = vmatmul.mubr.msk.bf16.gmra.mxu0 %vm272_vm1, %v4967_v16  ;;  %4257 = vmatmul.mubr.msk.bf16.gmra.mxu1 %vm272_vm1, %v4969_v18 }
  0x5e   : > { %4286 = vmatprep.mubr.msk.bf16.mxu0 %vm272_vm1, %v4971_v19  ;;  %4260 = vmatprep.mubr.msk.bf16.mxu1 %vm272_vm1, %v4973_v20 }
  0x65   : > { %4287 = vmatmul.mubr.msk.bf16.gmra.mxu0 %vm272_vm1, %v4991_v40  ;;  %4261 = vmatmul.mubr.msk.bf16.gmra.mxu1 %vm272_vm1, %v4993_v41 }
  0x66   : > { %4290 = vmatprep.mubr.msk.bf16.mxu0 %vm272_vm1, %v4995_v42  ;;  %4264 = vmatprep.mubr.msk.bf16.mxu1 %vm272_vm1, %v4997_v50 }
  0x6d   : > { %4291 = vmatmul.mubr.msk.bf16.gmra.mxu0 %vm272_vm1, %v5013_v57  ;;  %4265 = vmatmul.mubr.msk.bf16.gmra.mxu1 %vm272_vm1, %v566_v3 }
  0x6e   : > { %4294 = vmatprep.mubr.msk.bf16.mxu0 %vm272_vm1, %v5015_v4  ;;  %4304 = vmatprep.mubr.msk.bf16.mxu1 %vm272_vm1, %v4742_v12  ;;  %v907_v12 = vld [vmem:[%s4732_s15 + $0x16a] sm:$0xff] }
  0x6f   : > { %v5048_v63 = vpack.c.bf16 %v908_v28, %v907_v12 }
  0x75   : > { %4295 = vmatmul.mubr.msk.bf16.gmra.mxu0 %vm272_vm1, %v5028_v14  ;;  %4305 = vmatmul.mubr.msk.bf16.vlgmr.msra.gmra.mxu1 %vm272_vm1, %v4759_v22 }
  0x76   : > { %4298 = vmatprep.mubr.msk.bf16.mxu0 %vm272_vm1, %v5030_v15  ;;  %4371 = vmatpush3.bf16.msra.mxu1 %v2051_v21 }
  0x77   : > { %4308 = vmatprep.mubr.msk.bf16.mxu1 %vm272_vm1, %v4786_v34  ;;  %4524 = vmatprep.subr.msk.bf16.mxu1 %vm321_vm0, %v3971_v24 }
  0x7d   : > { %4299 = vmatmul.mubr.msk.bf16.gmra.mxu0 %vm272_vm1, %v5048_v63  ;;  %4309 = vmatmul.mubr.msk.bf16.gmra.mxu1 %vm272_vm1, %v4792_v36 }
  0x7e   : > { %4338 = vmatprep.mubr.msk.bf16.mxu0 %vm272_vm1, %v4835_v59  ;;  %4312 = vmatprep.mubr.msk.bf16.mxu1 %vm272_vm1, %v4812_v46  ;;  %v3773_v59 = vld [vmem:[%s4732_s15 + $0x180] sm:$0xff] }
  0x85   : > { %4339 = vmatmul.mubr.msk.bf16.vlgmr.msra.gmra.mxu0 %vm272_vm1, %v4839_v61  ;;  %4313 = vmatmul.mubr.msk.bf16.gmra.mxu1 %vm272_vm1, %v4816_v48 }
  0x86   : > { %4405 = vmatpush3.bf16.msra.mxu0 %v2410_v32  ;;  %4316 = vmatprep.mubr.msk.bf16.mxu1 %vm272_vm1, %v4833_v58 }
  0x87   : > { %4342 = vmatprep.mubr.msk.bf16.mxu0 %vm272_vm1, %v4867_v9  ;;  %4525 = vmatprep.subr.msk.bf16.mxu0 %vm321_vm0, %v4020_v33 }
  0x8d   : > { %4343 = vmatmul.mubr.msk.bf16.gmra.mxu0 %vm272_vm1, %v4869_v13  ;;  %4317 = vmatmul.mubr.msk.bf16.gmra.mxu1 %vm272_vm1, %v4837_v60 }
  0x8e   : > { %4346 = vmatprep.mubr.msk.bf16.mxu0 %vm272_vm1, %v4888_v27  ;;  %4320 = vmatprep.mubr.msk.bf16.mxu1 %vm272_vm1, %v4865_v8 }
  0x95   : > { %4347 = vmatmul.mubr.msk.bf16.gmra.mxu0 %vm272_vm1, %v4892_v29  ;;  %4321 = vmatmul.mubr.msk.bf16.gmra.mxu1 %vm272_vm1, %v4740_v11 }
  0x96   : > { %4350 = vmatprep.mubr.msk.bf16.mxu0 %vm272_vm1, %v4921_v44  ;;  %4324 = vmatprep.mubr.msk.bf16.mxu1 %vm272_vm1, %v4749_v17 }
  0x9d   : > { %4351 = vmatmul.mubr.msk.bf16.gmra.mxu0 %vm272_vm1, %v4925_v49  ;;  %4325 = vmatmul.mubr.msk.bf16.gmra.mxu1 %vm272_vm1, %v4761_v23  ;;  %v5106_v49 = vpack.c.bf16 %v3774_v31, %v3773_v59  ;;  %v3992_v59 = vld [vmem:[%s4732_s15 + $0x62] sm:$0xff]  ;;  %v3993_v31 = vld [vmem:[%s4732_s15 + $0x6a] sm:$0xff] }
  0x9e   : > { %4354 = vmatprep.mubr.msk.bf16.mxu0 %vm272_vm1, %v4945_v0  ;;  %4328 = vmatprep.mubr.msk.bf16.mxu1 %vm272_vm1, %v4790_v35  ;;  %v2768_v0 = vsel %vm321_vm0, %v3971_v24, 0 }
  0xa5   : > { %4355 = vmatmul.mubr.msk.bf16.gmra.mxu0 %vm272_vm1, %v4949_v2  ;;  %4329 = vmatmul.mubr.msk.bf16.gmra.mxu1 %vm272_vm1, %v4794_v37  ;;  %v3822_v2 = vld [vmem:[%s4732_s15 + $0x181] sm:$0xff] }
  0xa6   : > { %4358 = vmatprep.mubr.msk.bf16.mxu0 %vm272_vm1, %v4969_v18  ;;  %4332 = vmatprep.mubr.msk.bf16.mxu1 %vm272_vm1, %v4814_v47  ;;  %v3823_v18 = vld [vmem:[%s4732_s15 + $0x189] sm:$0xff] }
  0xad   : > { %4359 = vmatmul.mubr.msk.bf16.gmra.mxu0 %vm272_vm1, %v4973_v20  ;;  %4333 = vmatmul.mubr.msk.bf16.gmra.mxu1 %vm272_vm1, %v5106_v49  ;;  %v5126_v20 = vpack.c.bf16 %v3823_v18, %v3822_v2  ;;  %v3951_v2 = vld [vmem:[%s4732_s15 + $0xc1] sm:$0xff]  ;;  %v3952_v18 = vld [vmem:[%s4732_s15 + $0xc9] sm:$0xff] }
  0xae   : > { %4362 = vmatprep.mubr.msk.bf16.mxu0 %vm272_vm1, %v4993_v41  ;;  %4372 = vmatprep.mubr.msk.bf16.mxu1 %vm272_vm1, %v4886_v26  ;;  %v3126_v26 = vsel %vm321_vm0, %v4020_v33, 0 }
  0xb5   : > { %4363 = vmatmul.mubr.msk.bf16.gmra.mxu0 %vm272_vm1, %v4997_v50  ;;  %4373 = vmatmul.mubr.msk.bf16.vlgmr.msra.gmra.mxu1 %vm272_vm1, %v4894_v30 }
  0xb6   : > { %4366 = vmatprep.mubr.msk.bf16.mxu0 %vm272_vm1, %v566_v3  ;;  %4439 = vmatpush3.bf16.msra.mxu1 %v2768_v0 }
  0xb7   : > { %4376 = vmatprep.mubr.msk.bf16.mxu1 %vm272_vm1, %v4919_v43 }
  0xbd   : > { %4367 = vmatmul.mubr.msk.bf16.gmra.mxu0 %vm272_vm1, %v5126_v20  ;;  %4377 = vmatmul.mubr.msk.bf16.gmra.mxu1 %vm272_vm1, %v4923_v45 }
  0xbe   : > { %4406 = vmatprep.mubr.msk.bf16.mxu0 %vm272_vm1, %v4759_v22  ;;  %4380 = vmatprep.mubr.msk.bf16.mxu1 %vm272_vm1, %v4943_v62 }
  0xc5   : > { %4407 = vmatmul.mubr.msk.bf16.vlgmr.msra.gmra.mxu0 %vm272_vm1, %v4786_v34  ;;  %4381 = vmatmul.mubr.msk.bf16.gmra.mxu1 %vm272_vm1, %v4947_v1  ;;  %v3871_v1 = vld [vmem:[%s4732_s15 + $0x182] sm:$0xff] }
  0xc6   : > { %4473 = vmatpush3.bf16.msra.mxu0 %v3126_v26  ;;  %4384 = vmatprep.mubr.msk.bf16.mxu1 %vm272_vm1, %v4967_v16  ;;  %v3872_v16 = vld [vmem:[%s4732_s15 + $0x18a] sm:$0xff] }
  0xc7   : > { %4410 = vmatprep.mubr.msk.bf16.mxu0 %vm272_vm1, %v4792_v36  ;;  %v5192_v38 = vpack.c.bf16 %v3872_v16, %v3871_v1 }
  0xcd   : > { %4411 = vmatmul.mubr.msk.bf16.gmra.mxu0 %vm272_vm1, %v4812_v46  ;;  %4385 = vmatmul.mubr.msk.bf16.gmra.mxu1 %vm272_vm1, %v4971_v19 }
  0xce   : > { %4414 = vmatprep.mubr.msk.bf16.mxu0 %vm272_vm1, %v4816_v48  ;;  %4388 = vmatprep.mubr.msk.bf16.mxu1 %vm272_vm1, %v4991_v40 }
  0xd5   : > { %4415 = vmatmul.mubr.msk.bf16.gmra.mxu0 %vm272_vm1, %v4833_v58  ;;  %4389 = vmatmul.mubr.msk.bf16.gmra.mxu1 %vm272_vm1, %v4995_v42 }
  0xd6   : > { %4418 = vmatprep.mubr.msk.bf16.mxu0 %vm272_vm1, %v4837_v60  ;;  %4392 = vmatprep.mubr.msk.bf16.mxu1 %vm272_vm1, %v5013_v57 }
  0xdd   : > { %v4204_v22 = vpop.f32.mrf.mxu0  ;;  %4419 = vmatmul.mubr.msk.bf16.gmra.mxu0 %vm272_vm1, %v4865_v8  ;;  %v4224_v34 = vpop.f32.mrf.mxu1  ;;  %4393 = vmatmul.mubr.msk.bf16.gmra.mxu1 %vm272_vm1, %v5015_v4 }
  0xde   : > { %489 = vst.msk [vmem:[#allocation2 + $0x10] sm:$0xff] %vm486_vm2, %v4204_v22  ;;  %4422 = vmatprep.mubr.msk.bf16.mxu0 %vm272_vm1, %v4740_v11  ;;  %509 = vst.msk [vmem:[#allocation2 + $0xb0] sm:$0xff] %vm486_vm2, %v4224_v34  ;;  %4396 = vmatprep.mubr.msk.bf16.mxu1 %vm272_vm1, %v5028_v14  ;;  %v3061_v34 = vpack.c.bf16 %v3993_v31, %v3992_v59 }
  0xdf   : > { %v359_v36 = vpop.f32.mrf.mxu0  ;;  %v439_v46 = vpop.f32.mrf.mxu1 }
  0xe0   : > { %487 = vst.msk [vmem:[#allocation2] sm:$0xff] %vm486_vm2, %v359_v36  ;;  %507 = vst.msk [vmem:[#allocation2 + $0xa0] sm:$0xff] %vm486_vm2, %v439_v46  ;;  %v2707_v46 = vpack.c.bf16 %v3952_v18, %v3951_v2  ;;  %v4001_v2 = vld [vmem:[%s4732_s15 + $0xca] sm:$0xff] }
  0xe1   : > { %v4205_v48 = vpop.f32.mrf.mxu0  ;;  %v4225_v58 = vpop.f32.mrf.mxu1 }
  0xe2   : > { %490 = vst.msk [vmem:[#allocation2 + $0x18] sm:$0xff] %vm486_vm2, %v4205_v48  ;;  %510 = vst.msk [vmem:[#allocation2 + $0xb8] sm:$0xff] %vm486_vm2, %v4225_v58 }
  0xe3   : > { %v362_v11 = vpop.f32.mrf.mxu0  ;;  %v442_v60 = vpop.f32.mrf.mxu1 }
  0xe4   : > { %488 = vst.msk [vmem:[#allocation2 + $0x8] sm:$0xff] %vm486_vm2, %v362_v11  ;;  %508 = vst.msk [vmem:[#allocation2 + $0xa8] sm:$0xff] %vm486_vm2, %v442_v60 }
  0xe5   : > { %v4208_v8 = vpop.f32.mrf.mxu0  ;;  %4423 = vmatmul.mubr.msk.bf16.gmra.mxu0 %vm272_vm1, %v4749_v17  ;;  %v4228_v45 = vpop.f32.mrf.mxu1  ;;  %4397 = vmatmul.mubr.msk.bf16.gmra.mxu1 %vm272_vm1, %v5030_v15  ;;  %v783_v54 = vld [vmem:[#allocation2 + $0x10] sm:$0xff] }
  0xe6   : > { %493 = vst.msk [vmem:[#allocation2 + $0x30] sm:$0xff] %vm486_vm2, %v4208_v8  ;;  %4426 = vmatprep.mubr.msk.bf16.mxu0 %vm272_vm1, %v4761_v23  ;;  %513 = vst.msk [vmem:[#allocation2 + $0xd0] sm:$0xff] %vm486_vm2, %v4228_v45  ;;  %4400 = vmatprep.mubr.msk.bf16.mxu1 %vm272_vm1, %v5048_v63  ;;  %v3953_v45 = vld [vmem:[%s4732_s15 + $0xd9] sm:$0xff] }
  0xe7   : > { %v375_v62 = vpop.f32.mrf.mxu0  ;;  %v455_v17 = vpop.f32.mrf.mxu1  ;;  %v781_v4 = vld [vmem:[#allocation2] sm:$0xff] }
  0xe8   : > { %491 = vst.msk [vmem:[#allocation2 + $0x20] sm:$0xff] %vm486_vm2, %v375_v62  ;;  %511 = vst.msk [vmem:[#allocation2 + $0xc0] sm:$0xff] %vm486_vm2, %v455_v17  ;;  %v3954_v62 = vld [vmem:[%s4732_s15 + $0xe1] sm:$0xff] }
  0xe9   : > { %v4209_v19 = vpop.f32.mrf.mxu0  ;;  %v4229_v25 = vpop.f32.mrf.mxu1  ;;  %v784_v10 = vld [vmem:[#allocation2 + $0x18] sm:$0xff] }
  0xea   : > { %494 = vst.msk [vmem:[#allocation2 + $0x38] sm:$0xff] %vm486_vm2, %v4209_v19  ;;  %514 = vst.msk [vmem:[#allocation2 + $0xd8] sm:$0xff] %vm486_vm2, %v4229_v25  ;;  %v3994_v19 = vld [vmem:[%s4732_s15 + $0x7a] sm:$0xff]  ;;  %v3995_v25 = vld [vmem:[%s4732_s15 + $0x82] sm:$0xff] }
  0xeb   : > { %v378_v23 = vpop.f32.mrf.mxu0  ;;  %v458_v39 = vpop.f32.mrf.mxu1  ;;  %v782_v21 = vld [vmem:[#allocation2 + $0x8] sm:$0xff] }
  0xec   : > { %492 = vst.msk [vmem:[#allocation2 + $0x28] sm:$0xff] %vm486_vm2, %v378_v23  ;;  %512 = vst.msk [vmem:[#allocation2 + $0xc8] sm:$0xff] %vm486_vm2, %v458_v39 }
  0xed   : > { %v4212_v40 = vpop.f32.mrf.mxu0  ;;  %4427 = vmatmul.mubr.msk.bf16.gmra.mxu0 %vm272_vm1, %v4790_v35  ;;  %v4232_v41 = vpop.f32.mrf.mxu1  ;;  %4401 = vmatmul.mubr.msk.bf16.gmra.mxu1 %vm272_vm1, %v5192_v38  ;;  %v787_v63 = vld [vmem:[#allocation2 + $0x30] sm:$0xff] }
  0xee   : > { %497 = vst.msk [vmem:[#allocation2 + $0x50] sm:$0xff] %vm486_vm2, %v4212_v40  ;;  %4430 = vmatprep.mubr.msk.bf16.mxu0 %vm272_vm1, %v4794_v37  ;;  %517 = vst.msk [vmem:[#allocation2 + $0xf0] sm:$0xff] %vm486_vm2, %v4232_v41  ;;  %4440 = vmatprep.mubr.msk.bf16.mxu1 %vm272_vm1, %v4839_v61  ;;  %v3996_v40 = vld [vmem:[%s4732_s15 + $0x92] sm:$0xff]  ;;  %v3997_v41 = vld [vmem:[%s4732_s15 + $0x9a] sm:$0xff] }
  0xef   : > { %v391_v42 = vpop.f32.mrf.mxu0  ;;  %v471_v50 = vpop.f32.mrf.mxu1  ;;  %v785_v0 = vld [vmem:[#allocation2 + $0x20] sm:$0xff] }
  0xf0   : > { %495 = vst.msk [vmem:[#allocation2 + $0x40] sm:$0xff] %vm486_vm2, %v391_v42  ;;  %515 = vst.msk [vmem:[#allocation2 + $0xe0] sm:$0xff] %vm486_vm2, %v471_v50 }
  0xf1   : > { %v4213_v35 = vpop.f32.mrf.mxu0  ;;  %v4233_v51 = vpop.f32.mrf.mxu1  ;;  %v788_v22 = vld [vmem:[#allocation2 + $0x38] sm:$0xff] }
  0xf2   : > { %498 = vst.msk [vmem:[#allocation2 + $0x58] sm:$0xff] %vm486_vm2, %v4213_v35  ;;  %518 = vst.msk [vmem:[#allocation2 + $0xf8] sm:$0xff] %vm486_vm2, %v4233_v51  ;;  %v3956_v51 = vld [vmem:[%s4732_s15 + $0xf9] sm:$0xff] }
  0xf3   : > { %v394_v37 = vpop.f32.mrf.mxu0  ;;  %v474_v52 = vpop.f32.mrf.mxu1  ;;  %v786_v58 = vld [vmem:[#allocation2 + $0x28] sm:$0xff] }
  0xf4   : > { %496 = vst.msk [vmem:[#allocation2 + $0x48] sm:$0xff] %vm486_vm2, %v394_v37  ;;  %516 = vst.msk [vmem:[#allocation2 + $0xe8] sm:$0xff] %vm486_vm2, %v474_v52 }
  0xf5   : > { %v4216_v61 = vpop.f32.mrf.mxu0  ;;  %4431 = vmatmul.mubr.msk.bf16.gmra.mxu0 %vm272_vm1, %v4814_v47  ;;  %v4238_v53 = vpop.f32.mrf.mxu1  ;;  %4441 = vmatmul.mubr.msk.bf16.vlgmr.msra.gmra.mxu1 %vm272_vm1, %v4867_v9  ;;  %v791_v16 = vld [vmem:[#allocation2 + $0x50] sm:$0xff] }
  0xf6   : > { %501 = vst.msk [vmem:[#allocation2 + $0x70] sm:$0xff] %vm486_vm2, %v4216_v61  ;;  %4434 = vmatprep.mubr.msk.bf16.mxu0 %vm272_vm1, %v5106_v49  ;;  %v815_v57 = vadd.f32 %v4238_v53, %v783_v54  ;;  %4444 = vmatprep.mubr.msk.bf16.mxu1 %vm272_vm1, %v4869_v13  ;;  %v3062_v53 = vpack.c.bf16 %v3995_v25, %v3994_v19 }
  0xf7   : > { %v407_v3 = vpop.f32.mrf.mxu0  ;;  %v654_v47 = vpop.f32.mrf.mxu1  ;;  %v789_v50 = vld [vmem:[#allocation2 + $0x40] sm:$0xff] }
  0xf8   : > { %499 = vst.msk [vmem:[#allocation2 + $0x60] sm:$0xff] %vm486_vm2, %v407_v3  ;;  %847 = vst.msk [vmem:[#allocation2 + $0x10] sm:$0xff] %vm486_vm2, %v815_v57  ;;  %v813_v5 = vadd.f32 %v781_v4, %v654_v47  ;;  %v2708_v57 = vpack.c.bf16 %v3954_v62, %v3953_v45  ;;  %v3063_v3 = vpack.c.bf16 %v3997_v41, %v3996_v40  ;;  %v3961_v40 = vld [vmem:[%s4732_s15 + $0x139] sm:$0xff]  ;;  %v3962_v41 = vld [vmem:[%s4732_s15 + $0x141] sm:$0xff] }
  0xf9   : > { %v4217_v6 = vpop.f32.mrf.mxu0  ;;  %v4239_v9 = vpop.f32.mrf.mxu1  ;;  %v792_v55 = vld [vmem:[#allocation2 + $0x58] sm:$0xff] }
  0xfa   : > { %502 = vst.msk [vmem:[#allocation2 + $0x78] sm:$0xff] %vm486_vm2, %v4217_v6  ;;  %845 = vst.msk [vmem:[#allocation2] sm:$0xff] %vm486_vm2, %v813_v5  ;;  %v816_v14 = vadd.f32 %v4239_v9, %v784_v10 }
  0xfb   : > { %v410_v15 = vpop.f32.mrf.mxu0  ;;  %v657_v13 = vpop.f32.mrf.mxu1  ;;  %v790_v9 = vld [vmem:[#allocation2 + $0x48] sm:$0xff] }
  0xfc   : > { %500 = vst.msk [vmem:[#allocation2 + $0x68] sm:$0xff] %vm486_vm2, %v410_v15  ;;  %848 = vst.msk [vmem:[#allocation2 + $0x18] sm:$0xff] %vm486_vm2, %v816_v14  ;;  %v814_v24 = vadd.f32 %v782_v21, %v657_v13  ;;  %v3957_v21 = vld [vmem:[%s4732_s15 + $0x109] sm:$0xff] }
  0xfd   : > { %v4220_v12 = vpop.f32.mrf.mxu0  ;;  %4435 = vmatmul.mubr.msk.bf16.gmra.mxu0 %vm272_vm1, %v2358_v7  ;;  %v4242_v28 = vpop.f32.mrf.mxu1  ;;  %4445 = vmatmul.mubr.msk.bf16.gmra.mxu1 %vm272_vm1, %v4888_v27 }
  0xfe   : > { %505 = vst.msk [vmem:[#allocation2 + $0x90] sm:$0xff] %vm486_vm2, %v4220_v12  ;;  %4474 = vmatprep.mubr.msk.bf16.mxu0 %vm272_vm1, %v4894_v30  ;;  %846 = vst.msk [vmem:[#allocation2 + $0x8] sm:$0xff] %vm486_vm2, %v814_v24  ;;  %v819_v32 = vadd.f32 %v4242_v28, %v787_v63  ;;  %4448 = vmatprep.mubr.msk.bf16.mxu1 %vm272_vm1, %v4892_v29  ;;  %v3958_v24 = vld [vmem:[%s4732_s15 + $0x111] sm:$0xff] }
  0xff   : > { %v423_v33 = vpop.f32.mrf.mxu0  ;;  %v670_v49 = vpop.f32.mrf.mxu1  ;;  %v1141_v8 = vld [vmem:[#allocation2 + $0x10] sm:$0xff] }
 0x100   : > { %503 = vst.msk [vmem:[#allocation2 + $0x80] sm:$0xff] %vm486_vm2, %v423_v33  ;;  %851 = vst.msk [vmem:[#allocation2 + $0x30] sm:$0xff] %vm486_vm2, %v819_v32  ;;  %v817_v27 = vadd.f32 %v785_v0, %v670_v49  ;;  %v795_v28 = vld [vmem:[#allocation2 + $0x70] sm:$0xff]  ;;  %v4000_v0 = vld [vmem:[%s4732_s15 + $0xc2] sm:$0xff] }
 0x101   : > { %v4221_v26 = vpop.f32.mrf.mxu0  ;;  %v4243_v30 = vpop.f32.mrf.mxu1  ;;  %v3998_v32 = vld [vmem:[%s4732_s15 + $0xaa] sm:$0xff]  ;;  %v3999_v33 = vld [vmem:[%s4732_s15 + $0xb2] sm:$0xff] }
 0x102   : > { %506 = vst.msk [vmem:[#allocation2 + $0x98] sm:$0xff] %vm486_vm2, %v4221_v26  ;;  %849 = vst.msk [vmem:[#allocation2 + $0x20] sm:$0xff] %vm486_vm2, %v817_v27  ;;  %v820_v29 = vadd.f32 %v4243_v30, %v788_v22  ;;  %v793_v27 = vld [vmem:[#allocation2 + $0x60] sm:$0xff]  ;;  %v3960_v22 = vld [vmem:[%s4732_s15 + $0x129] sm:$0xff] }
 0x103   : > { %v426_v36 = vpop.f32.mrf.mxu0  ;;  %v673_v48 = vpop.f32.mrf.mxu1  ;;  %v1142_v61 = vld [vmem:[#allocation2 + $0x18] sm:$0xff]  ;;  %v3959_v30 = vld [vmem:[%s4732_s15 + $0x121] sm:$0xff] }
 0x104   : > { %504 = vst.msk [vmem:[#allocation2 + $0x88] sm:$0xff] %vm486_vm2, %v426_v36  ;;  %852 = vst.msk [vmem:[#allocation2 + $0x38] sm:$0xff] %vm486_vm2, %v820_v29  ;;  %v818_v11 = vadd.f32 %v786_v58, %v673_v48  ;;  %v796_v58 = vld [vmem:[#allocation2 + $0x78] sm:$0xff]  ;;  %v794_v19 = vld [vmem:[#allocation2 + $0x68] sm:$0xff] }
 0x105   : > { %v4272_v60 = vpop.f32.mrf.mxu0  ;;  %4475 = vmatmul.mubr.msk.bf16.vlgmr.msra.gmra.mxu0 %vm272_vm1, %v4919_v43  ;;  %v4246_v1 = vpop.f32.mrf.mxu1  ;;  %4449 = vmatmul.mubr.msk.bf16.gmra.mxu1 %vm272_vm1, %v4921_v44  ;;  %v1139_v43 = vld [vmem:[#allocation2] sm:$0xff]  ;;  %v3955_v44 = vld [vmem:[%s4732_s15 + $0xf1] sm:$0xff]  ;;  %v1140_v5 = vld [vmem:[#allocation2 + $0x8] sm:$0xff] }
 0x106   : > { %v1173_v17 = vadd.f32 %v4272_v60, %v1141_v8  ;;  %4478 = vmatprep.mubr.msk.bf16.mxu0 %vm272_vm1, %v3061_v34  ;;  %850 = vst.msk [vmem:[#allocation2 + $0x28] sm:$0xff] %vm486_vm2, %v818_v11  ;;  %v823_v23 = vadd.f32 %v4246_v1, %v791_v16  ;;  %4452 = vmatprep.mubr.msk.bf16.mxu1 %vm272_vm1, %v2707_v46 }
 0x107   : > { %v1012_v39 = vpop.f32.mrf.mxu0  ;;  %v686_v42 = vpop.f32.mrf.mxu1  ;;  %v2709_v6 = vpack.c.bf16 %v3956_v51, %v3955_v44  ;;  %v1145_v13 = vld [vmem:[#allocation2 + $0x30] sm:$0xff]  ;;  %v3064_v46 = vpack.c.bf16 %v3999_v33, %v3998_v32  ;;  %v2710_v60 = vpack.c.bf16 %v3958_v24, %v3957_v21  ;;  %v3065_v8 = vpack.c.bf16 %v4001_v2, %v4000_v0  ;;  %v4002_v44 = vld [vmem:[%s4732_s15 + $0xda] sm:$0xff]  ;;  %v4003_v51 = vld [vmem:[%s4732_s15 + $0xe2] sm:$0xff] }
 0x108   : > { %1205 = vst.msk [vmem:[#allocation2 + $0x10] sm:$0xff] %vm486_vm2, %v1173_v17  ;;  %v1171_v35 = vadd.f32 %v1139_v43, %v1012_v39  ;;  %855 = vst.msk [vmem:[#allocation2 + $0x50] sm:$0xff] %vm486_vm2, %v823_v23  ;;  %v821_v37 = vadd.f32 %v789_v50, %v686_v42  ;;  %v2711_v16 = vpack.c.bf16 %v3960_v22, %v3959_v30  ;;  %v799_v50 = vld [vmem:[#allocation2 + $0x90] sm:$0xff] }
 0x109   : > { %v4273_v52 = vpop.f32.mrf.mxu0  ;;  %v4247_v54 = vpop.f32.mrf.mxu1  ;;  %v1143_v49 = vld [vmem:[#allocation2 + $0x20] sm:$0xff]  ;;  %v3965_v0 = vld [vmem:[%s4732_s15 + $0x169] sm:$0xff]  ;;  %v3966_v2 = vld [vmem:[%s4732_s15 + $0x171] sm:$0xff] }
 0x10a   : > { %1203 = vst.msk [vmem:[#allocation2] sm:$0xff] %vm486_vm2, %v1171_v35  ;;  %v1174_v56 = vadd.f32 %v4273_v52, %v1142_v61  ;;  %853 = vst.msk [vmem:[#allocation2 + $0x40] sm:$0xff] %vm486_vm2, %v821_v37  ;;  %v824_v47 = vadd.f32 %v4247_v54, %v792_v55  ;;  %v4005_v54 = vld [vmem:[%s4732_s15 + $0xfa] sm:$0xff]  ;;  %v4006_v30 = vld [vmem:[%s4732_s15 + $0x10a] sm:$0xff] }
 0x10b   : > { %v1015_v4 = vpop.f32.mrf.mxu0  ;;  %v689_v7 = vpop.f32.mrf.mxu1  ;;  %v1146_v36 = vld [vmem:[#allocation2 + $0x38] sm:$0xff]  ;;  %v798_v32 = vld [vmem:[#allocation2 + $0x88] sm:$0xff] }
 0x10c   : > { %1206 = vst.msk [vmem:[#allocation2 + $0x18] sm:$0xff] %vm486_vm2, %v1174_v56  ;;  %v1172_v10 = vadd.f32 %v1140_v5, %v1015_v4  ;;  %856 = vst.msk [vmem:[#allocation2 + $0x58] sm:$0xff] %vm486_vm2, %v824_v47  ;;  %v822_v14 = vadd.f32 %v790_v9, %v689_v7  ;;  %v797_v56 = vld [vmem:[#allocation2 + $0x80] sm:$0xff]  ;;  %v3066_v7 = vpack.c.bf16 %v4003_v51, %v4002_v44  ;;  %v4007_v22 = vld [vmem:[%s4732_s15 + $0x112] sm:$0xff] }
 0x10d   : > { %v4276_v15 = vpop.f32.mrf.mxu0  ;;  %4479 = vmatmul.mubr.msk.bf16.gmra.mxu0 %vm272_vm1, %v3062_v53  ;;  %v4250_v12 = vpop.f32.mrf.mxu1  ;;  %4453 = vmatmul.mubr.msk.bf16.gmra.mxu1 %vm272_vm1, %v2708_v57  ;;  %v1144_v1 = vld [vmem:[#allocation2 + $0x28] sm:$0xff]  ;;  %v4004_v53 = vld [vmem:[%s4732_s15 + $0xf2] sm:$0xff] }
 0x10e   : > { %1204 = vst.msk [vmem:[#allocation2 + $0x8] sm:$0xff] %vm486_vm2, %v1172_v10  ;;  %v1177_v63 = vadd.f32 %v4276_v15, %v1145_v13  ;;  %4482 = vmatprep.mubr.msk.bf16.mxu0 %vm272_vm1, %v3063_v3  ;;  %854 = vst.msk [vmem:[#allocation2 + $0x48] sm:$0xff] %vm486_vm2, %v822_v14  ;;  %v827_v59 = vadd.f32 %v4250_v12, %v795_v28  ;;  %4456 = vmatprep.mubr.msk.bf16.mxu1 %vm272_vm1, %v2709_v6  ;;  %v3963_v3 = vld [vmem:[%s4732_s15 + $0x151] sm:$0xff]  ;;  %v3964_v47 = vld [vmem:[%s4732_s15 + $0x159] sm:$0xff] }
 0x10f   : > { %v1028_v31 = vpop.f32.mrf.mxu0  ;;  %v702_v18 = vpop.f32.mrf.mxu1  ;;  %v1149_v43 = vld [vmem:[#allocation2 + $0x50] sm:$0xff]  ;;  %v800_v10 = vld [vmem:[#allocation2 + $0x98] sm:$0xff]  ;;  %v2712_v15 = vpack.c.bf16 %v3962_v41, %v3961_v40  ;;  %v3067_v13 = vpack.c.bf16 %v4005_v54, %v4004_v53  ;;  %v2713_v28 = vpack.c.bf16 %v3964_v47, %v3963_v3 }
 0x110   : > { %1209 = vst.msk [vmem:[#allocation2 + $0x30] sm:$0xff] %vm486_vm2, %v1177_v63  ;;  %v1175_v26 = vadd.f32 %v1143_v49, %v1028_v31  ;;  %859 = vst.msk [vmem:[#allocation2 + $0x70] sm:$0xff] %vm486_vm2, %v827_v59  ;;  %v825_v34 = vadd.f32 %v793_v27, %v702_v18  ;;  %v803_v27 = vld [vmem:[#allocation2 + $0xb0] sm:$0xff] }
 0x111   : > { %v4277_v29 = vpop.f32.mrf.mxu0  ;;  %v4251_v48 = vpop.f32.mrf.mxu1  ;;  %v1147_v61 = vld [vmem:[#allocation2 + $0x40] sm:$0xff]  ;;  %v807_v53 = vld [vmem:[#allocation2 + $0xd0] sm:$0xff] }
 0x112   : > { %1207 = vst.msk [vmem:[#allocation2 + $0x20] sm:$0xff] %vm486_vm2, %v1175_v26  ;;  %v1178_v11 = vadd.f32 %v4277_v29, %v1146_v36  ;;  %857 = vst.msk [vmem:[#allocation2 + $0x60] sm:$0xff] %vm486_vm2, %v825_v34  ;;  %v828_v45 = vadd.f32 %v4251_v48, %v796_v58  ;;  %v4009_v48 = vld [vmem:[%s4732_s15 + $0x12a] sm:$0xff] }
 0x113   : > { %v1031_v62 = vpop.f32.mrf.mxu0  ;;  %v705_v17 = vpop.f32.mrf.mxu1  ;;  %v1150_v6 = vld [vmem:[#allocation2 + $0x58] sm:$0xff] }
 0x114   : > { %1210 = vst.msk [vmem:[#allocation2 + $0x38] sm:$0xff] %vm486_vm2, %v1178_v11  ;;  %v1176_v25 = vadd.f32 %v1144_v1, %v1031_v62  ;;  %860 = vst.msk [vmem:[#allocation2 + $0x78] sm:$0xff] %vm486_vm2, %v828_v45  ;;  %v826_v23 = vadd.f32 %v794_v19, %v705_v17  ;;  %v801_v11 = vld [vmem:[#allocation2 + $0xa0] sm:$0xff]  ;;  %v3068_v1 = vpack.c.bf16 %v4007_v22, %v4006_v30  ;;  %v804_v17 = vld [vmem:[#allocation2 + $0xb8] sm:$0xff] }
 0x115   : > { %v4280_v39 = vpop.f32.mrf.mxu0  ;;  %4483 = vmatmul.mubr.msk.bf16.gmra.mxu0 %vm272_vm1, %v3064_v46  ;;  %v4254_v42 = vpop.f32.mrf.mxu1  ;;  %4457 = vmatmul.mubr.msk.bf16.gmra.mxu1 %vm272_vm1, %v2710_v60  ;;  %v1148_v12 = vld [vmem:[#allocation2 + $0x48] sm:$0xff] }
 0x116   : > { %1208 = vst.msk [vmem:[#allocation2 + $0x28] sm:$0xff] %vm486_vm2, %v1176_v25  ;;  %v1181_v35 = vadd.f32 %v4280_v39, %v1149_v43  ;;  %4486 = vmatprep.mubr.msk.bf16.mxu0 %vm272_vm1, %v3065_v8  ;;  %858 = vst.msk [vmem:[#allocation2 + $0x68] sm:$0xff] %vm486_vm2, %v826_v23  ;;  %v831_v37 = vadd.f32 %v4254_v42, %v799_v50  ;;  %4460 = vmatprep.mubr.msk.bf16.mxu1 %vm272_vm1, %v2711_v16  ;;  %v4008_v46 = vld [vmem:[%s4732_s15 + $0x122] sm:$0xff]  ;;  %v4014_v22 = vld [vmem:[%s4732_s15 + $0x16a] sm:$0xff] }
 0x117   : > { %v1044_v52 = vpop.f32.mrf.mxu0  ;;  %v718_v55 = vpop.f32.mrf.mxu1  ;;  %v1153_v49 = vld [vmem:[#allocation2 + $0x70] sm:$0xff]  ;;  %v2714_v25 = vpack.c.bf16 %v3966_v2, %v3965_v0  ;;  %v3069_v23 = vpack.c.bf16 %v4009_v48, %v4008_v46  ;;  %v802_v42 = vld [vmem:[#allocation2 + $0xa8] sm:$0xff] }
 0x118   : > { %1213 = vst.msk [vmem:[#allocation2 + $0x50] sm:$0xff] %vm486_vm2, %v1181_v35  ;;  %v1179_v57 = vadd.f32 %v1147_v61, %v1044_v52  ;;  %863 = vst.msk [vmem:[#allocation2 + $0x90] sm:$0xff] %vm486_vm2, %v831_v37  ;;  %v829_v4 = vadd.f32 %v797_v56, %v718_v55  ;;  %v3969_v37 = vld [vmem:[%s4732_s15 + $0x199] sm:$0xff]  ;;  %v3970_v52 = vld [vmem:[%s4732_s15 + $0x1a1] sm:$0xff] }
 0x119   : > { %v4281_v5 = vpop.f32.mrf.mxu0  ;;  %v4255_v9 = vpop.f32.mrf.mxu1  ;;  %v1151_v36 = vld [vmem:[#allocation2 + $0x60] sm:$0xff] }
 0x11a   : > { %1211 = vst.msk [vmem:[#allocation2 + $0x40] sm:$0xff] %vm486_vm2, %v1179_v57  ;;  %v1182_v14 = vadd.f32 %v4281_v5, %v1150_v6  ;;  %861 = vst.msk [vmem:[#allocation2 + $0x80] sm:$0xff] %vm486_vm2, %v829_v4  ;;  %v832_v21 = vadd.f32 %v4255_v9, %v800_v10  ;;  %v4010_v55 = vld [vmem:[%s4732_s15 + $0x13a] sm:$0xff]  ;;  %v4011_v56 = vld [vmem:[%s4732_s15 + $0x142] sm:$0xff] }
 0x11b   : > { %v1047_v24 = vpop.f32.mrf.mxu0  ;;  %v721_v63 = vpop.f32.mrf.mxu1  ;;  %v1154_v62 = vld [vmem:[#allocation2 + $0x78] sm:$0xff] }
 0x11c   : > { %1214 = vst.msk [vmem:[#allocation2 + $0x58] sm:$0xff] %vm486_vm2, %v1182_v14  ;;  %v1180_v33 = vadd.f32 %v1148_v12, %v1047_v24  ;;  %864 = vst.msk [vmem:[#allocation2 + $0x98] sm:$0xff] %vm486_vm2, %v832_v21  ;;  %v830_v59 = vadd.f32 %v798_v32, %v721_v63  ;;  %v4012_v4 = vld [vmem:[%s4732_s15 + $0x152] sm:$0xff]  ;;  %v4013_v5 = vld [vmem:[%s4732_s15 + $0x15a] sm:$0xff] }
 0x11d   : > { %v4284_v31 = vpop.f32.mrf.mxu0  ;;  %4487 = vmatmul.mubr.msk.bf16.gmra.mxu0 %vm272_vm1, %v3066_v7  ;;  %v4258_v18 = vpop.f32.mrf.mxu1  ;;  %4461 = vmatmul.mubr.msk.bf16.gmra.mxu1 %vm272_vm1, %v2712_v15  ;;  %v1152_v40 = vld [vmem:[#allocation2 + $0x68] sm:$0xff]  ;;  %v805_v7 = vld [vmem:[#allocation2 + $0xc0] sm:$0xff]  ;;  %v808_v24 = vld [vmem:[#allocation2 + $0xd8] sm:$0xff] }
 0x11e   : > { %1212 = vst.msk [vmem:[#allocation2 + $0x48] sm:$0xff] %vm486_vm2, %v1180_v33  ;;  %v1185_v26 = vadd.f32 %v4284_v31, %v1153_v49  ;;  %4490 = vmatprep.mubr.msk.bf16.mxu0 %vm272_vm1, %v3067_v13  ;;  %862 = vst.msk [vmem:[#allocation2 + $0x88] sm:$0xff] %vm486_vm2, %v830_v59  ;;  %v835_v34 = vadd.f32 %v4258_v18, %v803_v27  ;;  %4464 = vmatprep.mubr.msk.bf16.mxu1 %vm272_vm1, %v2713_v28  ;;  %v806_v31 = vld [vmem:[#allocation2 + $0xc8] sm:$0xff] }
 0x11f   : > { %v1060_v29 = vpop.f32.mrf.mxu0  ;;  %v734_v58 = vpop.f32.mrf.mxu1  ;;  %v1157_v51 = vld [vmem:[#allocation2 + $0x90] sm:$0xff]  ;;  %v3070_v13 = vpack.c.bf16 %v4011_v56, %v4010_v55  ;;  %v2716_v28 = vpack.c.bf16 %v3970_v52, %v3969_v37  ;;  %v4018_v37 = vld [vmem:[%s4732_s15 + $0x19a] sm:$0xff]  ;;  %v4019_v52 = vld [vmem:[%s4732_s15 + $0x1a2] sm:$0xff] }
 0x120   : > { %1217 = vst.msk [vmem:[#allocation2 + $0x70] sm:$0xff] %vm486_vm2, %v1185_v26  ;;  %v1183_v60 = vadd.f32 %v1151_v36, %v1060_v29  ;;  %867 = vst.msk [vmem:[#allocation2 + $0xb0] sm:$0xff] %vm486_vm2, %v835_v34  ;;  %v833_v8 = vadd.f32 %v801_v11, %v734_v58  ;;  %v811_v26 = vld [vmem:[#allocation2 + $0xf0] sm:$0xff]  ;;  %v809_v58 = vld [vmem:[#allocation2 + $0xe0] sm:$0xff] }
 0x121   : > { %v4285_v45 = vpop.f32.mrf.mxu0  ;;  %v4259_v16 = vpop.f32.mrf.mxu1  ;;  %v1155_v47 = vld [vmem:[#allocation2 + $0x80] sm:$0xff]  ;;  %v4015_v34 = vld [vmem:[%s4732_s15 + $0x172] sm:$0xff] }
 0x122   : > { %1215 = vst.msk [vmem:[#allocation2 + $0x60] sm:$0xff] %vm486_vm2, %v1183_v60  ;;  %v1186_v19 = vadd.f32 %v4285_v45, %v1154_v62  ;;  %865 = vst.msk [vmem:[#allocation2 + $0xa0] sm:$0xff] %vm486_vm2, %v833_v8  ;;  %v836_v39 = vadd.f32 %v4259_v16, %v804_v17  ;;  %v3072_v62 = vpack.c.bf16 %v4015_v34, %v4014_v22  ;;  %v812_v16 = vld [vmem:[#allocation2 + $0xf8] sm:$0xff] }
 0x123   : > { %v1063_v43 = vpop.f32.mrf.mxu0  ;;  %v737_v41 = vpop.f32.mrf.mxu1  ;;  %v1158_v15 = vld [vmem:[#allocation2 + $0x98] sm:$0xff] }
 0x124   : > { %1218 = vst.msk [vmem:[#allocation2 + $0x78] sm:$0xff] %vm486_vm2, %v1186_v19  ;;  %v1184_v50 = vadd.f32 %v1152_v40, %v1063_v43  ;;  %868 = vst.msk [vmem:[#allocation2 + $0xb8] sm:$0xff] %vm486_vm2, %v836_v39  ;;  %v834_v35 = vadd.f32 %v802_v42, %v737_v41  ;;  %v810_v43 = vld [vmem:[#allocation2 + $0xe8] sm:$0xff]  ;;  %v1505_v34 = vld [vmem:[#allocation2 + $0x38] sm:$0xff] }
 0x125   : > { %v4288_v44 = vpop.f32.mrf.mxu0  ;;  %4491 = vmatmul.mubr.msk.bf16.gmra.mxu0 %vm272_vm1, %v3068_v1  ;;  %v4262_v61 = vpop.f32.mrf.mxu1  ;;  %4465 = vmatmul.mubr.msk.bf16.gmra.mxu1 %vm272_vm1, %v2714_v25  ;;  %v1156_v33 = vld [vmem:[#allocation2 + $0x88] sm:$0xff] }
 0x126   : > { %1216 = vst.msk [vmem:[#allocation2 + $0x68] sm:$0xff] %vm486_vm2, %v1184_v50  ;;  %v1189_v54 = vadd.f32 %v4288_v44, %v1157_v51  ;;  %4494 = vmatprep.mubr.msk.bf16.mxu0 %vm272_vm1, %v3069_v23  ;;  %866 = vst.msk [vmem:[#allocation2 + $0xa8] sm:$0xff] %vm486_vm2, %v834_v35  ;;  %v839_v57 = vadd.f32 %v4262_v61, %v807_v53  ;;  %4468 = vmatprep.mubr.msk.bf16.mxu1 %vm272_vm1, %v5126_v20  ;;  %v1500_v51 = vld [vmem:[#allocation2 + $0x10] sm:$0xff] }
 0x127   : > { %v1076_v3 = vpop.f32.mrf.mxu0  ;;  %v750_v6 = vpop.f32.mrf.mxu1  ;;  %v3071_v20 = vpack.c.bf16 %v4013_v5, %v4012_v4  ;;  %v1161_v18 = vld [vmem:[#allocation2 + $0xb0] sm:$0xff]  ;;  %v3074_v5 = vpack.c.bf16 %v4019_v52, %v4018_v37 }
 0x128   : > { %1221 = vst.msk [vmem:[#allocation2 + $0x90] sm:$0xff] %vm486_vm2, %v1189_v54  ;;  %v1187_v9 = vadd.f32 %v1155_v47, %v1076_v3  ;;  %871 = vst.msk [vmem:[#allocation2 + $0xd0] sm:$0xff] %vm486_vm2, %v839_v57  ;;  %v837_v10 = vadd.f32 %v805_v7, %v750_v6  ;;  %v1498_v57 = vld [vmem:[#allocation2] sm:$0xff]  ;;  %v1501_v7 = vld [vmem:[#allocation2 + $0x18] sm:$0xff] }
 0x129   : > { %v4289_v14 = vpop.f32.mrf.mxu0  ;;  %v4263_v21 = vpop.f32.mrf.mxu1  ;;  %v1159_v46 = vld [vmem:[#allocation2 + $0xa0] sm:$0xff] }
 0x12a   : > { %1219 = vst.msk [vmem:[#allocation2 + $0x80] sm:$0xff] %vm486_vm2, %v1187_v9  ;;  %v1190_v12 = vadd.f32 %v4289_v14, %v1158_v15  ;;  %869 = vst.msk [vmem:[#allocation2 + $0xc0] sm:$0xff] %vm486_vm2, %v837_v10  ;;  %v840_v63 = vadd.f32 %v4263_v21, %v808_v24  ;;  %v1499_v21 = vld [vmem:[#allocation2 + $0x8] sm:$0xff] }
 0x12b   : > { %v1079_v32 = vpop.f32.mrf.mxu0  ;;  %v753_v59 = vpop.f32.mrf.mxu1  ;;  %v1162_v45 = vld [vmem:[#allocation2 + $0xb8] sm:$0xff] }
 0x12c   : > { %1222 = vst.msk [vmem:[#allocation2 + $0x98] sm:$0xff] %vm486_vm2, %v1190_v12  ;;  %v1188_v49 = vadd.f32 %v1156_v33, %v1079_v32  ;;  %872 = vst.msk [vmem:[#allocation2 + $0xd8] sm:$0xff] %vm486_vm2, %v840_v63  ;;  %v838_v0 = vadd.f32 %v806_v31, %v753_v59  ;;  %v1504_v32 = vld [vmem:[#allocation2 + $0x30] sm:$0xff] }
 0x12d   : > { %v4292_v2 = vpop.f32.mrf.mxu0  ;;  %4495 = vmatmul.mubr.msk.bf16.gmra.mxu0 %vm272_vm1, %v3070_v13  ;;  %v4266_v27 = vpop.f32.mrf.mxu1  ;;  %4469 = vmatmul.mubr.msk.bf16.gmra.mxu1 %vm272_vm1, %v2716_v28  ;;  %v1160_v23 = vld [vmem:[#allocation2 + $0xa8] sm:$0xff] }
 0x12e   : > { %1220 = vst.msk [vmem:[#allocation2 + $0x88] sm:$0xff] %vm486_vm2, %v1188_v49  ;;  %v1193_v30 = vadd.f32 %v4292_v2, %v1161_v18  ;;  %4498 = vmatprep.mubr.msk.bf16.mxu0 %vm272_vm1, %v3071_v20  ;;  %870 = vst.msk [vmem:[#allocation2 + $0xc8] sm:$0xff] %vm486_vm2, %v838_v0  ;;  %v843_v29 = vadd.f32 %v4266_v27, %v811_v26  ;;  %v1502_v2 = vld [vmem:[#allocation2 + $0x20] sm:$0xff] }
 0x12f   : > { %v1092_v36 = vpop.f32.mrf.mxu0  ;;  %v766_v48 = vpop.f32.mrf.mxu1  ;;  %v1165_v50 = vld [vmem:[#allocation2 + $0xd0] sm:$0xff] }
 0x130   : > { %1225 = vst.msk [vmem:[#allocation2 + $0xb0] sm:$0xff] %vm486_vm2, %v1193_v30  ;;  %v1191_v11 = vadd.f32 %v1159_v46, %v1092_v36  ;;  %875 = vst.msk [vmem:[#allocation2 + $0xf0] sm:$0xff] %vm486_vm2, %v843_v29  ;;  %v841_v60 = vadd.f32 %v809_v58, %v766_v48 }
 0x131   : > { %v4293_v8 = vpop.f32.mrf.mxu0  ;;  %v4267_v1 = vpop.f32.mrf.mxu1  ;;  %v1163_v54 = vld [vmem:[#allocation2 + $0xc0] sm:$0xff] }
 0x132   : > { %1223 = vst.msk [vmem:[#allocation2 + $0xa0] sm:$0xff] %vm486_vm2, %v1191_v11  ;;  %v1194_v17 = vadd.f32 %v4293_v8, %v1162_v45  ;;  %873 = vst.msk [vmem:[#allocation2 + $0xe0] sm:$0xff] %vm486_vm2, %v841_v60  ;;  %v844_v19 = vadd.f32 %v4267_v1, %v812_v16  ;;  %v1503_v11 = vld [vmem:[#allocation2 + $0x28] sm:$0xff]  ;;  %v1508_v1 = vld [vmem:[#allocation2 + $0x50] sm:$0xff] }
 0x133   : > { %v1095_v25 = vpop.f32.mrf.mxu0  ;;  %v769_v39 = vpop.f32.mrf.mxu1  ;;  %v1166_v4 = vld [vmem:[#allocation2 + $0xd8] sm:$0xff] }
 0x134   : > { %1226 = vst.msk [vmem:[#allocation2 + $0xb8] sm:$0xff] %vm486_vm2, %v1194_v17  ;;  %v1192_v40 = vadd.f32 %v1160_v23, %v1095_v25  ;;  %876 = vst.msk [vmem:[#allocation2 + $0xf8] sm:$0xff] %vm486_vm2, %v844_v19  ;;  %v842_v41 = vadd.f32 %v810_v43, %v769_v39  ;;  %v1506_v39 = vld [vmem:[#allocation2 + $0x40] sm:$0xff] }
 0x135   : > { %v4296_v42 = vpop.f32.mrf.mxu0  ;;  %4499 = vmatmul.mubr.msk.bf16.gmra.mxu0 %vm272_vm1, %v3072_v62  ;;  %v4306_v44 = vpop.f32.mrf.mxu1  ;;  %v1164_v14 = vld [vmem:[#allocation2 + $0xc8] sm:$0xff] }
 0x136   : > { %1224 = vst.msk [vmem:[#allocation2 + $0xa8] sm:$0xff] %vm486_vm2, %v1192_v40  ;;  %v1197_v35 = vadd.f32 %v4296_v42, %v1165_v50  ;;  %4502 = vmatprep.mubr.msk.bf16.mxu0 %vm272_vm1, %v5192_v38  ;;  %874 = vst.msk [vmem:[#allocation2 + $0xe8] sm:$0xff] %vm486_vm2, %v842_v41  ;;  %v1532_v61 = vadd.f32 %v4306_v44, %v1500_v51 }
 0x137   : > { %v1108_v53 = vpop.f32.mrf.mxu0  ;;  %v1371_v56 = vpop.f32.mrf.mxu1  ;;  %v1169_v28 = vld [vmem:[#allocation2 + $0xf0] sm:$0xff] }
 0x138   : > { %1229 = vst.msk [vmem:[#allocation2 + $0xd0] sm:$0xff] %vm486_vm2, %v1197_v35  ;;  %v1195_v55 = vadd.f32 %v1163_v54, %v1108_v53  ;;  %1564 = vst.msk [vmem:[#allocation2 + $0x10] sm:$0xff] %vm486_vm2, %v1532_v61  ;;  %v1530_v3 = vadd.f32 %v1498_v57, %v1371_v56  ;;  %v1509_v35 = vld [vmem:[#allocation2 + $0x58] sm:$0xff]  ;;  %v1507_v53 = vld [vmem:[#allocation2 + $0x48] sm:$0xff] }
 0x139   : > { %v4297_v47 = vpop.f32.mrf.mxu0  ;;  %v4307_v6 = vpop.f32.mrf.mxu1  ;;  %v1167_v31 = vld [vmem:[#allocation2 + $0xe0] sm:$0xff] }
 0x13a   : > { %1227 = vst.msk [vmem:[#allocation2 + $0xc0] sm:$0xff] %vm486_vm2, %v1195_v55  ;;  %v1198_v38 = vadd.f32 %v4297_v47, %v1166_v4  ;;  %1562 = vst.msk [vmem:[#allocation2] sm:$0xff] %vm486_vm2, %v1530_v3  ;;  %v1533_v9 = vadd.f32 %v4307_v6, %v1501_v7  ;;  %v1512_v47 = vld [vmem:[#allocation2 + $0x70] sm:$0xff] }
 0x13b   : > { %v1111_v10 = vpop.f32.mrf.mxu0  ;;  %v1374_v13 = vpop.f32.mrf.mxu1  ;;  %v1170_v26 = vld [vmem:[#allocation2 + $0xf8] sm:$0xff] }
 0x13c   : > { %1230 = vst.msk [vmem:[#allocation2 + $0xd8] sm:$0xff] %vm486_vm2, %v1198_v38  ;;  %v1196_v15 = vadd.f32 %v1164_v14, %v1111_v10  ;;  %1565 = vst.msk [vmem:[#allocation2 + $0x18] sm:$0xff] %vm486_vm2, %v1533_v9  ;;  %v1531_v24 = vadd.f32 %v1499_v21, %v1374_v13  ;;  %v1510_v9 = vld [vmem:[#allocation2 + $0x60] sm:$0xff] }
 0x13d   : > { %v4300_v12 = vpop.f32.mrf.mxu0  ;;  %4503 = vmatmul.mubr.msk.bf16.gmra.mxu0 %vm272_vm1, %v3074_v5  ;;  %v4310_v63 = vpop.f32.mrf.mxu1  ;;  %v1168_v46 = vld [vmem:[#allocation2 + $0xe8] sm:$0xff] }
 0x13e   : > { %1228 = vst.msk [vmem:[#allocation2 + $0xc8] sm:$0xff] %vm486_vm2, %v1196_v15  ;;  %v1201_v20 = vadd.f32 %v4300_v12, %v1169_v28  ;;  %1563 = vst.msk [vmem:[#allocation2 + $0x8] sm:$0xff] %vm486_vm2, %v1531_v24  ;;  %v1536_v33 = vadd.f32 %v4310_v63, %v1504_v32  ;;  %v1513_v24 = vld [vmem:[#allocation2 + $0x78] sm:$0xff] }
 0x13f   : > { %v1124_v59 = vpop.f32.mrf.mxu0  ;;  %v1387_v0 = vpop.f32.mrf.mxu1  ;;  %v1858_v45 = vld [vmem:[#allocation2 + $0x10] sm:$0xff] }
 0x140   : > { %1233 = vst.msk [vmem:[#allocation2 + $0xf0] sm:$0xff] %vm486_vm2, %v1201_v20  ;;  %v1199_v49 = vadd.f32 %v1167_v31, %v1124_v59  ;;  %1568 = vst.msk [vmem:[#allocation2 + $0x30] sm:$0xff] %vm486_vm2, %v1536_v33  ;;  %v1534_v18 = vadd.f32 %v1502_v2, %v1387_v0  ;;  %v1511_v33 = vld [vmem:[#allocation2 + $0x68] sm:$0xff] }
 0x141   : > { %v4301_v27 = vpop.f32.mrf.mxu0  ;;  %v4311_v22 = vpop.f32.mrf.mxu1  ;;  %v1856_v25 = vld [vmem:[#allocation2] sm:$0xff] }
 0x142   : > { %1231 = vst.msk [vmem:[#allocation2 + $0xe0] sm:$0xff] %vm486_vm2, %v1199_v49  ;;  %v1202_v30 = vadd.f32 %v4301_v27, %v1170_v26  ;;  %1566 = vst.msk [vmem:[#allocation2 + $0x20] sm:$0xff] %vm486_vm2, %v1534_v18  ;;  %v1537_v29 = vadd.f32 %v4311_v22, %v1505_v34  ;;  %v1516_v18 = vld [vmem:[#allocation2 + $0x90] sm:$0xff] }
 0x143   : > { %v1127_v36 = vpop.f32.mrf.mxu0  ;;  %v1390_v58 = vpop.f32.mrf.mxu1  ;;  %v1859_v42 = vld [vmem:[#allocation2 + $0x18] sm:$0xff] }
 0x144   : > { %1234 = vst.msk [vmem:[#allocation2 + $0xf8] sm:$0xff] %vm486_vm2, %v1202_v30  ;;  %v1200_v48 = vadd.f32 %v1168_v46, %v1127_v36  ;;  %1569 = vst.msk [vmem:[#allocation2 + $0x38] sm:$0xff] %vm486_vm2, %v1537_v29  ;;  %v1535_v60 = vadd.f32 %v1503_v11, %v1390_v58  ;;  %v1514_v29 = vld [vmem:[#allocation2 + $0x80] sm:$0xff] }
 0x145   : > { %v4340_v8 = vpop.f32.mrf.mxu0  ;;  %v4314_v62 = vpop.f32.mrf.mxu1  ;;  %v1857_v52 = vld [vmem:[#allocation2 + $0x8] sm:$0xff] }
 0x146   : > { %1232 = vst.msk [vmem:[#allocation2 + $0xe8] sm:$0xff] %vm486_vm2, %v1200_v48  ;;  %v1890_v16 = vadd.f32 %v4340_v8, %v1858_v45  ;;  %1567 = vst.msk [vmem:[#allocation2 + $0x28] sm:$0xff] %vm486_vm2, %v1535_v60  ;;  %v1540_v17 = vadd.f32 %v4314_v62, %v1508_v1  ;;  %v1517_v60 = vld [vmem:[#allocation2 + $0x98] sm:$0xff] }
 0x147   : > { %v1729_v19 = vpop.f32.mrf.mxu0  ;;  %v1403_v23 = vpop.f32.mrf.mxu1  ;;  %v1862_v57 = vld [vmem:[#allocation2 + $0x30] sm:$0xff] }
 0x148   : > { %1922 = vst.msk [vmem:[#allocation2 + $0x10] sm:$0xff] %vm486_vm2, %v1890_v16  ;;  %v1888_v43 = vadd.f32 %v1856_v25, %v1729_v19  ;;  %1572 = vst.msk [vmem:[#allocation2 + $0x50] sm:$0xff] %vm486_vm2, %v1540_v17  ;;  %v1538_v40 = vadd.f32 %v1506_v39, %v1403_v23  ;;  %v1515_v17 = vld [vmem:[#allocation2 + $0x88] sm:$0xff] }
 0x149   : > { %v4341_v41 = vpop.f32.mrf.mxu0  ;;  %v4315_v50 = vpop.f32.mrf.mxu1  ;;  %v1860_v6 = vld [vmem:[#allocation2 + $0x20] sm:$0xff] }
 0x14a   : > { %1920 = vst.msk [vmem:[#allocation2] sm:$0xff] %vm486_vm2, %v1888_v43  ;;  %v1891_v44 = vadd.f32 %v4341_v41, %v1859_v42  ;;  %1570 = vst.msk [vmem:[#allocation2 + $0x40] sm:$0xff] %vm486_vm2, %v1538_v40  ;;  %v1541_v51 = vadd.f32 %v4315_v50, %v1509_v35  ;;  %v1520_v40 = vld [vmem:[#allocation2 + $0xb0] sm:$0xff] }
 0x14b   : > { %v1732_v37 = vpop.f32.mrf.mxu0  ;;  %v1406_v61 = vpop.f32.mrf.mxu1  ;;  %v1863_v13 = vld [vmem:[#allocation2 + $0x38] sm:$0xff] }
 0x14c   : > { %1923 = vst.msk [vmem:[#allocation2 + $0x18] sm:$0xff] %vm486_vm2, %v1891_v44  ;;  %v1889_v54 = vadd.f32 %v1857_v52, %v1732_v37  ;;  %1573 = vst.msk [vmem:[#allocation2 + $0x58] sm:$0xff] %vm486_vm2, %v1541_v51  ;;  %v1539_v55 = vadd.f32 %v1507_v53, %v1406_v61  ;;  %v1518_v51 = vld [vmem:[#allocation2 + $0xa0] sm:$0xff] }
 0x14d   : > { %v4344_v56 = vpop.f32.mrf.mxu0  ;;  %v4318_v3 = vpop.f32.mrf.mxu1  ;;  %v1861_v63 = vld [vmem:[#allocation2 + $0x28] sm:$0xff] }
 0x14e   : > { %1921 = vst.msk [vmem:[#allocation2 + $0x8] sm:$0xff] %vm486_vm2, %v1889_v54  ;;  %v1894_v4 = vadd.f32 %v4344_v56, %v1862_v57  ;;  %1571 = vst.msk [vmem:[#allocation2 + $0x48] sm:$0xff] %vm486_vm2, %v1539_v55  ;;  %v1544_v5 = vadd.f32 %v4318_v3, %v1512_v47  ;;  %v1521_v55 = vld [vmem:[#allocation2 + $0xb8] sm:$0xff] }
 0x14f   : > { %v1745_v38 = vpop.f32.mrf.mxu0  ;;  %v1419_v7 = vpop.f32.mrf.mxu1  ;;  %v1866_v0 = vld [vmem:[#allocation2 + $0x50] sm:$0xff] }
 0x150   : > { %1926 = vst.msk [vmem:[#allocation2 + $0x30] sm:$0xff] %vm486_vm2, %v1894_v4  ;;  %v1892_v10 = vadd.f32 %v1860_v6, %v1745_v38  ;;  %1576 = vst.msk [vmem:[#allocation2 + $0x70] sm:$0xff] %vm486_vm2, %v1544_v5  ;;  %v1542_v14 = vadd.f32 %v1510_v9, %v1419_v7  ;;  %v1519_v5 = vld [vmem:[#allocation2 + $0xa8] sm:$0xff] }
 0x151   : > { %v4345_v15 = vpop.f32.mrf.mxu0  ;;  %v4319_v21 = vpop.f32.mrf.mxu1  ;;  %v1864_v22 = vld [vmem:[#allocation2 + $0x40] sm:$0xff] }
 0x152   : > { %1924 = vst.msk [vmem:[#allocation2 + $0x20] sm:$0xff] %vm486_vm2, %v1892_v10  ;;  %v1895_v12 = vadd.f32 %v4345_v15, %v1863_v13  ;;  %1574 = vst.msk [vmem:[#allocation2 + $0x60] sm:$0xff] %vm486_vm2, %v1542_v14  ;;  %v1545_v28 = vadd.f32 %v4319_v21, %v1513_v24  ;;  %v1524_v14 = vld [vmem:[#allocation2 + $0xd0] sm:$0xff] }
 0x153   : > { %v1748_v20 = vpop.f32.mrf.mxu0  ;;  %v1422_v32 = vpop.f32.mrf.mxu1  ;;  %v1867_v58 = vld [vmem:[#allocation2 + $0x58] sm:$0xff] }
 0x154   : > { %1927 = vst.msk [vmem:[#allocation2 + $0x38] sm:$0xff] %vm486_vm2, %v1895_v12  ;;  %v1893_v59 = vadd.f32 %v1861_v63, %v1748_v20  ;;  %1577 = vst.msk [vmem:[#allocation2 + $0x78] sm:$0xff] %vm486_vm2, %v1545_v28  ;;  %v1543_v31 = vadd.f32 %v1511_v33, %v1422_v32  ;;  %v1522_v28 = vld [vmem:[#allocation2 + $0xc0] sm:$0xff] }
 0x155   : > { %v4348_v49 = vpop.f32.mrf.mxu0  ;;  %v4322_v2 = vpop.f32.mrf.mxu1  ;;  %v1865_v1 = vld [vmem:[#allocation2 + $0x48] sm:$0xff] }
 0x156   : > { %1925 = vst.msk [vmem:[#allocation2 + $0x28] sm:$0xff] %vm486_vm2, %v1893_v59  ;;  %v1898_v27 = vadd.f32 %v4348_v49, %v1866_v0  ;;  %1575 = vst.msk [vmem:[#allocation2 + $0x68] sm:$0xff] %vm486_vm2, %v1543_v31  ;;  %v1548_v26 = vadd.f32 %v4322_v2, %v1516_v18  ;;  %v1525_v31 = vld [vmem:[#allocation2 + $0xd8] sm:$0xff] }
 0x157   : > { %v1761_v30 = vpop.f32.mrf.mxu0  ;;  %v1435_v34 = vpop.f32.mrf.mxu1  ;;  %v1870_v39 = vld [vmem:[#allocation2 + $0x70] sm:$0xff] }
 0x158   : > { %1930 = vst.msk [vmem:[#allocation2 + $0x50] sm:$0xff] %vm486_vm2, %v1898_v27  ;;  %v1896_v36 = vadd.f32 %v1864_v22, %v1761_v30  ;;  %1580 = vst.msk [vmem:[#allocation2 + $0x90] sm:$0xff] %vm486_vm2, %v1548_v26  ;;  %v1546_v46 = vadd.f32 %v1514_v29, %v1435_v34  ;;  %v1523_v26 = vld [vmem:[#allocation2 + $0xc8] sm:$0xff] }
 0x159   : > { %v4349_v48 = vpop.f32.mrf.mxu0  ;;  %v4323_v11 = vpop.f32.mrf.mxu1  ;;  %v1868_v35 = vld [vmem:[#allocation2 + $0x60] sm:$0xff] }
 0x15a   : > { %1928 = vst.msk [vmem:[#allocation2 + $0x40] sm:$0xff] %vm486_vm2, %v1896_v36  ;;  %v1899_v8 = vadd.f32 %v4349_v48, %v1867_v58  ;;  %1578 = vst.msk [vmem:[#allocation2 + $0x80] sm:$0xff] %vm486_vm2, %v1546_v46  ;;  %v1549_v45 = vadd.f32 %v4323_v11, %v1517_v60  ;;  %v1528_v46 = vld [vmem:[#allocation2 + $0xf0] sm:$0xff] }
 0x15b   : > { %v1764_v62 = vpop.f32.mrf.mxu0  ;;  %v1438_v16 = vpop.f32.mrf.mxu1  ;;  %v1871_v53 = vld [vmem:[#allocation2 + $0x78] sm:$0xff] }
 0x15c   : > { %1931 = vst.msk [vmem:[#allocation2 + $0x58] sm:$0xff] %vm486_vm2, %v1899_v8  ;;  %v1897_v19 = vadd.f32 %v1865_v1, %v1764_v62  ;;  %1581 = vst.msk [vmem:[#allocation2 + $0x98] sm:$0xff] %vm486_vm2, %v1549_v45  ;;  %v1547_v25 = vadd.f32 %v1515_v17, %v1438_v16  ;;  %v1526_v45 = vld [vmem:[#allocation2 + $0xe0] sm:$0xff] }
 0x15d   : > { %v4352_v23 = vpop.f32.mrf.mxu0  ;;  %v4326_v43 = vpop.f32.mrf.mxu1  ;;  %v1869_v47 = vld [vmem:[#allocation2 + $0x68] sm:$0xff] }
 0x15e   : > { %1929 = vst.msk [vmem:[#allocation2 + $0x48] sm:$0xff] %vm486_vm2, %v1897_v19  ;;  %v1902_v41 = vadd.f32 %v4352_v23, %v1870_v39  ;;  %1579 = vst.msk [vmem:[#allocation2 + $0x88] sm:$0xff] %vm486_vm2, %v1547_v25  ;;  %v1552_v42 = vadd.f32 %v4326_v43, %v1520_v40  ;;  %v1529_v25 = vld [vmem:[#allocation2 + $0xf8] sm:$0xff] }
 0x15f   : > { %v1777_v50 = vpop.f32.mrf.mxu0  ;;  %v1451_v44 = vpop.f32.mrf.mxu1  ;;  %v1874_v9 = vld [vmem:[#allocation2 + $0x90] sm:$0xff] }
 0x160   : > { %1934 = vst.msk [vmem:[#allocation2 + $0x70] sm:$0xff] %vm486_vm2, %v1902_v41  ;;  %v1900_v37 = vadd.f32 %v1868_v35, %v1777_v50  ;;  %1584 = vst.msk [vmem:[#allocation2 + $0xb0] sm:$0xff] %vm486_vm2, %v1552_v42  ;;  %v1550_v52 = vadd.f32 %v1518_v51, %v1451_v44  ;;  %v1527_v42 = vld [vmem:[#allocation2 + $0xe8] sm:$0xff] }
 0x161   : > { %v4353_v61 = vpop.f32.mrf.mxu0  ;;  %v4327_v54 = vpop.f32.mrf.mxu1  ;;  %v1872_v24 = vld [vmem:[#allocation2 + $0x80] sm:$0xff] }
 0x162   : > { %1932 = vst.msk [vmem:[#allocation2 + $0x60] sm:$0xff] %vm486_vm2, %v1900_v37  ;;  %v1903_v56 = vadd.f32 %v4353_v61, %v1871_v53  ;;  %1582 = vst.msk [vmem:[#allocation2 + $0xa0] sm:$0xff] %vm486_vm2, %v1550_v52  ;;  %v1553_v57 = vadd.f32 %v4327_v54, %v1521_v55  ;;  %v2216_v61 = vld [vmem:[#allocation2 + $0x10] sm:$0xff] }
 0x163   : > { %v1780_v3 = vpop.f32.mrf.mxu0  ;;  %v1454_v4 = vpop.f32.mrf.mxu1  ;;  %v1875_v33 = vld [vmem:[#allocation2 + $0x98] sm:$0xff] }
 0x164   : > { %1935 = vst.msk [vmem:[#allocation2 + $0x78] sm:$0xff] %vm486_vm2, %v1903_v56  ;;  %v1901_v38 = vadd.f32 %v1869_v47, %v1780_v3  ;;  %1585 = vst.msk [vmem:[#allocation2 + $0xb8] sm:$0xff] %vm486_vm2, %v1553_v57  ;;  %v1551_v6 = vadd.f32 %v1519_v5, %v1454_v4  ;;  %v2214_v3 = vld [vmem:[#allocation2] sm:$0xff] }
 0x165   : > { %v4356_v7 = vpop.f32.mrf.mxu0  ;;  %v4330_v10 = vpop.f32.mrf.mxu1  ;;  %v1873_v18 = vld [vmem:[#allocation2 + $0x88] sm:$0xff] }
 0x166   : > { %1933 = vst.msk [vmem:[#allocation2 + $0x68] sm:$0xff] %vm486_vm2, %v1901_v38  ;;  %v1906_v15 = vadd.f32 %v4356_v7, %v1874_v9  ;;  %1583 = vst.msk [vmem:[#allocation2 + $0xa8] sm:$0xff] %vm486_vm2, %v1551_v6  ;;  %v1556_v13 = vadd.f32 %v4330_v10, %v1524_v14  ;;  %v4568_v38 = vld [vmem:[%s5699_s3 + $0x8] sm:$0xff]   ;;  %v2217_v9 = vld [vmem:[#allocation2 + $0x18] sm:$0xff]  ;;  %v4632_v10 = vmov 0.0  }
 0x167   : > { %v1793_v21 = vpop.f32.mrf.mxu0  ;;  %v1467_v12 = vpop.f32.mrf.mxu1  ;;  %v1878_v29 = vld [vmem:[#allocation2 + $0xb0] sm:$0xff]  ;;  %4506 = vmatprep.subr.bf16.mxu1 %v4632_v10  ;;  %4510 = vmatprep.mubr.msk.bf16.mxu1 %vm4633_vm3, %v4632_v10 }
 0x168   : > { %1938 = vst.msk [vmem:[#allocation2 + $0x90] sm:$0xff] %vm486_vm2, %v1906_v15  ;;  %v1904_v20 = vadd.f32 %v1872_v24, %v1793_v21  ;;  %1588 = vst.msk [vmem:[#allocation2 + $0xd0] sm:$0xff] %vm486_vm2, %v1556_v13  ;;  %v1554_v63 = vadd.f32 %v1522_v28, %v1467_v12  ;;  %4507 = vmatpush3.bf16.msra.mxu1 %v4568_v38  ;;  %v2215_v12 = vld [vmem:[#allocation2 + $0x8] sm:$0xff]  ;;  %v2228_v38 = vld [vmem:[#allocation2 + $0x70] sm:$0xff] }
 0x169   : > { %v4357_v32 = vpop.f32.mrf.mxu0  ;;  %v4331_v59 = vpop.f32.mrf.mxu1  ;;  %v1876_v60 = vld [vmem:[#allocation2 + $0xa0] sm:$0xff]  ;;  %4508 = vmatprep.subr.bf16.mxu1 %v4632_v10 }
 0x16a   : > { %1936 = vst.msk [vmem:[#allocation2 + $0x80] sm:$0xff] %vm486_vm2, %v1904_v20  ;;  %v1907_v49 = vadd.f32 %v4357_v32, %v1875_v33  ;;  %1586 = vst.msk [vmem:[#allocation2 + $0xc0] sm:$0xff] %vm486_vm2, %v1554_v63  ;;  %v1557_v0 = vadd.f32 %v4331_v59, %v1525_v31  ;;  %v2220_v59 = vld [vmem:[#allocation2 + $0x30] sm:$0xff] }
 0x16b   : > { %v1796_v2 = vpop.f32.mrf.mxu0  ;;  %v1470_v27 = vpop.f32.mrf.mxu1  ;;  %v1879_v17 = vld [vmem:[#allocation2 + $0xb8] sm:$0xff] }
 0x16c   : > { %1939 = vst.msk [vmem:[#allocation2 + $0x98] sm:$0xff] %vm486_vm2, %v1907_v49  ;;  %v1905_v30 = vadd.f32 %v1873_v18, %v1796_v2  ;;  %1589 = vst.msk [vmem:[#allocation2 + $0xd8] sm:$0xff] %vm486_vm2, %v1557_v0  ;;  %v1555_v22 = vadd.f32 %v1523_v26, %v1470_v27  ;;  %v2218_v27 = vld [vmem:[#allocation2 + $0x20] sm:$0xff]  ;;  %v2229_v10 = vld [vmem:[#allocation2 + $0x78] sm:$0xff] }
 0x16d   : > { %v4360_v34 = vpop.f32.mrf.mxu0  ;;  %v4334_v36 = vpop.f32.mrf.mxu1  ;;  %v1877_v40 = vld [vmem:[#allocation2 + $0xa8] sm:$0xff] }
 0x16e   : > { %1937 = vst.msk [vmem:[#allocation2 + $0x88] sm:$0xff] %vm486_vm2, %v1905_v30  ;;  %v1910_v48 = vadd.f32 %v4360_v34, %v1878_v29  ;;  %1587 = vst.msk [vmem:[#allocation2 + $0xc8] sm:$0xff] %vm486_vm2, %v1555_v22  ;;  %v1560_v58 = vadd.f32 %v4334_v36, %v1528_v46  ;;  %v2221_v36 = vld [vmem:[#allocation2 + $0x38] sm:$0xff] }
 0x16f   : > { %v1809_v11 = vpop.f32.mrf.mxu0  ;;  %v1483_v8 = vpop.f32.mrf.mxu1  ;;  %v1882_v51 = vld [vmem:[#allocation2 + $0xd0] sm:$0xff] }
 0x170   : > { %1942 = vst.msk [vmem:[#allocation2 + $0xb0] sm:$0xff] %vm486_vm2, %v1910_v48  ;;  %v1908_v62 = vadd.f32 %v1876_v60, %v1809_v11  ;;  %1592 = vst.msk [vmem:[#allocation2 + $0xf0] sm:$0xff] %vm486_vm2, %v1560_v58  ;;  %v1558_v1 = vadd.f32 %v1526_v45, %v1483_v8  ;;  %v2219_v8 = vld [vmem:[#allocation2 + $0x28] sm:$0xff] }
 0x171   : > { %v4361_v16 = vpop.f32.mrf.mxu0  ;;  %v4335_v19 = vpop.f32.mrf.mxu1  ;;  %v1880_v55 = vld [vmem:[#allocation2 + $0xc0] sm:$0xff] }
 0x172   : > { %1940 = vst.msk [vmem:[#allocation2 + $0xa0] sm:$0xff] %vm486_vm2, %v1908_v62  ;;  %v1911_v23 = vadd.f32 %v4361_v16, %v1879_v17  ;;  %1590 = vst.msk [vmem:[#allocation2 + $0xe0] sm:$0xff] %vm486_vm2, %v1558_v1  ;;  %v1561_v39 = vadd.f32 %v4335_v19, %v1529_v25  ;;  %v2224_v17 = vld [vmem:[#allocation2 + $0x50] sm:$0xff] }
 0x173   : > { %v1812_v43 = vpop.f32.mrf.mxu0  ;;  %v1486_v41 = vpop.f32.mrf.mxu1  ;;  %v1883_v5 = vld [vmem:[#allocation2 + $0xd8] sm:$0xff] }
 0x174   : > { %1943 = vst.msk [vmem:[#allocation2 + $0xb8] sm:$0xff] %vm486_vm2, %v1911_v23  ;;  %v1909_v50 = vadd.f32 %v1877_v40, %v1812_v43  ;;  %1593 = vst.msk [vmem:[#allocation2 + $0xf8] sm:$0xff] %vm486_vm2, %v1561_v39  ;;  %v1559_v35 = vadd.f32 %v1527_v42, %v1486_v41  ;;  %v2222_v40 = vld [vmem:[#allocation2 + $0x40] sm:$0xff] }
 0x175   : > { %v4364_v44 = vpop.f32.mrf.mxu0  ;;  %v4374_v52 = vpop.f32.mrf.mxu1  ;;  %v1881_v13 = vld [vmem:[#allocation2 + $0xc8] sm:$0xff] }
 0x176   : > { %1941 = vst.msk [vmem:[#allocation2 + $0xa8] sm:$0xff] %vm486_vm2, %v1909_v50  ;;  %v1914_v37 = vadd.f32 %v4364_v44, %v1882_v51  ;;  %1591 = vst.msk [vmem:[#allocation2 + $0xe8] sm:$0xff] %vm486_vm2, %v1559_v35  ;;  %v2248_v53 = vadd.f32 %v4374_v52, %v2216_v61  ;;  %v2225_v51 = vld [vmem:[#allocation2 + $0x58] sm:$0xff] }
 0x177   : > { %v1825_v54 = vpop.f32.mrf.mxu0  ;;  %v2087_v57 = vpop.f32.mrf.mxu1  ;;  %v1886_v63 = vld [vmem:[#allocation2 + $0xf0] sm:$0xff] }
 0x178   : > { %1946 = vst.msk [vmem:[#allocation2 + $0xd0] sm:$0xff] %vm486_vm2, %v1914_v37  ;;  %v1912_v56 = vadd.f32 %v1880_v55, %v1825_v54  ;;  %2280 = vst.msk [vmem:[#allocation2 + $0x10] sm:$0xff] %vm486_vm2, %v2248_v53  ;;  %v2246_v47 = vadd.f32 %v2214_v3, %v2087_v57  ;;  %v2223_v55 = vld [vmem:[#allocation2 + $0x48] sm:$0xff] }
 0x179   : > { %v4365_v4 = vpop.f32.mrf.mxu0  ;;  %v4375_v7 = vpop.f32.mrf.mxu1  ;;  %v1884_v0 = vld [vmem:[#allocation2 + $0xe0] sm:$0xff] }
 0x17a   : > { %1944 = vst.msk [vmem:[#allocation2 + $0xc0] sm:$0xff] %vm486_vm2, %v1912_v56  ;;  %v1915_v6 = vadd.f32 %v4365_v4, %v1883_v5  ;;  %2278 = vst.msk [vmem:[#allocation2] sm:$0xff] %vm486_vm2, %v2246_v47  ;;  %v2249_v14 = vadd.f32 %v4375_v7, %v2217_v9  ;;  %v4569_v4 = vld [vmem:[%s5699_s3] sm:$0xff]  }
 0x17b   : > { %v1828_v15 = vpop.f32.mrf.mxu0  ;;  %v2090_v24 = vpop.f32.mrf.mxu1  ;;  %v1887_v22 = vld [vmem:[#allocation2 + $0xf8] sm:$0xff]  ;;  %4509 = vmatpush3.bf16.msra.mxu1 %v4569_v4 }
 0x17c   : > { %1947 = vst.msk [vmem:[#allocation2 + $0xd8] sm:$0xff] %vm486_vm2, %v1915_v6  ;;  %v1913_v21 = vadd.f32 %v1881_v13, %v1828_v15  ;;  %2281 = vst.msk [vmem:[#allocation2 + $0x18] sm:$0xff] %vm486_vm2, %v2249_v14  ;;  %v2247_v28 = vadd.f32 %v2215_v12, %v2090_v24  ;;  %v2226_v13 = vld [vmem:[#allocation2 + $0x60] sm:$0xff] }
 0x17d   : > { %v4368_v20 = vpop.f32.mrf.mxu0  ;;  %v4378_v33 = vpop.f32.mrf.mxu1  ;;  %v1885_v58 = vld [vmem:[#allocation2 + $0xe8] sm:$0xff] }
 0x17e   : > { %1945 = vst.msk [vmem:[#allocation2 + $0xc8] sm:$0xff] %vm486_vm2, %v1913_v21  ;;  %v1918_v32 = vadd.f32 %v4368_v20, %v1886_v63  ;;  %2279 = vst.msk [vmem:[#allocation2 + $0x8] sm:$0xff] %vm486_vm2, %v2247_v28  ;;  %v2252_v31 = vadd.f32 %v4378_v33, %v2220_v59 }
 0x17f   : > { %v1841_v49 = vpop.f32.mrf.mxu0  ;;  %v2103_v18 = vpop.f32.mrf.mxu1  ;;  %v2575_v1 = vld [vmem:[#allocation2 + $0x10] sm:$0xff] }
 0x180   : > { %1950 = vst.msk [vmem:[#allocation2 + $0xf0] sm:$0xff] %vm486_vm2, %v1918_v32  ;;  %v1916_v2 = vadd.f32 %v1884_v0, %v1841_v49  ;;  %2284 = vst.msk [vmem:[#allocation2 + $0x30] sm:$0xff] %vm486_vm2, %v2252_v31  ;;  %v2250_v26 = vadd.f32 %v2218_v27, %v2103_v18  ;;  %v2227_v49 = vld [vmem:[#allocation2 + $0x68] sm:$0xff] }
 0x181   : > { %v4369_v30 = vpop.f32.mrf.mxu0  ;;  %v4379_v29 = vpop.f32.mrf.mxu1  ;;  %v2573_v39 = vld [vmem:[#allocation2] sm:$0xff] }
 0x182   : > { %1948 = vst.msk [vmem:[#allocation2 + $0xe0] sm:$0xff] %vm486_vm2, %v1916_v2  ;;  %v1919_v34 = vadd.f32 %v4369_v30, %v1887_v22  ;;  %2282 = vst.msk [vmem:[#allocation2 + $0x20] sm:$0xff] %vm486_vm2, %v2250_v26  ;;  %v2253_v46 = vadd.f32 %v4379_v29, %v2221_v36  ;;  %v2232_v30 = vld [vmem:[#allocation2 + $0x90] sm:$0xff] }
 0x183   : > { %v1844_v48 = vpop.f32.mrf.mxu0  ;;  %v2106_v60 = vpop.f32.mrf.mxu1  ;;  %v2576_v35 = vld [vmem:[#allocation2 + $0x18] sm:$0xff] }
 0x184   : > { %1951 = vst.msk [vmem:[#allocation2 + $0xf8] sm:$0xff] %vm486_vm2, %v1919_v34  ;;  %v1917_v11 = vadd.f32 %v1885_v58, %v1844_v48  ;;  %2285 = vst.msk [vmem:[#allocation2 + $0x38] sm:$0xff] %vm486_vm2, %v2253_v46  ;;  %v2251_v45 = vadd.f32 %v2219_v8, %v2106_v60  ;;  %v2230_v48 = vld [vmem:[#allocation2 + $0x80] sm:$0xff] }
 0x185   : > { %v4408_v62 = vpop.f32.mrf.mxu0  ;;  %v4382_v16 = vpop.f32.mrf.mxu1  ;;  %v2574_v53 = vld [vmem:[#allocation2 + $0x8] sm:$0xff] }
 0x186   : > { %1949 = vst.msk [vmem:[#allocation2 + $0xe8] sm:$0xff] %vm486_vm2, %v1917_v11  ;;  %v2607_v19 = vadd.f32 %v4408_v62, %v2575_v1  ;;  %2283 = vst.msk [vmem:[#allocation2 + $0x28] sm:$0xff] %vm486_vm2, %v2251_v45  ;;  %v2256_v25 = vadd.f32 %v4382_v16, %v2224_v17  ;;  %v2233_v62 = vld [vmem:[#allocation2 + $0x98] sm:$0xff] }
 0x187   : > { %v2446_v23 = vpop.f32.mrf.mxu0  ;;  %v2119_v43 = vpop.f32.mrf.mxu1  ;;  %v2579_v47 = vld [vmem:[#allocation2 + $0x30] sm:$0xff] }
 0x188   : > { %2639 = vst.msk [vmem:[#allocation2 + $0x10] sm:$0xff] %vm486_vm2, %v2607_v19  ;;  %v2605_v41 = vadd.f32 %v2573_v39, %v2446_v23  ;;  %2288 = vst.msk [vmem:[#allocation2 + $0x50] sm:$0xff] %vm486_vm2, %v2256_v25  ;;  %v2254_v42 = vadd.f32 %v2222_v40, %v2119_v43  ;;  %v2231_v23 = vld [vmem:[#allocation2 + $0x88] sm:$0xff] }
 0x189   : > { %v4409_v50 = vpop.f32.mrf.mxu0  ;;  %v4383_v44 = vpop.f32.mrf.mxu1  ;;  %v2577_v14 = vld [vmem:[#allocation2 + $0x20] sm:$0xff] }
 0x18a   : > { %2637 = vst.msk [vmem:[#allocation2] sm:$0xff] %vm486_vm2, %v2605_v41  ;;  %v2608_v37 = vadd.f32 %v4409_v50, %v2576_v35  ;;  %2286 = vst.msk [vmem:[#allocation2 + $0x40] sm:$0xff] %vm486_vm2, %v2254_v42  ;;  %v2257_v52 = vadd.f32 %v4383_v44, %v2225_v51  ;;  %v2236_v50 = vld [vmem:[#allocation2 + $0xb0] sm:$0xff] }
 0x18b   : > { %v2449_v61 = vpop.f32.mrf.mxu0  ;;  %v2122_v54 = vpop.f32.mrf.mxu1  ;;  %v2580_v28 = vld [vmem:[#allocation2 + $0x38] sm:$0xff] }
 0x18c   : > { %2640 = vst.msk [vmem:[#allocation2 + $0x18] sm:$0xff] %vm486_vm2, %v2608_v37  ;;  %v2606_v56 = vadd.f32 %v2574_v53, %v2449_v61  ;;  %2289 = vst.msk [vmem:[#allocation2 + $0x58] sm:$0xff] %vm486_vm2, %v2257_v52  ;;  %v2255_v57 = vadd.f32 %v2223_v55, %v2122_v54  ;;  %v2234_v61 = vld [vmem:[#allocation2 + $0xa0] sm:$0xff] }
 0x18d   : > { %v4412_v3 = vpop.f32.mrf.mxu0  ;;  %v4386_v5 = vpop.f32.mrf.mxu1  ;;  %v2578_v59 = vld [vmem:[#allocation2 + $0x28] sm:$0xff] }
 0x18e   : > { %2638 = vst.msk [vmem:[#allocation2 + $0x8] sm:$0xff] %vm486_vm2, %v2606_v56  ;;  %v2611_v6 = vadd.f32 %v4412_v3, %v2579_v47  ;;  %2287 = vst.msk [vmem:[#allocation2 + $0x48] sm:$0xff] %vm486_vm2, %v2255_v57  ;;  %v2260_v7 = vadd.f32 %v4386_v5, %v2228_v38  ;;  %v2237_v3 = vld [vmem:[#allocation2 + $0xb8] sm:$0xff] }
 0x18f   : > { %v2462_v9 = vpop.f32.mrf.mxu0  ;;  %v2135_v15 = vpop.f32.mrf.mxu1  ;;  %v2583_v27 = vld [vmem:[#allocation2 + $0x50] sm:$0xff] }
 0x190   : > { %2643 = vst.msk [vmem:[#allocation2 + $0x30] sm:$0xff] %vm486_vm2, %v2611_v6  ;;  %v2609_v21 = vadd.f32 %v2577_v14, %v2462_v9  ;;  %2292 = vst.msk [vmem:[#allocation2 + $0x70] sm:$0xff] %vm486_vm2, %v2260_v7  ;;  %v2258_v24 = vadd.f32 %v2226_v13, %v2135_v15  ;;  %v2235_v7 = vld [vmem:[#allocation2 + $0xa8] sm:$0xff] }
 0x191   : > { %v4413_v12 = vpop.f32.mrf.mxu0  ;;  %v4387_v20 = vpop.f32.mrf.mxu1  ;;  %v2581_v36 = vld [vmem:[#allocation2 + $0x40] sm:$0xff] }
 0x192   : > { %2641 = vst.msk [vmem:[#allocation2 + $0x20] sm:$0xff] %vm486_vm2, %v2609_v21  ;;  %v2612_v63 = vadd.f32 %v4413_v12, %v2580_v28  ;;  %2290 = vst.msk [vmem:[#allocation2 + $0x60] sm:$0xff] %vm486_vm2, %v2258_v24  ;;  %v2261_v32 = vadd.f32 %v4387_v20, %v2229_v10  ;;  %v2240_v24 = vld [vmem:[#allocation2 + $0xd0] sm:$0xff] }
 0x193   : > { %v2465_v33 = vpop.f32.mrf.mxu0  ;;  %v2138_v31 = vpop.f32.mrf.mxu1  ;;  %v2584_v8 = vld [vmem:[#allocation2 + $0x58] sm:$0xff] }
 0x194   : > { %2644 = vst.msk [vmem:[#allocation2 + $0x38] sm:$0xff] %vm486_vm2, %v2612_v63  ;;  %v2610_v0 = vadd.f32 %v2578_v59, %v2465_v33  ;;  %2293 = vst.msk [vmem:[#allocation2 + $0x78] sm:$0xff] %vm486_vm2, %v2261_v32  ;;  %v2259_v2 = vadd.f32 %v2227_v49, %v2138_v31  ;;  %v2238_v32 = vld [vmem:[#allocation2 + $0xc0] sm:$0xff] }
 0x195   : > { %v4416_v18 = vpop.f32.mrf.mxu0  ;;  %v4390_v26 = vpop.f32.mrf.mxu1  ;;  %v2582_v19 = vld [vmem:[#allocation2 + $0x48] sm:$0xff] }
 0x196   : > { %2642 = vst.msk [vmem:[#allocation2 + $0x28] sm:$0xff] %vm486_vm2, %v2610_v0  ;;  %v2615_v22 = vadd.f32 %v4416_v18, %v2583_v27  ;;  %2291 = vst.msk [vmem:[#allocation2 + $0x68] sm:$0xff] %vm486_vm2, %v2259_v2  ;;  %v2264_v34 = vadd.f32 %v4390_v26, %v2232_v30  ;;  %v2241_v2 = vld [vmem:[#allocation2 + $0xd8] sm:$0xff] }
 0x197   : > { %v2478_v29 = vpop.f32.mrf.mxu0  ;;  %v2151_v46 = vpop.f32.mrf.mxu1  ;;  %v2587_v41 = vld [vmem:[#allocation2 + $0x70] sm:$0xff] }
 0x198   : > { %2647 = vst.msk [vmem:[#allocation2 + $0x50] sm:$0xff] %vm486_vm2, %v2615_v22  ;;  %v2613_v58 = vadd.f32 %v2581_v36, %v2478_v29  ;;  %2296 = vst.msk [vmem:[#allocation2 + $0x90] sm:$0xff] %vm486_vm2, %v2264_v34  ;;  %v2262_v11 = vadd.f32 %v2230_v48, %v2151_v46  ;;  %v2239_v34 = vld [vmem:[#allocation2 + $0xc8] sm:$0xff] }
 0x199   : > { %v4417_v60 = vpop.f32.mrf.mxu0  ;;  %v4391_v45 = vpop.f32.mrf.mxu1  ;;  %v2585_v37 = vld [vmem:[#allocation2 + $0x60] sm:$0xff] }
 0x19a   : > { %2645 = vst.msk [vmem:[#allocation2 + $0x40] sm:$0xff] %vm486_vm2, %v2613_v58  ;;  %v2616_v1 = vadd.f32 %v4417_v60, %v2584_v8  ;;  %2294 = vst.msk [vmem:[#allocation2 + $0x80] sm:$0xff] %vm486_vm2, %v2262_v11  ;;  %v2265_v16 = vadd.f32 %v4391_v45, %v2233_v62  ;;  %v2244_v11 = vld [vmem:[#allocation2 + $0xf0] sm:$0xff] }
 0x19b   : > { %v2481_v17 = vpop.f32.mrf.mxu0  ;;  %v2154_v25 = vpop.f32.mrf.mxu1  ;;  %v2588_v56 = vld [vmem:[#allocation2 + $0x78] sm:$0xff] }
 0x19c   : > { %2648 = vst.msk [vmem:[#allocation2 + $0x58] sm:$0xff] %vm486_vm2, %v2616_v1  ;;  %v2614_v39 = vadd.f32 %v2582_v19, %v2481_v17  ;;  %2297 = vst.msk [vmem:[#allocation2 + $0x98] sm:$0xff] %vm486_vm2, %v2265_v16  ;;  %v2263_v43 = vadd.f32 %v2231_v23, %v2154_v25  ;;  %v2242_v16 = vld [vmem:[#allocation2 + $0xe0] sm:$0xff] }
 0x19d   : > { %v4420_v40 = vpop.f32.mrf.mxu0  ;;  %v4394_v42 = vpop.f32.mrf.mxu1  ;;  %v2586_v38 = vld [vmem:[#allocation2 + $0x68] sm:$0xff] }
 0x19e   : > { %2646 = vst.msk [vmem:[#allocation2 + $0x48] sm:$0xff] %vm486_vm2, %v2614_v39  ;;  %v2619_v35 = vadd.f32 %v4420_v40, %v2587_v41  ;;  %2295 = vst.msk [vmem:[#allocation2 + $0x88] sm:$0xff] %vm486_vm2, %v2263_v43  ;;  %v2268_v44 = vadd.f32 %v4394_v42, %v2236_v50  ;;  %v2245_v43 = vld [vmem:[#allocation2 + $0xf8] sm:$0xff] }
 0x19f   : > { %v2494_v51 = vpop.f32.mrf.mxu0  ;;  %v2167_v52 = vpop.f32.mrf.mxu1  ;;  %v2591_v13 = vld [vmem:[#allocation2 + $0x90] sm:$0xff] }
 0x1a0   : > { %2651 = vst.msk [vmem:[#allocation2 + $0x70] sm:$0xff] %vm486_vm2, %v2619_v35  ;;  %v2617_v53 = vadd.f32 %v2585_v37, %v2494_v51  ;;  %2300 = vst.msk [vmem:[#allocation2 + $0xb0] sm:$0xff] %vm486_vm2, %v2268_v44  ;;  %v2266_v54 = vadd.f32 %v2234_v61, %v2167_v52  ;;  %v2243_v44 = vld [vmem:[#allocation2 + $0xe8] sm:$0xff] }
 0x1a1   : > { %v4421_v55 = vpop.f32.mrf.mxu0  ;;  %v4395_v57 = vpop.f32.mrf.mxu1  ;;  %v2589_v10 = vld [vmem:[#allocation2 + $0x80] sm:$0xff] }
 0x1a2   : > { %2649 = vst.msk [vmem:[#allocation2 + $0x60] sm:$0xff] %vm486_vm2, %v2617_v53  ;;  %v2620_v47 = vadd.f32 %v4421_v55, %v2588_v56  ;;  %2298 = vst.msk [vmem:[#allocation2 + $0xa0] sm:$0xff] %vm486_vm2, %v2266_v54  ;;  %v2269_v4 = vadd.f32 %v4395_v57, %v2237_v3  ;;  %v2933_v55 = vld [vmem:[#allocation2 + $0x10] sm:$0xff] }
 0x1a3   : > { %v2497_v5 = vpop.f32.mrf.mxu0  ;;  %v2170_v6 = vpop.f32.mrf.mxu1  ;;  %v2592_v49 = vld [vmem:[#allocation2 + $0x98] sm:$0xff] }
 0x1a4   : > { %2652 = vst.msk [vmem:[#allocation2 + $0x78] sm:$0xff] %vm486_vm2, %v2620_v47  ;;  %v2618_v9 = vadd.f32 %v2586_v38, %v2497_v5  ;;  %2301 = vst.msk [vmem:[#allocation2 + $0xb8] sm:$0xff] %vm486_vm2, %v2269_v4  ;;  %v2267_v14 = vadd.f32 %v2235_v7, %v2170_v6  ;;  %v2931_v5 = vld [vmem:[#allocation2] sm:$0xff] }
 0x1a5   : > { %v4424_v15 = vpop.f32.mrf.mxu0  ;;  %v4398_v21 = vpop.f32.mrf.mxu1  ;;  %v2590_v30 = vld [vmem:[#allocation2 + $0x88] sm:$0xff] }
 0x1a6   : > { %2650 = vst.msk [vmem:[#allocation2 + $0x68] sm:$0xff] %vm486_vm2, %v2618_v9  ;;  %v2623_v12 = vadd.f32 %v4424_v15, %v2591_v13  ;;  %2299 = vst.msk [vmem:[#allocation2 + $0xa8] sm:$0xff] %vm486_vm2, %v2267_v14  ;;  %v2272_v28 = vadd.f32 %v4398_v21, %v2240_v24  ;;  %v2934_v15 = vld [vmem:[#allocation2 + $0x18] sm:$0xff] }
 0x1a7   : > { %v2510_v20 = vpop.f32.mrf.mxu0  ;;  %v2183_v63 = vpop.f32.mrf.mxu1  ;;  %v2595_v48 = vld [vmem:[#allocation2 + $0xb0] sm:$0xff] }
 0x1a8   : > { %2655 = vst.msk [vmem:[#allocation2 + $0x90] sm:$0xff] %vm486_vm2, %v2623_v12  ;;  %v2621_v33 = vadd.f32 %v2589_v10, %v2510_v20  ;;  %2304 = vst.msk [vmem:[#allocation2 + $0xd0] sm:$0xff] %vm486_vm2, %v2272_v28  ;;  %v2270_v59 = vadd.f32 %v2238_v32, %v2183_v63  ;;  %v2932_v20 = vld [vmem:[#allocation2 + $0x8] sm:$0xff] }
 0x1a9   : > { %v4425_v31 = vpop.f32.mrf.mxu0  ;;  %v4399_v0 = vpop.f32.mrf.mxu1  ;;  %v2593_v62 = vld [vmem:[#allocation2 + $0xa0] sm:$0xff] }
 0x1aa   : > { %2653 = vst.msk [vmem:[#allocation2 + $0x80] sm:$0xff] %vm486_vm2, %v2621_v33  ;;  %v2624_v18 = vadd.f32 %v4425_v31, %v2592_v49  ;;  %2302 = vst.msk [vmem:[#allocation2 + $0xc0] sm:$0xff] %vm486_vm2, %v2270_v59  ;;  %v2273_v27 = vadd.f32 %v4399_v0, %v2241_v2  ;;  %v2937_v31 = vld [vmem:[#allocation2 + $0x30] sm:$0xff] }
 0x1ab   : > { %v2513_v26 = vpop.f32.mrf.mxu0  ;;  %v2186_v22 = vpop.f32.mrf.mxu1  ;;  %v2596_v23 = vld [vmem:[#allocation2 + $0xb8] sm:$0xff] }
 0x1ac   : > { %2656 = vst.msk [vmem:[#allocation2 + $0x98] sm:$0xff] %vm486_vm2, %v2624_v18  ;;  %v2622_v29 = vadd.f32 %v2590_v30, %v2513_v26  ;;  %2305 = vst.msk [vmem:[#allocation2 + $0xd8] sm:$0xff] %vm486_vm2, %v2273_v27  ;;  %v2271_v36 = vadd.f32 %v2239_v34, %v2186_v22  ;;  %v2935_v26 = vld [vmem:[#allocation2 + $0x20] sm:$0xff] }
 0x1ad   : > { %v4428_v46 = vpop.f32.mrf.mxu0  ;;  %v4402_v58 = vpop.f32.mrf.mxu1  ;;  %v2594_v50 = vld [vmem:[#allocation2 + $0xa8] sm:$0xff] }
 0x1ae   : > { %2654 = vst.msk [vmem:[#allocation2 + $0x88] sm:$0xff] %vm486_vm2, %v2622_v29  ;;  %v2627_v60 = vadd.f32 %v4428_v46, %v2595_v48  ;;  %2303 = vst.msk [vmem:[#allocation2 + $0xc8] sm:$0xff] %vm486_vm2, %v2271_v36  ;;  %v2276_v8 = vadd.f32 %v4402_v58, %v2244_v11  ;;  %v2938_v46 = vld [vmem:[#allocation2 + $0x38] sm:$0xff] }
 0x1af   : > { %v2526_v45 = vpop.f32.mrf.mxu0  ;;  %v2199_v1 = vpop.f32.mrf.mxu1  ;;  %v2599_v61 = vld [vmem:[#allocation2 + $0xd0] sm:$0xff] }
 0x1b0   : > { %2659 = vst.msk [vmem:[#allocation2 + $0xb0] sm:$0xff] %vm486_vm2, %v2627_v60  ;;  %v2625_v17 = vadd.f32 %v2593_v62, %v2526_v45  ;;  %2308 = vst.msk [vmem:[#allocation2 + $0xf0] sm:$0xff] %vm486_vm2, %v2276_v8  ;;  %v2274_v19 = vadd.f32 %v2242_v16, %v2199_v1  ;;  %v2936_v45 = vld [vmem:[#allocation2 + $0x28] sm:$0xff] }
 0x1b1   : > { %v4429_v25 = vpop.f32.mrf.mxu0  ;;  %v4403_v39 = vpop.f32.mrf.mxu1  ;;  %v2597_v3 = vld [vmem:[#allocation2 + $0xc0] sm:$0xff] }
 0x1b2   : > { %2657 = vst.msk [vmem:[#allocation2 + $0xa0] sm:$0xff] %vm486_vm2, %v2625_v17  ;;  %v2628_v40 = vadd.f32 %v4429_v25, %v2596_v23  ;;  %2306 = vst.msk [vmem:[#allocation2 + $0xe0] sm:$0xff] %vm486_vm2, %v2274_v19  ;;  %v2277_v41 = vadd.f32 %v4403_v39, %v2245_v43  ;;  %v2941_v19 = vld [vmem:[#allocation2 + $0x50] sm:$0xff] }
 0x1b3   : > { %v2529_v42 = vpop.f32.mrf.mxu0  ;;  %v2202_v35 = vpop.f32.mrf.mxu1  ;;  %v2600_v7 = vld [vmem:[#allocation2 + $0xd8] sm:$0xff] }
 0x1b4   : > { %2660 = vst.msk [vmem:[#allocation2 + $0xb8] sm:$0xff] %vm486_vm2, %v2628_v40  ;;  %v2626_v51 = vadd.f32 %v2594_v50, %v2529_v42  ;;  %2309 = vst.msk [vmem:[#allocation2 + $0xf8] sm:$0xff] %vm486_vm2, %v2277_v41  ;;  %v2275_v37 = vadd.f32 %v2243_v44, %v2202_v35  ;;  %v2939_v41 = vld [vmem:[#allocation2 + $0x40] sm:$0xff] }
 0x1b5   : > { %v4432_v52 = vpop.f32.mrf.mxu0  ;;  %v4442_v54 = vpop.f32.mrf.mxu1  ;;  %v2598_v24 = vld [vmem:[#allocation2 + $0xc8] sm:$0xff] }
 0x1b6   : > { %2658 = vst.msk [vmem:[#allocation2 + $0xa8] sm:$0xff] %vm486_vm2, %v2626_v51  ;;  %v2631_v53 = vadd.f32 %v4432_v52, %v2599_v61  ;;  %2307 = vst.msk [vmem:[#allocation2 + $0xe8] sm:$0xff] %vm486_vm2, %v2275_v37  ;;  %v2965_v56 = vadd.f32 %v4442_v54, %v2933_v55  ;;  %v2942_v37 = vld [vmem:[#allocation2 + $0x58] sm:$0xff] }
 0x1b7   : > { %v2542_v57 = vpop.f32.mrf.mxu0  ;;  %v2804_v4 = vpop.f32.mrf.mxu1  ;;  %v2603_v32 = vld [vmem:[#allocation2 + $0xf0] sm:$0xff] }
 0x1b8   : > { %2663 = vst.msk [vmem:[#allocation2 + $0xd0] sm:$0xff] %vm486_vm2, %v2631_v53  ;;  %v2629_v47 = vadd.f32 %v2597_v3, %v2542_v57  ;;  %2997 = vst.msk [vmem:[#allocation2 + $0x10] sm:$0xff] %vm486_vm2, %v2965_v56  ;;  %v2963_v38 = vadd.f32 %v2931_v5, %v2804_v4  ;;  %v2940_v56 = vld [vmem:[#allocation2 + $0x48] sm:$0xff] }
 0x1b9   : > { %v4433_v6 = vpop.f32.mrf.mxu0  ;;  %v4443_v14 = vpop.f32.mrf.mxu1  ;;  %v2601_v2 = vld [vmem:[#allocation2 + $0xe0] sm:$0xff] }
 0x1ba   : > { %2661 = vst.msk [vmem:[#allocation2 + $0xc0] sm:$0xff] %vm486_vm2, %v2629_v47  ;;  %v2632_v9 = vadd.f32 %v4433_v6, %v2600_v7  ;;  %2995 = vst.msk [vmem:[#allocation2] sm:$0xff] %vm486_vm2, %v2963_v38  ;;  %v2966_v13 = vadd.f32 %v4443_v14, %v2934_v15  ;;  %v2945_v38 = vld [vmem:[#allocation2 + $0x70] sm:$0xff]  ;;  %v5532_v15 = vld [vmem:[%s5698_s2] ss:$0 sm:$0xff] }
 0x1bb   : > { %v2545_v21 = vpop.f32.mrf.mxu0  ;;  %v2807_v28 = vpop.f32.mrf.mxu1  ;;  %v2604_v34 = vld [vmem:[#allocation2 + $0xf8] sm:$0xff] }
 0x1bc   : > { %2664 = vst.msk [vmem:[#allocation2 + $0xd8] sm:$0xff] %vm486_vm2, %v2632_v9  ;;  %v2630_v12 = vadd.f32 %v2598_v24, %v2545_v21  ;;  %2998 = vst.msk [vmem:[#allocation2 + $0x18] sm:$0xff] %vm486_vm2, %v2966_v13  ;;  %v2964_v10 = vadd.f32 %v2932_v20, %v2807_v28  ;;  %v2943_v21 = vld [vmem:[#allocation2 + $0x60] sm:$0xff] }
 0x1bd   : > { %v4436_v63 = vpop.f32.mrf.mxu0  ;;  %v4446_v59 = vpop.f32.mrf.mxu1  ;;  %v2602_v11 = vld [vmem:[#allocation2 + $0xe8] sm:$0xff] }
 0x1be   : > { %2662 = vst.msk [vmem:[#allocation2 + $0xc8] sm:$0xff] %vm486_vm2, %v2630_v12  ;;  %v2635_v33 = vadd.f32 %v4436_v63, %v2603_v32  ;;  %2996 = vst.msk [vmem:[#allocation2 + $0x8] sm:$0xff] %vm486_vm2, %v2964_v10  ;;  %v2969_v49 = vadd.f32 %v4446_v59, %v2937_v31  ;;  %v2946_v59 = vld [vmem:[#allocation2 + $0x78] sm:$0xff] }
 0x1bf   : > { %v2558_v0 = vpop.f32.mrf.mxu0  ;;  %v2820_v27 = vpop.f32.mrf.mxu1  ;;  %v3291_v16 = vld [vmem:[#allocation2 + $0x10] sm:$0xff] }
 0x1c0   : > { %2667 = vst.msk [vmem:[#allocation2 + $0xf0] sm:$0xff] %vm486_vm2, %v2635_v33  ;;  %v2633_v18 = vadd.f32 %v2601_v2, %v2558_v0  ;;  %3001 = vst.msk [vmem:[#allocation2 + $0x30] sm:$0xff] %vm486_vm2, %v2969_v49  ;;  %v2967_v30 = vadd.f32 %v2935_v26, %v2820_v27 }
 0x1c1   : > { %v4437_v22 = vpop.f32.mrf.mxu0  ;;  %v4447_v36 = vpop.f32.mrf.mxu1  ;;  %v3289_v43 = vld [vmem:[#allocation2] sm:$0xff] }
 0x1c2   : > { %2665 = vst.msk [vmem:[#allocation2 + $0xe0] sm:$0xff] %vm486_vm2, %v2633_v18  ;;  %v2636_v29 = vadd.f32 %v4437_v22, %v2604_v34  ;;  %2999 = vst.msk [vmem:[#allocation2 + $0x20] sm:$0xff] %vm486_vm2, %v2967_v30  ;;  %v2970_v48 = vadd.f32 %v4447_v36, %v2938_v46  ;;  %v2944_v30 = vld [vmem:[#allocation2 + $0x68] sm:$0xff] }
 0x1c3   : > { %v2561_v58 = vpop.f32.mrf.mxu0  ;;  %v2823_v8 = vpop.f32.mrf.mxu1  ;;  %v3292_v44 = vld [vmem:[#allocation2 + $0x18] sm:$0xff] }
 0x1c4   : > { %2668 = vst.msk [vmem:[#allocation2 + $0xf8] sm:$0xff] %vm486_vm2, %v2636_v29  ;;  %v2634_v60 = vadd.f32 %v2602_v11, %v2561_v58  ;;  %3002 = vst.msk [vmem:[#allocation2 + $0x38] sm:$0xff] %vm486_vm2, %v2970_v48  ;;  %v2968_v62 = vadd.f32 %v2936_v45, %v2823_v8  ;;  %v2949_v8 = vld [vmem:[#allocation2 + $0x90] sm:$0xff] }
 0x1c5   : > { %v4476_v1 = vpop.f32.mrf.mxu0  ;;  %v4450_v17 = vpop.f32.mrf.mxu1  ;;  %v3290_v54 = vld [vmem:[#allocation2 + $0x8] sm:$0xff] }
 0x1c6   : > { %2666 = vst.msk [vmem:[#allocation2 + $0xe8] sm:$0xff] %vm486_vm2, %v2634_v60  ;;  %v3323_v25 = vadd.f32 %v4476_v1, %v3291_v16  ;;  %3000 = vst.msk [vmem:[#allocation2 + $0x28] sm:$0xff] %vm486_vm2, %v2968_v62  ;;  %v2973_v23 = vadd.f32 %v4450_v17, %v2941_v19 }
 0x1c7   : > { %v3162_v39 = vpop.f32.mrf.mxu0  ;;  %v2836_v40 = vpop.f32.mrf.mxu1  ;;  %v3295_v4 = vld [vmem:[#allocation2 + $0x30] sm:$0xff] }
 0x1c8   : > { %3355 = vst.msk [vmem:[#allocation2 + $0x10] sm:$0xff] %vm486_vm2, %v3323_v25  ;;  %v3321_v42 = vadd.f32 %v3289_v43, %v3162_v39  ;;  %3005 = vst.msk [vmem:[#allocation2 + $0x50] sm:$0xff] %vm486_vm2, %v2973_v23  ;;  %v2971_v50 = vadd.f32 %v2939_v41, %v2836_v40  ;;  %v2947_v23 = vld [vmem:[#allocation2 + $0x80] sm:$0xff] }
 0x1c9   : > { %v4477_v35 = vpop.f32.mrf.mxu0  ;;  %v4451_v51 = vpop.f32.mrf.mxu1  ;;  %v3293_v14 = vld [vmem:[#allocation2 + $0x20] sm:$0xff] }
 0x1ca   : > { %3353 = vst.msk [vmem:[#allocation2] sm:$0xff] %vm486_vm2, %v3321_v42  ;;  %v3324_v52 = vadd.f32 %v4477_v35, %v3292_v44  ;;  %3003 = vst.msk [vmem:[#allocation2 + $0x40] sm:$0xff] %vm486_vm2, %v2971_v50  ;;  %v2974_v61 = vadd.f32 %v4451_v51, %v2942_v37 }
 0x1cb   : > { %v3165_v53 = vpop.f32.mrf.mxu0  ;;  %v2839_v55 = vpop.f32.mrf.mxu1  ;;  %v3296_v63 = vld [vmem:[#allocation2 + $0x38] sm:$0xff] }
 0x1cc   : > { %3356 = vst.msk [vmem:[#allocation2 + $0x18] sm:$0xff] %vm486_vm2, %v3324_v52  ;;  %v3322_v57 = vadd.f32 %v3290_v54, %v3165_v53  ;;  %3006 = vst.msk [vmem:[#allocation2 + $0x58] sm:$0xff] %vm486_vm2, %v2974_v61  ;;  %v2972_v3 = vadd.f32 %v2940_v56, %v2839_v55  ;;  %v2950_v61 = vld [vmem:[#allocation2 + $0x98] sm:$0xff] }
 0x1cd   : > { %v4480_v47 = vpop.f32.mrf.mxu0  ;;  %v4454_v5 = vpop.f32.mrf.mxu1  ;;  %v3294_v18 = vld [vmem:[#allocation2 + $0x28] sm:$0xff] }
 0x1ce   : > { %3354 = vst.msk [vmem:[#allocation2 + $0x8] sm:$0xff] %vm486_vm2, %v3322_v57  ;;  %v3327_v6 = vadd.f32 %v4480_v47, %v3295_v4  ;;  %3004 = vst.msk [vmem:[#allocation2 + $0x48] sm:$0xff] %vm486_vm2, %v2972_v3  ;;  %v2977_v7 = vadd.f32 %v4454_v5, %v2945_v38 }
 0x1cf   : > { %v3178_v9 = vpop.f32.mrf.mxu0  ;;  %v2852_v13 = vpop.f32.mrf.mxu1  ;;  %v3387_v12 = vld [vmem:[#allocation2 + $0x10] sm:$0xff] }
 0x1d0   : > { %3359 = vst.msk [vmem:[#allocation2 + $0x30] sm:$0xff] %vm486_vm2, %v3327_v6  ;;  %v3325_v24 = vadd.f32 %v3293_v14, %v3178_v9  ;;  %3009 = vst.msk [vmem:[#allocation2 + $0x70] sm:$0xff] %vm486_vm2, %v2977_v7  ;;  %v2975_v20 = vadd.f32 %v2943_v21, %v2852_v13  ;;  %v3426_v27 = vadd.f32 %v5532_v15, %v3387_v12  ;;  %v3299_v48 = vld [vmem:[#allocation2 + $0x50] sm:$0xff]  ;;  %v2948_v6 = vld [vmem:[#allocation2 + $0x88] sm:$0xff] }
 0x1d1   : > { %v3385_v28 = vld [vmem:[#allocation2] sm:$0xff]  ;;  %v4481_v10 = vpop.f32.mrf.mxu0  ;;  %v4455_v33 = vpop.f32.mrf.mxu1 }
 0x1d2   : > { %v3424_v32 = vadd.f32 %v5532_v15, %v3385_v28  ;;  %3357 = vst.msk [vmem:[#allocation2 + $0x20] sm:$0xff] %vm486_vm2, %v3325_v24  ;;  %v3328_v31 = vadd.f32 %v4481_v10, %v3296_v63  ;;  %3007 = vst.msk [vmem:[#allocation2 + $0x60] sm:$0xff] %vm486_vm2, %v2975_v20  ;;  %v2978_v0 = vadd.f32 %v4455_v33, %v2946_v59  ;;  %v3297_v16 = vld [vmem:[#allocation2 + $0x40] sm:$0xff]  ;;  %v3458_v17 = vmax.f32 %v3426_v27, 0.0  ;;  %v2953_v63 = vld [vmem:[#allocation2 + $0xb0] sm:$0xff] }
 0x1d3   : > { %v3388_v49 = vld [vmem:[#allocation2 + $0x18] sm:$0xff]  ;;  %v3181_v2 = vpop.f32.mrf.mxu0  ;;  %v2855_v26 = vpop.f32.mrf.mxu1 }
 0x1d4   : > { %3360 = vst.msk [vmem:[#allocation2 + $0x38] sm:$0xff] %vm486_vm2, %v3328_v31  ;;  %v3326_v22 = vadd.f32 %v3294_v18, %v3181_v2  ;;  %v3456_v34 = vmax.f32 %v3424_v32, 0.0  ;;  %3010 = vst.msk [vmem:[#allocation2 + $0x78] sm:$0xff] %vm486_vm2, %v2978_v0  ;;  %v2976_v36 = vadd.f32 %v2944_v30, %v2855_v26  ;;  %v3427_v58 = vadd.f32 %v5532_v15, %v3388_v49  ;;  %v3300_v35 = vld [vmem:[#allocation2 + $0x58] sm:$0xff]  ;;  %v2951_v26 = vld [vmem:[#allocation2 + $0xa0] sm:$0xff] }
 0x1d5   : > { %v3386_v29 = vld [vmem:[#allocation2 + $0x8] sm:$0xff]  ;;  %v4484_v46 = vpop.f32.mrf.mxu0  ;;  %v4458_v60 = vpop.f32.mrf.mxu1  ;;  %v3491_v47 = vsel %vm486_vm2, %v3458_v17, 0.0 }
 0x1d6   : > { %v3425_v11 = vadd.f32 %v5532_v15, %v3386_v29  ;;  %3358 = vst.msk [vmem:[#allocation2 + $0x28] sm:$0xff] %vm486_vm2, %v3326_v22  ;;  %v3331_v45 = vadd.f32 %v4484_v46, %v3299_v48  ;;  %3008 = vst.msk [vmem:[#allocation2 + $0x68] sm:$0xff] %vm486_vm2, %v2976_v36  ;;  %v2981_v62 = vadd.f32 %v4458_v60, %v2949_v8  ;;  %v3488_v43 = vsel %vm486_vm2, %v3456_v34, 0.0  ;;  %v3298_v3 = vld [vmem:[#allocation2 + $0x48] sm:$0xff] }
 0x1d7   : > { %v3194_v1 = vpop.f32.mrf.mxu0  ;;  %v2868_v25 = vpop.f32.mrf.mxu1  ;;  %v3391_v40 = vld [vmem:[#allocation2 + $0x30] sm:$0xff]  ;;  %v3459_v44 = vmax.f32 %v3427_v58, 0.0 }
 0x1d8   : > { %v3457_v19 = vmax.f32 %v3425_v11, 0.0  ;;  %3363 = vst.msk [vmem:[#allocation2 + $0x50] sm:$0xff] %vm486_vm2, %v3331_v45  ;;  %v3329_v39 = vadd.f32 %v3297_v16, %v3194_v1  ;;  %3013 = vst.msk [vmem:[#allocation2 + $0x90] sm:$0xff] %vm486_vm2, %v2981_v62  ;;  %v2979_v42 = vadd.f32 %v2947_v23, %v2868_v25  ;;  %v3430_v4 = vadd.f32 %v5532_v15, %v3391_v40  ;;  %v3303_v24 = vld [vmem:[#allocation2 + $0x70] sm:$0xff]  ;;  %v2954_v45 = vld [vmem:[#allocation2 + $0xb8] sm:$0xff] }
 0x1d9   : > { %v3389_v41 = vld [vmem:[#allocation2 + $0x20] sm:$0xff]  ;;  %v4485_v50 = vpop.f32.mrf.mxu0  ;;  %v4459_v52 = vpop.f32.mrf.mxu1  ;;  %v3493_v12 = vsel %vm486_vm2, %v3459_v44, 0.0 }
 0x1da   : > { %v3489_v51 = vsel %vm486_vm2, %v3457_v19, 0.0  ;;  %v3428_v37 = vadd.f32 %v5532_v15, %v3389_v41  ;;  %3361 = vst.msk [vmem:[#allocation2 + $0x40] sm:$0xff] %vm486_vm2, %v3329_v39  ;;  %v3332_v53 = vadd.f32 %v4485_v50, %v3300_v35  ;;  %3011 = vst.msk [vmem:[#allocation2 + $0x80] sm:$0xff] %vm486_vm2, %v2979_v42  ;;  %v2982_v56 = vadd.f32 %v4459_v52, %v2950_v61  ;;  %v3301_v49 = vld [vmem:[#allocation2 + $0x60] sm:$0xff]  ;;  %v2952_v41 = vld [vmem:[#allocation2 + $0xa8] sm:$0xff] }
 0x1db   : > { %v3490_v54 = vadd.f32 %v3489_v51, %v3488_v43  ;;  %v3392_v55 = vld [vmem:[#allocation2 + $0x38] sm:$0xff]  ;;  %v3197_v57 = vpop.f32.mrf.mxu0  ;;  %v2871_v38 = vpop.f32.mrf.mxu1  ;;  %v3462_v0 = vmax.f32 %v3430_v4, 0.0 }
 0x1dc   : > { %v3460_v5 = vmax.f32 %v3428_v37, 0.0  ;;  %3364 = vst.msk [vmem:[#allocation2 + $0x58] sm:$0xff] %vm486_vm2, %v3332_v53  ;;  %v3330_v7 = vadd.f32 %v3298_v3, %v3197_v57  ;;  %3014 = vst.msk [vmem:[#allocation2 + $0x98] sm:$0xff] %vm486_vm2, %v2982_v56  ;;  %v2980_v13 = vadd.f32 %v2948_v6, %v2871_v38  ;;  %v3431_v28 = vadd.f32 %v5532_v15, %v3392_v55  ;;  %v3304_v48 = vld [vmem:[#allocation2 + $0x78] sm:$0xff]  ;;  %v2957_v55 = vld [vmem:[#allocation2 + $0xd0] sm:$0xff] }
 0x1dd   : > { %v3492_v9 = vadd.f32 %v3491_v47, %v3490_v54  ;;  %v3390_v14 = vld [vmem:[#allocation2 + $0x28] sm:$0xff]  ;;  %v4488_v21 = vpop.f32.mrf.mxu0  ;;  %v4462_v10 = vpop.f32.mrf.mxu1  ;;  %v3499_v23 = vsel %vm486_vm2, %v3462_v0, 0.0 }
 0x1de   : > { %v3429_v20 = vadd.f32 %v5532_v15, %v3390_v14  ;;  %3362 = vst.msk [vmem:[#allocation2 + $0x48] sm:$0xff] %vm486_vm2, %v3330_v7  ;;  %v3335_v32 = vadd.f32 %v4488_v21, %v3303_v24  ;;  %3012 = vst.msk [vmem:[#allocation2 + $0x88] sm:$0xff] %vm486_vm2, %v2980_v13  ;;  %v2985_v59 = vadd.f32 %v4462_v10, %v2953_v63  ;;  %v3495_v2 = vsel %vm486_vm2, %v3460_v5, 0.0  ;;  %v3302_v25 = vld [vmem:[#allocation2 + $0x68] sm:$0xff] }
 0x1df   : > { %v3494_v33 = vadd.f32 %v3493_v12, %v3492_v9  ;;  %v3210_v31 = vpop.f32.mrf.mxu0  ;;  %v2884_v27 = vpop.f32.mrf.mxu1  ;;  %v3395_v34 = vld [vmem:[#allocation2 + $0x50] sm:$0xff]  ;;  %v3463_v58 = vmax.f32 %v3431_v28, 0.0  ;;  %v2955_v9 = vld [vmem:[#allocation2 + $0xc0] sm:$0xff] }
 0x1e0   : > { %v3461_v18 = vmax.f32 %v3429_v20, 0.0  ;;  %3367 = vst.msk [vmem:[#allocation2 + $0x70] sm:$0xff] %vm486_vm2, %v3335_v32  ;;  %v3333_v30 = vadd.f32 %v3301_v49, %v3210_v31  ;;  %3017 = vst.msk [vmem:[#allocation2 + $0xb0] sm:$0xff] %vm486_vm2, %v2985_v59  ;;  %v2983_v36 = vadd.f32 %v2951_v26, %v2884_v27  ;;  %v3434_v39 = vadd.f32 %v5532_v15, %v3395_v34  ;;  %v3307_v37 = vld [vmem:[#allocation2 + $0x90] sm:$0xff]  ;;  %v2958_v59 = vld [vmem:[#allocation2 + $0xd8] sm:$0xff] }
 0x1e1   : > { %v3496_v22 = vadd.f32 %v3495_v2, %v3494_v33  ;;  %v3393_v29 = vld [vmem:[#allocation2 + $0x40] sm:$0xff]  ;;  %v4489_v46 = vpop.f32.mrf.mxu0  ;;  %v4463_v8 = vpop.f32.mrf.mxu1  ;;  %v3501_v52 = vsel %vm486_vm2, %v3463_v58, 0.0 }
 0x1e2   : > { %v3497_v11 = vsel %vm486_vm2, %v3461_v18, 0.0  ;;  %v3432_v60 = vadd.f32 %v5532_v15, %v3393_v29  ;;  %3365 = vst.msk [vmem:[#allocation2 + $0x60] sm:$0xff] %vm486_vm2, %v3333_v30  ;;  %v3336_v62 = vadd.f32 %v4489_v46, %v3304_v48  ;;  %3015 = vst.msk [vmem:[#allocation2 + $0xa0] sm:$0xff] %vm486_vm2, %v2983_v36  ;;  %v2986_v17 = vadd.f32 %v4463_v8, %v2954_v45  ;;  %v3305_v4 = vld [vmem:[#allocation2 + $0x80] sm:$0xff]  ;;  %v2956_v29 = vld [vmem:[#allocation2 + $0xc8] sm:$0xff] }
 0x1e3   : > { %v3498_v1 = vadd.f32 %v3497_v11, %v3496_v22  ;;  %v3396_v16 = vld [vmem:[#allocation2 + $0x58] sm:$0xff]  ;;  %v3213_v19 = vpop.f32.mrf.mxu0  ;;  %v2887_v40 = vpop.f32.mrf.mxu1  ;;  %v3466_v5 = vmax.f32 %v3434_v39, 0.0 }
 0x1e4   : > { %v3464_v43 = vmax.f32 %v3432_v60, 0.0  ;;  %3368 = vst.msk [vmem:[#allocation2 + $0x78] sm:$0xff] %vm486_vm2, %v3336_v62  ;;  %v3334_v42 = vadd.f32 %v3302_v25, %v3213_v19  ;;  %3018 = vst.msk [vmem:[#allocation2 + $0xb8] sm:$0xff] %vm486_vm2, %v2986_v17  ;;  %v2984_v44 = vadd.f32 %v2952_v41, %v2887_v40  ;;  %v3435_v61 = vadd.f32 %v5532_v15, %v3396_v16  ;;  %v3308_v20 = vld [vmem:[#allocation2 + $0x98] sm:$0xff]  ;;  %v2961_v16 = vld [vmem:[#allocation2 + $0xf0] sm:$0xff] }
 0x1e5   : > { %v3500_v50 = vadd.f32 %v3499_v23, %v3498_v1  ;;  %v3394_v35 = vld [vmem:[#allocation2 + $0x48] sm:$0xff]  ;;  %v4492_v51 = vpop.f32.mrf.mxu0  ;;  %v4466_v54 = vpop.f32.mrf.mxu1  ;;  %v3507_v26 = vsel %vm486_vm2, %v3466_v5, 0.0 }
 0x1e6   : > { %v3433_v53 = vadd.f32 %v5532_v15, %v3394_v35  ;;  %3366 = vst.msk [vmem:[#allocation2 + $0x68] sm:$0xff] %vm486_vm2, %v3334_v42  ;;  %v3339_v56 = vadd.f32 %v4492_v51, %v3307_v37  ;;  %3016 = vst.msk [vmem:[#allocation2 + $0xa8] sm:$0xff] %vm486_vm2, %v2984_v44  ;;  %v2989_v3 = vadd.f32 %v4466_v54, %v2957_v55  ;;  %v3503_v38 = vsel %vm486_vm2, %v3464_v43, 0.0  ;;  %v3306_v27 = vld [vmem:[#allocation2 + $0x88] sm:$0xff] }
 0x1e7   : > { %v3502_v57 = vadd.f32 %v3501_v52, %v3500_v50  ;;  %v3226_v47 = vpop.f32.mrf.mxu0  ;;  %v2900_v7 = vpop.f32.mrf.mxu1  ;;  %v3399_v21 = vld [vmem:[#allocation2 + $0x70] sm:$0xff]  ;;  %v3467_v10 = vmax.f32 %v3435_v61, 0.0  ;;  %v2959_v50 = vld [vmem:[#allocation2 + $0xe0] sm:$0xff] }
 0x1e8   : > { %v3465_v6 = vmax.f32 %v3433_v53, 0.0  ;;  %3371 = vst.msk [vmem:[#allocation2 + $0x90] sm:$0xff] %vm486_vm2, %v3339_v56  ;;  %v3337_v14 = vadd.f32 %v3305_v4, %v3226_v47  ;;  %3021 = vst.msk [vmem:[#allocation2 + $0xd0] sm:$0xff] %vm486_vm2, %v2989_v3  ;;  %v2987_v12 = vadd.f32 %v2955_v9, %v2900_v7  ;;  %v3438_v30 = vadd.f32 %v5532_v15, %v3399_v21  ;;  %v3311_v60 = vld [vmem:[#allocation2 + $0xb0] sm:$0xff]  ;;  %v2962_v3 = vld [vmem:[#allocation2 + $0xf8] sm:$0xff] }
 0x1e9   : > { %v3504_v13 = vadd.f32 %v3503_v38, %v3502_v57  ;;  %v3397_v24 = vld [vmem:[#allocation2 + $0x60] sm:$0xff]  ;;  %v4493_v28 = vpop.f32.mrf.mxu0  ;;  %v4467_v33 = vpop.f32.mrf.mxu1  ;;  %v3509_v8 = vsel %vm486_vm2, %v3467_v10, 0.0 }
 0x1ea   : > { %v3505_v63 = vsel %vm486_vm2, %v3465_v6, 0.0  ;;  %v3436_v32 = vadd.f32 %v5532_v15, %v3397_v24  ;;  %3369 = vst.msk [vmem:[#allocation2 + $0x80] sm:$0xff] %vm486_vm2, %v3337_v14  ;;  %v3340_v31 = vadd.f32 %v4493_v28, %v3308_v20  ;;  %3019 = vst.msk [vmem:[#allocation2 + $0xc0] sm:$0xff] %vm486_vm2, %v2987_v12  ;;  %v2990_v2 = vadd.f32 %v4467_v33, %v2958_v59  ;;  %v3309_v39 = vld [vmem:[#allocation2 + $0xa0] sm:$0xff]  ;;  %v2960_v24 = vld [vmem:[#allocation2 + $0xe8] sm:$0xff] }
 0x1eb   : > { %v3506_v49 = vadd.f32 %v3505_v63, %v3504_v13  ;;  %v3400_v0 = vld [vmem:[#allocation2 + $0x78] sm:$0xff]  ;;  %v3229_v18 = vpop.f32.mrf.mxu0  ;;  %v2903_v34 = vpop.f32.mrf.mxu1  ;;  %v3470_v43 = vmax.f32 %v3438_v30, 0.0 }
 0x1ec   : > { %v3468_v22 = vmax.f32 %v3436_v32, 0.0  ;;  %3372 = vst.msk [vmem:[#allocation2 + $0x98] sm:$0xff] %vm486_vm2, %v3340_v31  ;;  %v3338_v36 = vadd.f32 %v3306_v27, %v3229_v18  ;;  %3022 = vst.msk [vmem:[#allocation2 + $0xd8] sm:$0xff] %vm486_vm2, %v2990_v2  ;;  %v2988_v58 = vadd.f32 %v2956_v29, %v2903_v34  ;;  %v3439_v45 = vadd.f32 %v5532_v15, %v3400_v0  ;;  %v3312_v53 = vld [vmem:[#allocation2 + $0xb8] sm:$0xff] }
 0x1ed   : > { %v3508_v46 = vadd.f32 %v3507_v26, %v3506_v49  ;;  %v3398_v48 = vld [vmem:[#allocation2 + $0x68] sm:$0xff]  ;;  %v4496_v11 = vpop.f32.mrf.mxu0  ;;  %v4470_v1 = vpop.f32.mrf.mxu1  ;;  %v3515_v9 = vsel %vm486_vm2, %v3470_v43, 0.0 }
 0x1ee   : > { %v3437_v62 = vadd.f32 %v5532_v15, %v3398_v48  ;;  %3370 = vst.msk [vmem:[#allocation2 + $0x88] sm:$0xff] %vm486_vm2, %v3338_v36  ;;  %v3343_v17 = vadd.f32 %v4496_v11, %v3311_v60  ;;  %3020 = vst.msk [vmem:[#allocation2 + $0xc8] sm:$0xff] %vm486_vm2, %v2988_v58  ;;  %v2993_v25 = vadd.f32 %v4470_v1, %v2961_v16  ;;  %v3511_v40 = vsel %vm486_vm2, %v3468_v22, 0.0  ;;  %v3310_v7 = vld [vmem:[#allocation2 + $0xa8] sm:$0xff] }
 0x1ef   : > { %v3510_v19 = vadd.f32 %v3509_v8, %v3508_v46  ;;  %v3242_v23 = vpop.f32.mrf.mxu0  ;;  %v2916_v42 = vpop.f32.mrf.mxu1  ;;  %v3403_v51 = vld [vmem:[#allocation2 + $0x90] sm:$0xff]  ;;  %v3471_v54 = vmax.f32 %v3439_v45, 0.0 }
 0x1f0   : > { %v3469_v41 = vmax.f32 %v3437_v62, 0.0  ;;  %3375 = vst.msk [vmem:[#allocation2 + $0xb0] sm:$0xff] %vm486_vm2, %v3343_v17  ;;  %v3341_v35 = vadd.f32 %v3309_v39, %v3242_v23  ;;  %3025 = vst.msk [vmem:[#allocation2 + $0xf0] sm:$0xff] %vm486_vm2, %v2993_v25  ;;  %v2991_v52 = vadd.f32 %v2959_v50, %v2916_v42  ;;  %v3442_v14 = vadd.f32 %v5532_v15, %v3403_v51  ;;  %v3315_v32 = vld [vmem:[#allocation2 + $0xd0] sm:$0xff] }
 0x1f1   : > { %v3512_v44 = vadd.f32 %v3511_v40, %v3510_v19  ;;  %v3401_v37 = vld [vmem:[#allocation2 + $0x80] sm:$0xff]  ;;  %v4497_v61 = vpop.f32.mrf.mxu0  ;;  %v4471_v57 = vpop.f32.mrf.mxu1  ;;  %v3517_v33 = vsel %vm486_vm2, %v3471_v54, 0.0 }
 0x1f2   : > { %v3513_v55 = vsel %vm486_vm2, %v3469_v41, 0.0  ;;  %v3440_v56 = vadd.f32 %v5532_v15, %v3401_v37  ;;  %3373 = vst.msk [vmem:[#allocation2 + $0xa0] sm:$0xff] %vm486_vm2, %v3341_v35  ;;  %v3344_v47 = vadd.f32 %v4497_v61, %v3312_v53  ;;  %3023 = vst.msk [vmem:[#allocation2 + $0xe0] sm:$0xff] %vm486_vm2, %v2991_v52  ;;  %v2994_v38 = vadd.f32 %v4471_v57, %v2962_v3  ;;  %v3313_v18 = vld [vmem:[#allocation2 + $0xc0] sm:$0xff] }
 0x1f3   : > { %v3514_v4 = vadd.f32 %v3513_v55, %v3512_v44  ;;  %v3404_v5 = vld [vmem:[#allocation2 + $0x98] sm:$0xff]  ;;  %v3245_v6 = vpop.f32.mrf.mxu0  ;;  %v2919_v21 = vpop.f32.mrf.mxu1  ;;  %v3474_v27 = vmax.f32 %v3442_v14, 0.0 }
 0x1f4   : > { %v3472_v13 = vmax.f32 %v3440_v56, 0.0  ;;  %3376 = vst.msk [vmem:[#allocation2 + $0xb8] sm:$0xff] %vm486_vm2, %v3344_v47  ;;  %v3342_v12 = vadd.f32 %v3310_v7, %v3245_v6  ;;  %3026 = vst.msk [vmem:[#allocation2 + $0xf8] sm:$0xff] %vm486_vm2, %v2994_v38  ;;  %v2992_v10 = vadd.f32 %v2960_v24, %v2919_v21  ;;  %v3443_v59 = vadd.f32 %v5532_v15, %v3404_v5  ;;  %v3316_v48 = vld [vmem:[#allocation2 + $0xd8] sm:$0xff] }
 0x1f5   : > { %v3516_v28 = vadd.f32 %v3515_v9, %v3514_v4  ;;  %v3402_v20 = vld [vmem:[#allocation2 + $0x88] sm:$0xff]  ;;  %v4500_v63 = vpop.f32.mrf.mxu0  ;;  %v3523_v17 = vsel %vm486_vm2, %v3474_v27, 0.0 }
 0x1f6   : > { %v3441_v31 = vadd.f32 %v5532_v15, %v3402_v20  ;;  %3374 = vst.msk [vmem:[#allocation2 + $0xa8] sm:$0xff] %vm486_vm2, %v3342_v12  ;;  %v3347_v49 = vadd.f32 %v4500_v63, %v3315_v32  ;;  %3024 = vst.msk [vmem:[#allocation2 + $0xe8] sm:$0xff] %vm486_vm2, %v2992_v10  ;;  %v3519_v26 = vsel %vm486_vm2, %v3472_v13, 0.0  ;;  %v3475_v58 = vmax.f32 %v3443_v59, 0.0  ;;  %v3314_v16 = vld [vmem:[#allocation2 + $0xc8] sm:$0xff] }
 0x1f7   : > { %v3518_v0 = vadd.f32 %v3517_v33, %v3516_v28  ;;  %v3258_v2 = vpop.f32.mrf.mxu0  ;;  %v3407_v29 = vld [vmem:[#allocation2 + $0xb0] sm:$0xff] }
 0x1f8   : > { %v3473_v30 = vmax.f32 %v3441_v31, 0.0  ;;  %3379 = vst.msk [vmem:[#allocation2 + $0xd0] sm:$0xff] %vm486_vm2, %v3347_v49  ;;  %v3345_v22 = vadd.f32 %v3313_v18, %v3258_v2  ;;  %v3446_v19 = vadd.f32 %v5532_v15, %v3407_v29  ;;  %v3319_v41 = vld [vmem:[#allocation2 + $0xf0] sm:$0xff]  ;;  %v3525_v42 = vsel %vm486_vm2, %v3475_v58, 0.0 }
 0x1f9   : > { %v3520_v34 = vadd.f32 %v3519_v26, %v3518_v0  ;;  %v3405_v36 = vld [vmem:[#allocation2 + $0xa0] sm:$0xff]  ;;  %v4501_v46 = vpop.f32.mrf.mxu0 }
 0x1fa   : > { %v3521_v11 = vsel %vm486_vm2, %v3473_v30, 0.0  ;;  %v3444_v60 = vadd.f32 %v5532_v15, %v3405_v36  ;;  %3377 = vst.msk [vmem:[#allocation2 + $0xc0] sm:$0xff] %vm486_vm2, %v3345_v22  ;;  %v3348_v8 = vadd.f32 %v4501_v46, %v3316_v48  ;;  %v3317_v52 = vld [vmem:[#allocation2 + $0xe0] sm:$0xff]  ;;  %v3478_v61 = vmax.f32 %v3446_v19, 0.0 }
 0x1fb   : > { %v3522_v45 = vadd.f32 %v3521_v11, %v3520_v34  ;;  %v3408_v62 = vld [vmem:[#allocation2 + $0xb8] sm:$0xff]  ;;  %v3261_v1 = vpop.f32.mrf.mxu0 }
 0x1fc   : > { %v3476_v25 = vmax.f32 %v3444_v60, 0.0  ;;  %3380 = vst.msk [vmem:[#allocation2 + $0xd8] sm:$0xff] %vm486_vm2, %v3348_v8  ;;  %v3346_v23 = vadd.f32 %v3314_v16, %v3261_v1  ;;  %v3447_v50 = vadd.f32 %v5532_v15, %v3408_v62  ;;  %v3320_v4 = vld [vmem:[#allocation2 + $0xf8] sm:$0xff]  ;;  %v3531_v24 = vsel %vm486_vm2, %v3478_v61, 0.0 }
 0x1fd   : > { %v3524_v39 = vadd.f32 %v3523_v17, %v3522_v45  ;;  %v3406_v43 = vld [vmem:[#allocation2 + $0xa8] sm:$0xff]  ;;  %v4504_v40 = vpop.f32.mrf.mxu0 }
 0x1fe   : > { %v3445_v35 = vadd.f32 %v5532_v15, %v3406_v43  ;;  %3378 = vst.msk [vmem:[#allocation2 + $0xc8] sm:$0xff] %vm486_vm2, %v3346_v23  ;;  %v3351_v44 = vadd.f32 %v4504_v40, %v3319_v41  ;;  %v3527_v53 = vsel %vm486_vm2, %v3476_v25, 0.0  ;;  %v3479_v5 = vmax.f32 %v3447_v50, 0.0  ;;  %v3318_v21 = vld [vmem:[#allocation2 + $0xe8] sm:$0xff] }
 0x1ff   : > { %v3526_v51 = vadd.f32 %v3525_v42, %v3524_v39  ;;  %v3274_v37 = vpop.f32.mrf.mxu0  ;;  %v3411_v57 = vld [vmem:[#allocation2 + $0xd0] sm:$0xff] }
 0x200   : > { %v3477_v54 = vmax.f32 %v3445_v35, 0.0  ;;  %3383 = vst.msk [vmem:[#allocation2 + $0xf0] sm:$0xff] %vm486_vm2, %v3351_v44  ;;  %v3349_v55 = vadd.f32 %v3317_v52, %v3274_v37  ;;  %v3450_v12 = vadd.f32 %v5532_v15, %v3411_v57  ;;  %v3533_v32 = vsel %vm486_vm2, %v3479_v5, 0.0 }
 0x201   : > { %v3528_v56 = vadd.f32 %v3527_v53, %v3526_v51  ;;  %v3409_v3 = vld [vmem:[#allocation2 + $0xc0] sm:$0xff]  ;;  %v4505_v47 = vpop.f32.mrf.mxu0 }
 0x202   : > { %v3529_v38 = vsel %vm486_vm2, %v3477_v54, 0.0  ;;  %v3448_v6 = vadd.f32 %v5532_v15, %v3409_v3  ;;  %3381 = vst.msk [vmem:[#allocation2 + $0xe0] sm:$0xff] %vm486_vm2, %v3349_v55  ;;  %v3352_v7 = vadd.f32 %v4505_v47, %v3320_v4  ;;  %v3482_v49 = vmax.f32 %v3450_v12, 0.0  ;;  %v3563_v54 = vld [vmem:[%s5700_s4] sm:$0x1] }
 0x203   : > { %v3530_v9 = vadd.f32 %v3529_v38, %v3528_v56  ;;  %v3412_v14 = vld [vmem:[#allocation2 + $0xd8] sm:$0xff]  ;;  %v3277_v13 = vpop.f32.mrf.mxu0 }
 0x204   : > { %v3480_v28 = vmax.f32 %v3448_v6, 0.0  ;;  %3384 = vst.msk [vmem:[#allocation2 + $0xf8] sm:$0xff] %vm486_vm2, %v3352_v7  ;;  %v3350_v20 = vadd.f32 %v3318_v21, %v3277_v13  ;;  %v3451_v33 = vadd.f32 %v5532_v15, %v3412_v14  ;;  %v3539_v46 = vsel %vm486_vm2, %v3482_v49, 0.0 }
 0x205   : > { %v3532_v10 = vadd.f32 %v3531_v24, %v3530_v9  ;;  %v3410_v63 = vld [vmem:[#allocation2 + $0xc8] sm:$0xff] }
 0x206   : > { %v3449_v59 = vadd.f32 %v5532_v15, %v3410_v63  ;;  %3382 = vst.msk [vmem:[#allocation2 + $0xe8] sm:$0xff] %vm486_vm2, %v3350_v20  ;;  %v3535_v0 = vsel %vm486_vm2, %v3480_v28, 0.0  ;;  %v3483_v30 = vmax.f32 %v3451_v33, 0.0 }
 0x207   : > { %v3534_v31 = vadd.f32 %v3533_v32, %v3532_v10  ;;  %v3415_v26 = vld [vmem:[#allocation2 + $0xf0] sm:$0xff] }
 0x208   : > { %v3481_v2 = vmax.f32 %v3449_v59, 0.0  ;;  %v3454_v58 = vadd.f32 %v5532_v15, %v3415_v26  ;;  %v3541_v62 = vsel %vm486_vm2, %v3483_v30, 0.0 }
 0x209   : > { %v3536_v18 = vadd.f32 %v3535_v0, %v3534_v31  ;;  %v3413_v27 = vld [vmem:[#allocation2 + $0xe0] sm:$0xff] }
 0x20a   : > { %v3537_v22 = vsel %vm486_vm2, %v3481_v2, 0.0  ;;  %v3452_v34 = vadd.f32 %v5532_v15, %v3413_v27  ;;  %v3486_v17 = vmax.f32 %v3454_v58, 0.0 }
 0x20b   : > { %v3538_v29 = vadd.f32 %v3537_v22, %v3536_v18  ;;  %v3416_v36 = vld [vmem:[#allocation2 + $0xf8] sm:$0xff] }
 0x20c   : > { %v3484_v48 = vmax.f32 %v3452_v34, 0.0  ;;  %v3455_v45 = vadd.f32 %v5532_v15, %v3416_v36  ;;  %v3547_v40 = vsel %vm486_vm2, %v3486_v17, 0.0 }
 0x20d   : > { %v3414_v11 = vld [vmem:[#allocation2 + $0xe8] sm:$0xff]  ;;  %v3540_v60 = vadd.f32 %v3539_v46, %v3538_v29 }
 0x20e   : > { %v3453_v8 = vadd.f32 %v5532_v15, %v3414_v11  ;;  %v3543_v19 = vsel %vm486_vm2, %v3484_v48, 0.0  ;;  %v3487_v23 = vmax.f32 %v3455_v45, 0.0 }
 0x20f   : > { %v3542_v1 = vadd.f32 %v3541_v62, %v3540_v60 }
 0x210   : > { %v3485_v16 = vmax.f32 %v3453_v8, 0.0  ;;  %v3549_v42 = vsel %vm486_vm2, %v3487_v23, 0.0 }
 0x211   : > { %v3544_v25 = vadd.f32 %v3543_v19, %v3542_v1 }
 0x212   : > { %v3545_v39 = vsel %vm486_vm2, %v3485_v16, 0.0 }
 0x213   : > { %v3546_v43 = vadd.f32 %v3545_v39, %v3544_v25 }
 0x215   : > { %v3548_v41 = vadd.f32 %v3547_v40, %v3546_v43 }
 0x217   : > { %v3550_v15 = vadd.f32 %v3549_v42, %v3548_v41 }
 0x219   : > { %v3551_v50 = vrot.slane %v3550_v15, 4 }
 0x21b   : > { %v3552_v35 = vadd.f32 %v3551_v50, %v3550_v15 }
 0x21d   : > { %v3553_v44 = vrot.slane %v3552_v35, 2 }
 0x21f   : > { %v3554_v51 = vadd.f32 %v3553_v44, %v3552_v35 }
 0x221   : > { %v3555_v37 = vrot.slane %v3554_v51, 1 }
 0x223   : > { %v3556_v52 = vadd.f32 %v3555_v37, %v3554_v51 }
 0x225   : > { %v3557_v61 = vmul.f32 0.00390625, %v3556_v52 }
 0x227   : > { %v3558_v53 = vpack.c.bf16 %v3557_v61, %v3557_v61 }
 0x229   : > { %4511 = vmatmul.mubr.msk.bf16.vlgmr.msra.gmra.mxu1 %vm486_vm2, %v3558_v53 }
 0x2e9   : > { %v3613_v55 = vpop.f32.mrf.mxu1 }
 0x2ea   : > { %v3614_v56 = vadd.f32 %v3613_v55, %v3563_v54 }
 0x2eb   : > { %v4512_v57 = vpop.f32.mrf.mxu1 }
 0x2ec   : > { %3619 = vst [vmem:[%s216_s6] sm:$0x1] %v3614_v56 }
 0x2ed   : > { %v3616_v3 = vpop.f32.mrf.mxu1 }
 0x2ee   : > { %4583 = shalt.err (!%p4580_p3)
}
 0x2ef   : > { %s4584_s15 = scalar_lea.hbm %s5655_s10, 16  ;;  %s4588_s23 = scalar_lea.hbm %s5701_s5, 32 }
 0x2f0   : > { %p4585_p4 = scmp.ne.s32.totalorder %s5655_s10, %s4584_s15  ;;  %p4589_p9 = scmp.lt.s32.totalorder %s5655_s10, %s5701_s5 }
 0x2f1   : > { %p4590_p10 = scmp.lt.s32.totalorder %s4588_s23, %s4584_s15 }
 0x2f2   : > { %p4586_p7 = pnand %p4585_p4, %p4703_p5 }
 0x2f3   : > { %p4591_p11 = por %p4590_p10, %p4589_p9 }
 0x2f4   : > { %p4587_p8 = pneg %p4586_p7 }
 0x2f6   : > { %p4592_p12 = pnand %p4591_p11, %p4587_p8 }
 0x2f8   : > { %4595 = shalt.err (!%p4592_p12)
}
 0x2f9   : > { %4527 = dma.vmem_to_hbm [thread:$0]  (%p4703_p5), %s5657_s7, 16, %s5655_s10, %s3621_s11   ;;  %v4513_v47 = vpop.f32.mrf.mxu1 }
 0x2fa PF: > { %p4533_p13 = scmp.ge.s32.totalorder %s4630_s21, 2  ;;  %s3645_s30 = sand.u32 1, %s4618_s18  }
 0x2fb   : > { %s3646_s6 = scalar_lea.sflag [#allocation4], %s3645_s30 }
 0x2fc   : > { %p4530_p0 = pnand %p4533_p13, %p4707_p6 }
 0x2fe   : > { %p4531_p1 = pneg %p4530_p0 }
 0x300   : > { %4613 = dma.done.wait (%p4531_p1), %s3646_s6, 16  }
 0x301   : > { %4615 = vsyncadd (%p4531_p1), %s3646_s6, 4294967280  ;;  %p15_p2 = scmp.ge.s32.totalorder %s4690_s24, 4   ;;  %s5704_s18 = smov %s4622_s19 }
 0x302   : > { %s5705_s19 = smov %s4626_s20  ;;  %s5706_s20 = smov %s4701_s27 }
 0x303   : > { %s5707_s21 = smov %s4690_s24  ;;  %17 = sbr.rel (!%p15_p2) target bundleno = 3 (0x3), region = 85 }
 0x308   :  { %3650 = vsyncpa [#allocation4], 1 }
 0x309   :  { %3652 = vsyncpa [#allocation4 + $0x1], 1 }

</bundles_post_ra>
